<compile_context>
chip_gen: v7x
topology: tpu7x:2x2x1
jax: 0.10.0
libtpu: 0.0.40
codegen_flags: <defaults>
</compile_context>

<pallas_src>
import functools

import jax
import jax.numpy as jnp
from jax import lax
from jax.experimental import pallas as pl
from jax.experimental.pallas import tpu as pltpu


# ---------------------------------------------------------------------------
# Fused multi-atrous kernel: one program per batch element.
#   xpad_ref : (1, Hp, Wp, Cin)          zero-padded NHWC input (pad = max rate)
#   w_dil_ref: (n_rates, 9, Cin, Cout)   3x3 dilated-conv weights, tap-major
#   w_gap_ref: (Cin, Cout)               1x1 conv weights
#   b_ref    : (1, (n_rates+1)*Cout)     all biases, concatenated branch order
#   out_ref  : (1, H, W, (n_rates+1)*Cout)
# ---------------------------------------------------------------------------
def _multi_atrous_kernel(xpad_ref, w_dil_ref, w_gap_ref, b_ref, out_ref, *,
                         dilation_rates, pad, H, W, Cin, Cout):
    x = xpad_ref[0]        # (Hp, Wp, Cin)
    bias = b_ref[...]      # (1, n_branches*Cout)
    n_rates = len(dilation_rates)

    # --- dilated 3x3 branches --------------------------------------------
    for bi, rate in enumerate(dilation_rates):
        acc = jnp.zeros((H * W, Cout), jnp.float32)
        for ky in range(3):
            for kx in range(3):
                y0 = pad + (ky - 1) * rate          # static offsets
                x0 = pad + (kx - 1) * rate
                patch = x[y0:y0 + H, x0:x0 + W, :].reshape(H * W, Cin)
                w_tap = w_dil_ref[bi, ky * 3 + kx]  # (Cin, Cout)
                acc = acc + jnp.dot(patch, w_tap,
                                    preferred_element_type=jnp.float32)
        c0 = bi * Cout
        acc = acc + bias[:, c0:c0 + Cout]           # fused bias epilogue
        out_ref[0, :, :, c0:c0 + Cout] = acc.reshape(H, W, Cout).astype(out_ref.dtype)

    # --- 1x1 "gap" branch --------------------------------------------------
    center = x[pad:pad + H, pad:pad + W, :].reshape(H * W, Cin)
    acc = jnp.dot(center, w_gap_ref[...], preferred_element_type=jnp.float32)
    c0 = n_rates * Cout
    acc = acc + bias[:, c0:c0 + Cout]
    out_ref[0, :, :, c0:] = acc.reshape(H, W, Cout).astype(out_ref.dtype)


# ---------------------------------------------------------------------------
# Wrapper (NCHW in / NCHW out, matching the PyTorch module)
# ---------------------------------------------------------------------------
def multi_atrous_forward(x_nchw, params, dilation_rates=(3, 6, 9)):
    B, Cin, H, W = x_nchw.shape
    Cout = params["w_gap"].shape[1]
    n_branches = len(dilation_rates) + 1
    n_out = n_branches * Cout
    pad = max(dilation_rates)

    # NCHW -> NHWC (channels on the lane axis) and pad once with the max rate.
    x_nhwc = jnp.transpose(x_nchw, (0, 2, 3, 1))
    xpad = jnp.pad(x_nhwc, ((0, 0), (pad, pad), (pad, pad), (0, 0)))
    Hp, Wp = H + 2 * pad, W + 2 * pad

    kernel = functools.partial(
        _multi_atrous_kernel,
        dilation_rates=tuple(dilation_rates),
        pad=pad, H=H, W=W, Cin=Cin, Cout=Cout)

    out_nhwc = pl.pallas_call(
        kernel,
        out_shape=jax.ShapeDtypeStruct((B, H, W, n_out), x_nchw.dtype),
        grid=(B,),
        in_specs=[
            pl.BlockSpec((1, Hp, Wp, Cin), lambda b: (b, 0, 0, 0)),
            pl.BlockSpec(params["w_dil"].shape, lambda b: (0, 0, 0, 0)),
            pl.BlockSpec(params["w_gap"].shape, lambda b: (0, 0)),
            pl.BlockSpec((1, n_out), lambda b: (0, 0)),
        ],
        out_specs=pl.BlockSpec((1, H, W, n_out), lambda b: (b, 0, 0, 0)),
        compiler_params=pltpu.CompilerParams(
            dimension_semantics=("parallel",)),
    )(xpad, params["w_dil"], params["w_gap"], params["b_all"])

    # Back to the module's NCHW output layout.
    return jnp.transpose(out_nhwc, (0, 3, 1, 2))


# ---------------------------------------------------------------------------
# One-time parameter re-packing from PyTorch Conv2d layout -> kernel layout.
# (Runs once outside the forward; no per-call weight transposes.)
# ---------------------------------------------------------------------------
def prepare_params(torch_params):
    w_dil = jnp.stack(
        [jnp.transpose(w, (2, 3, 1, 0)).reshape(9, w.shape[1], w.shape[0])
         for w in torch_params["w_dil_list"]],
        axis=0)                                              # (n_rates, 9, Cin, Cout)
    w_gap = jnp.transpose(torch_params["w_gap"][:, :, 0, 0], (1, 0))  # (Cin, Cout)
    b_all = jnp.concatenate(
        list(torch_params["b_dil_list"]) + [torch_params["b_gap"]]).reshape(1, -1)
    return {"w_dil": w_dil, "w_gap": w_gap, "b_all": b_all}


# ---------------------------------------------------------------------------
# Pure-JAX reference (lax.conv_general_dilated) for correctness checking
# ---------------------------------------------------------------------------
def multi_atrous_reference(x_nchw, torch_params, dilation_rates=(3, 6, 9)):
    outs = []
    for w, b, r in zip(torch_params["w_dil_list"], torch_params["b_dil_list"],
                       dilation_rates):
        o = lax.conv_general_dilated(
            x_nchw, w, window_strides=(1, 1),
            padding=((r, r), (r, r)), rhs_dilation=(r, r),
            dimension_numbers=("NCHW", "OIHW", "NCHW"))
        outs.append(o + b[None, :, None, None])
    o = lax.conv_general_dilated(
        x_nchw, torch_params["w_gap"], window_strides=(1, 1),
        padding=((0, 0), (0, 0)),
        dimension_numbers=("NCHW", "OIHW", "NCHW"))
    outs.append(o + torch_params["b_gap"][None, :, None, None])
    return jnp.concatenate(outs, axis=1)


if __name__ == "__main__":
    # Small shapes consistent with the module: B=2, Cin=4, H=W=16, Cout=8.
    B, Cin, H, W = 2, 4, 16, 16
    Cout = 8
    rates = (3, 6, 9)
    n_r = len(rates)

    key = jax.random.PRNGKey(0)
    keys = jax.random.split(key, 3 + 2 * n_r)

    x = jax.random.normal(keys[0], (B, Cin, H, W), dtype=jnp.float32)

    torch_params = {
        # PyTorch Conv2d layout: weight (Cout, Cin, kh, kw), bias (Cout,)
        "w_dil_list": [
            jax.random.normal(keys[1 + i], (Cout, Cin, 3, 3), jnp.float32) * 0.1
            for i in range(n_r)
        ],
        "b_dil_list": [
            jax.random.normal(keys[1 + n_r + i], (Cout,), jnp.float32) * 0.1
            for i in range(n_r)
        ],
        "w_gap": jax.random.normal(keys[1 + 2 * n_r], (Cout, Cin, 1, 1),
                                   jnp.float32) * 0.1,
        "b_gap": jax.random.normal(keys[2 + 2 * n_r], (Cout,),
                                   jnp.float32) * 0.1,
    }

    params = prepare_params(torch_params)

    out = multi_atrous_forward(x, params, rates)
    out = jax.block_until_ready(out)

    ref = multi_atrous_reference(x, torch_params, rates)
    assert out.shape == (B, (n_r + 1) * Cout, H, W), out.shape
    assert jnp.allclose(out, ref, atol=1e-4, rtol=1e-4), "mismatch vs reference"

    print("KERNEL_OK")
</pallas_src>

<mosaic_0001>
module attributes {stable_mosaic.version = 11 : i64} {
  func.func @_multi_atrous_kernel(%arg0: i32, %arg1: memref<1x34x34x4xf32, #tpu.memory_space<vmem>>, %arg2: memref<3x9x4x8xf32, #tpu.memory_space<vmem>>, %arg3: memref<4x8xf32, #tpu.memory_space<vmem>>, %arg4: memref<1x32xf32, #tpu.memory_space<vmem>>, %arg5: memref<1x16x16x32xf32, #tpu.memory_space<vmem>>) attributes {dimension_semantics = [#tpu.dimension_semantics<parallel>], iteration_bounds = array<i64: 2>, scalar_prefetch = 0 : i64, scratch_operands = 0 : i64, tpu.core_type = #tpu.core_type<tc>, window_params = [{transform_indices = @transform_0, window_bounds = array<i64: 1, 34, 34, 4>}, {pipeline_mode = #tpu.pipeline_mode<synchronous>, transform_indices = @transform_1, window_bounds = array<i64: 3, 9, 4, 8>}, {pipeline_mode = #tpu.pipeline_mode<synchronous>, transform_indices = @transform_2, window_bounds = array<i64: 4, 8>}, {pipeline_mode = #tpu.pipeline_mode<synchronous>, transform_indices = @transform_3, window_bounds = array<i64: 1, 32>}, {transform_indices = @transform_4, window_bounds = array<i64: 1, 16, 16, 32>}]} {
    %c0 = arith.constant 0 : index
    %c0_0 = arith.constant 0 : index
    %c0_1 = arith.constant 0 : index
    %c0_2 = arith.constant 0 : index
    %0 = vector.load %arg1[%c0, %c0_0, %c0_1, %c0_2] : memref<1x34x34x4xf32, #tpu.memory_space<vmem>>, vector<1x34x34x4xf32>
    %1 = vector.shape_cast %0 : vector<1x34x34x4xf32> to vector<34x34x4xf32>
    %c0_3 = arith.constant 0 : index
    %c0_4 = arith.constant 0 : index
    %2 = vector.load %arg4[%c0_3, %c0_4] : memref<1x32xf32, #tpu.memory_space<vmem>>, vector<1x32xf32>
    %cst = arith.constant 0.000000e+00 : f32
    %3 = vector.broadcast %cst : f32 to vector<256x8xf32>
    %4 = vector.extract_strided_slice %1 {offsets = [6, 6, 0], sizes = [16, 16, 4], strides = [1, 1, 1]} : vector<34x34x4xf32> to vector<16x16x4xf32>
    %5 = vector.shape_cast %4 : vector<16x16x4xf32> to vector<256x4xf32>
    %c0_5 = arith.constant 0 : index
    %c0_6 = arith.constant 0 : index
    %c0_7 = arith.constant 0 : index
    %c0_8 = arith.constant 0 : index
    %6 = vector.load %arg2[%c0_5, %c0_6, %c0_7, %c0_8] : memref<3x9x4x8xf32, #tpu.memory_space<vmem>>, vector<1x1x4x8xf32>
    %7 = vector.shape_cast %6 : vector<1x1x4x8xf32> to vector<4x8xf32>
    %cst_9 = arith.constant dense<0.000000e+00> : vector<256x8xf32>
    %8 = tpu.matmul %5, %7, %cst_9 {dimension_numbers = #tpu.dot_dimension_numbers<[1], [0], [0], [1], [0, 0, 1, 1], [], []>} : vector<256x4xf32>, vector<4x8xf32>, vector<256x8xf32> -> vector<256x8xf32>
    %9 = arith.addf %3, %8 : vector<256x8xf32>
    %10 = vector.extract_strided_slice %1 {offsets = [6, 9, 0], sizes = [16, 16, 4], strides = [1, 1, 1]} : vector<34x34x4xf32> to vector<16x16x4xf32>
    %11 = vector.shape_cast %10 : vector<16x16x4xf32> to vector<256x4xf32>
    %c0_10 = arith.constant 0 : index
    %c1 = arith.constant 1 : index
    %c0_11 = arith.constant 0 : index
    %c0_12 = arith.constant 0 : index
    %12 = vector.load %arg2[%c0_10, %c1, %c0_11, %c0_12] : memref<3x9x4x8xf32, #tpu.memory_space<vmem>>, vector<1x1x4x8xf32>
    %13 = vector.shape_cast %12 : vector<1x1x4x8xf32> to vector<4x8xf32>
    %cst_13 = arith.constant dense<0.000000e+00> : vector<256x8xf32>
    %14 = tpu.matmul %11, %13, %cst_13 {dimension_numbers = #tpu.dot_dimension_numbers<[1], [0], [0], [1], [0, 0, 1, 1], [], []>} : vector<256x4xf32>, vector<4x8xf32>, vector<256x8xf32> -> vector<256x8xf32>
    %15 = arith.addf %9, %14 : vector<256x8xf32>
    %16 = vector.extract_strided_slice %1 {offsets = [6, 12, 0], sizes = [16, 16, 4], strides = [1, 1, 1]} : vector<34x34x4xf32> to vector<16x16x4xf32>
    %17 = vector.shape_cast %16 : vector<16x16x4xf32> to vector<256x4xf32>
    %c0_14 = arith.constant 0 : index
    %c2 = arith.constant 2 : index
    %c0_15 = arith.constant 0 : index
    %c0_16 = arith.constant 0 : index
    %18 = vector.load %arg2[%c0_14, %c2, %c0_15, %c0_16] : memref<3x9x4x8xf32, #tpu.memory_space<vmem>>, vector<1x1x4x8xf32>
    %19 = vector.shape_cast %18 : vector<1x1x4x8xf32> to vector<4x8xf32>
    %cst_17 = arith.constant dense<0.000000e+00> : vector<256x8xf32>
    %20 = tpu.matmul %17, %19, %cst_17 {dimension_numbers = #tpu.dot_dimension_numbers<[1], [0], [0], [1], [0, 0, 1, 1], [], []>} : vector<256x4xf32>, vector<4x8xf32>, vector<256x8xf32> -> vector<256x8xf32>
    %21 = arith.addf %15, %20 : vector<256x8xf32>
    %22 = vector.extract_strided_slice %1 {offsets = [9, 6, 0], sizes = [16, 16, 4], strides = [1, 1, 1]} : vector<34x34x4xf32> to vector<16x16x4xf32>
    %23 = vector.shape_cast %22 : vector<16x16x4xf32> to vector<256x4xf32>
    %c0_18 = arith.constant 0 : index
    %c3 = arith.constant 3 : index
    %c0_19 = arith.constant 0 : index
    %c0_20 = arith.constant 0 : index
    %24 = vector.load %arg2[%c0_18, %c3, %c0_19, %c0_20] : memref<3x9x4x8xf32, #tpu.memory_space<vmem>>, vector<1x1x4x8xf32>
    %25 = vector.shape_cast %24 : vector<1x1x4x8xf32> to vector<4x8xf32>
    %cst_21 = arith.constant dense<0.000000e+00> : vector<256x8xf32>
    %26 = tpu.matmul %23, %25, %cst_21 {dimension_numbers = #tpu.dot_dimension_numbers<[1], [0], [0], [1], [0, 0, 1, 1], [], []>} : vector<256x4xf32>, vector<4x8xf32>, vector<256x8xf32> -> vector<256x8xf32>
    %27 = arith.addf %21, %26 : vector<256x8xf32>
    %28 = vector.extract_strided_slice %1 {offsets = [9, 9, 0], sizes = [16, 16, 4], strides = [1, 1, 1]} : vector<34x34x4xf32> to vector<16x16x4xf32>
    %29 = vector.shape_cast %28 : vector<16x16x4xf32> to vector<256x4xf32>
    %c0_22 = arith.constant 0 : index
    %c4 = arith.constant 4 : index
    %c0_23 = arith.constant 0 : index
    %c0_24 = arith.constant 0 : index
    %30 = vector.load %arg2[%c0_22, %c4, %c0_23, %c0_24] : memref<3x9x4x8xf32, #tpu.memory_space<vmem>>, vector<1x1x4x8xf32>
    %31 = vector.shape_cast %30 : vector<1x1x4x8xf32> to vector<4x8xf32>
    %cst_25 = arith.constant dense<0.000000e+00> : vector<256x8xf32>
    %32 = tpu.matmul %29, %31, %cst_25 {dimension_numbers = #tpu.dot_dimension_numbers<[1], [0], [0], [1], [0, 0, 1, 1], [], []>} : vector<256x4xf32>, vector<4x8xf32>, vector<256x8xf32> -> vector<256x8xf32>
    %33 = arith.addf %27, %32 : vector<256x8xf32>
    %34 = vector.extract_strided_slice %1 {offsets = [9, 12, 0], sizes = [16, 16, 4], strides = [1, 1, 1]} : vector<34x34x4xf32> to vector<16x16x4xf32>
    %35 = vector.shape_cast %34 : vector<16x16x4xf32> to vector<256x4xf32>
    %c0_26 = arith.constant 0 : index
    %c5 = arith.constant 5 : index
    %c0_27 = arith.constant 0 : index
    %c0_28 = arith.constant 0 : index
    %36 = vector.load %arg2[%c0_26, %c5, %c0_27, %c0_28] : memref<3x9x4x8xf32, #tpu.memory_space<vmem>>, vector<1x1x4x8xf32>
    %37 = vector.shape_cast %36 : vector<1x1x4x8xf32> to vector<4x8xf32>
    %cst_29 = arith.constant dense<0.000000e+00> : vector<256x8xf32>
    %38 = tpu.matmul %35, %37, %cst_29 {dimension_numbers = #tpu.dot_dimension_numbers<[1], [0], [0], [1], [0, 0, 1, 1], [], []>} : vector<256x4xf32>, vector<4x8xf32>, vector<256x8xf32> -> vector<256x8xf32>
    %39 = arith.addf %33, %38 : vector<256x8xf32>
    %40 = vector.extract_strided_slice %1 {offsets = [12, 6, 0], sizes = [16, 16, 4], strides = [1, 1, 1]} : vector<34x34x4xf32> to vector<16x16x4xf32>
    %41 = vector.shape_cast %40 : vector<16x16x4xf32> to vector<256x4xf32>
    %c0_30 = arith.constant 0 : index
    %c6 = arith.constant 6 : index
    %c0_31 = arith.constant 0 : index
    %c0_32 = arith.constant 0 : index
    %42 = vector.load %arg2[%c0_30, %c6, %c0_31, %c0_32] : memref<3x9x4x8xf32, #tpu.memory_space<vmem>>, vector<1x1x4x8xf32>
    %43 = vector.shape_cast %42 : vector<1x1x4x8xf32> to vector<4x8xf32>
    %cst_33 = arith.constant dense<0.000000e+00> : vector<256x8xf32>
    %44 = tpu.matmul %41, %43, %cst_33 {dimension_numbers = #tpu.dot_dimension_numbers<[1], [0], [0], [1], [0, 0, 1, 1], [], []>} : vector<256x4xf32>, vector<4x8xf32>, vector<256x8xf32> -> vector<256x8xf32>
    %45 = arith.addf %39, %44 : vector<256x8xf32>
    %46 = vector.extract_strided_slice %1 {offsets = [12, 9, 0], sizes = [16, 16, 4], strides = [1, 1, 1]} : vector<34x34x4xf32> to vector<16x16x4xf32>
    %47 = vector.shape_cast %46 : vector<16x16x4xf32> to vector<256x4xf32>
    %c0_34 = arith.constant 0 : index
    %c7 = arith.constant 7 : index
    %c0_35 = arith.constant 0 : index
    %c0_36 = arith.constant 0 : index
    %48 = vector.load %arg2[%c0_34, %c7, %c0_35, %c0_36] : memref<3x9x4x8xf32, #tpu.memory_space<vmem>>, vector<1x1x4x8xf32>
    %49 = vector.shape_cast %48 : vector<1x1x4x8xf32> to vector<4x8xf32>
    %cst_37 = arith.constant dense<0.000000e+00> : vector<256x8xf32>
    %50 = tpu.matmul %47, %49, %cst_37 {dimension_numbers = #tpu.dot_dimension_numbers<[1], [0], [0], [1], [0, 0, 1, 1], [], []>} : vector<256x4xf32>, vector<4x8xf32>, vector<256x8xf32> -> vector<256x8xf32>
    %51 = arith.addf %45, %50 : vector<256x8xf32>
    %52 = vector.extract_strided_slice %1 {offsets = [12, 12, 0], sizes = [16, 16, 4], strides = [1, 1, 1]} : vector<34x34x4xf32> to vector<16x16x4xf32>
    %53 = vector.shape_cast %52 : vector<16x16x4xf32> to vector<256x4xf32>
    %c0_38 = arith.constant 0 : index
    %c8 = arith.constant 8 : index
    %c0_39 = arith.constant 0 : index
    %c0_40 = arith.constant 0 : index
    %54 = vector.load %arg2[%c0_38, %c8, %c0_39, %c0_40] : memref<3x9x4x8xf32, #tpu.memory_space<vmem>>, vector<1x1x4x8xf32>
    %55 = vector.shape_cast %54 : vector<1x1x4x8xf32> to vector<4x8xf32>
    %cst_41 = arith.constant dense<0.000000e+00> : vector<256x8xf32>
    %56 = tpu.matmul %53, %55, %cst_41 {dimension_numbers = #tpu.dot_dimension_numbers<[1], [0], [0], [1], [0, 0, 1, 1], [], []>} : vector<256x4xf32>, vector<4x8xf32>, vector<256x8xf32> -> vector<256x8xf32>
    %57 = arith.addf %51, %56 : vector<256x8xf32>
    %58 = vector.extract_strided_slice %2 {offsets = [0, 0], sizes = [1, 8], strides = [1, 1]} : vector<1x32xf32> to vector<1x8xf32>
    %59 = vector.broadcast %58 : vector<1x8xf32> to vector<256x8xf32>
    %60 = arith.addf %57, %59 : vector<256x8xf32>
    %61 = vector.shape_cast %60 : vector<256x8xf32> to vector<16x16x8xf32>
    %c0_42 = arith.constant 0 : index
    %c0_43 = arith.constant 0 : index
    %c0_44 = arith.constant 0 : index
    %c0_45 = arith.constant 0 : index
    %62 = vector.load %arg5[%c0_42, %c0_43, %c0_44, %c0_45] : memref<1x16x16x32xf32, #tpu.memory_space<vmem>>, vector<1x16x16x8xf32>
    %63 = vector.shape_cast %62 : vector<1x16x16x8xf32> to vector<16x16x8xf32>
    %64 = vector.shape_cast %61 : vector<16x16x8xf32> to vector<1x16x16x8xf32>
    tpu.vector_store %arg5[%c0_42, %c0_43, %c0_44, %c0_45], %64 {strides = array<i32>} : memref<1x16x16x32xf32, #tpu.memory_space<vmem>>, vector<1x16x16x8xf32>,
    %cst_46 = arith.constant 0.000000e+00 : f32
    %65 = vector.broadcast %cst_46 : f32 to vector<256x8xf32>
    %66 = vector.extract_strided_slice %1 {offsets = [3, 3, 0], sizes = [16, 16, 4], strides = [1, 1, 1]} : vector<34x34x4xf32> to vector<16x16x4xf32>
    %67 = vector.shape_cast %66 : vector<16x16x4xf32> to vector<256x4xf32>
    %c1_47 = arith.constant 1 : index
    %c0_48 = arith.constant 0 : index
    %c0_49 = arith.constant 0 : index
    %c0_50 = arith.constant 0 : index
    %68 = vector.load %arg2[%c1_47, %c0_48, %c0_49, %c0_50] : memref<3x9x4x8xf32, #tpu.memory_space<vmem>>, vector<1x1x4x8xf32>
    %69 = vector.shape_cast %68 : vector<1x1x4x8xf32> to vector<4x8xf32>
    %cst_51 = arith.constant dense<0.000000e+00> : vector<256x8xf32>
    %70 = tpu.matmul %67, %69, %cst_51 {dimension_numbers = #tpu.dot_dimension_numbers<[1], [0], [0], [1], [0, 0, 1, 1], [], []>} : vector<256x4xf32>, vector<4x8xf32>, vector<256x8xf32> -> vector<256x8xf32>
    %71 = arith.addf %65, %70 : vector<256x8xf32>
    %72 = vector.extract_strided_slice %1 {offsets = [3, 9, 0], sizes = [16, 16, 4], strides = [1, 1, 1]} : vector<34x34x4xf32> to vector<16x16x4xf32>
    %73 = vector.shape_cast %72 : vector<16x16x4xf32> to vector<256x4xf32>
    %c1_52 = arith.constant 1 : index
    %c1_53 = arith.constant 1 : index
    %c0_54 = arith.constant 0 : index
    %c0_55 = arith.constant 0 : index
    %74 = vector.load %arg2[%c1_52, %c1_53, %c0_54, %c0_55] : memref<3x9x4x8xf32, #tpu.memory_space<vmem>>, vector<1x1x4x8xf32>
    %75 = vector.shape_cast %74 : vector<1x1x4x8xf32> to vector<4x8xf32>
    %cst_56 = arith.constant dense<0.000000e+00> : vector<256x8xf32>
    %76 = tpu.matmul %73, %75, %cst_56 {dimension_numbers = #tpu.dot_dimension_numbers<[1], [0], [0], [1], [0, 0, 1, 1], [], []>} : vector<256x4xf32>, vector<4x8xf32>, vector<256x8xf32> -> vector<256x8xf32>
    %77 = arith.addf %71, %76 : vector<256x8xf32>
    %78 = vector.extract_strided_slice %1 {offsets = [3, 15, 0], sizes = [16, 16, 4], strides = [1, 1, 1]} : vector<34x34x4xf32> to vector<16x16x4xf32>
    %79 = vector.shape_cast %78 : vector<16x16x4xf32> to vector<256x4xf32>
    %c1_57 = arith.constant 1 : index
    %c2_58 = arith.constant 2 : index
    %c0_59 = arith.constant 0 : index
    %c0_60 = arith.constant 0 : index
    %80 = vector.load %arg2[%c1_57, %c2_58, %c0_59, %c0_60] : memref<3x9x4x8xf32, #tpu.memory_space<vmem>>, vector<1x1x4x8xf32>
    %81 = vector.shape_cast %80 : vector<1x1x4x8xf32> to vector<4x8xf32>
    %cst_61 = arith.constant dense<0.000000e+00> : vector<256x8xf32>
    %82 = tpu.matmul %79, %81, %cst_61 {dimension_numbers = #tpu.dot_dimension_numbers<[1], [0], [0], [1], [0, 0, 1, 1], [], []>} : vector<256x4xf32>, vector<4x8xf32>, vector<256x8xf32> -> vector<256x8xf32>
    %83 = arith.addf %77, %82 : vector<256x8xf32>
    %84 = vector.extract_strided_slice %1 {offsets = [9, 3, 0], sizes = [16, 16, 4], strides = [1, 1, 1]} : vector<34x34x4xf32> to vector<16x16x4xf32>
    %85 = vector.shape_cast %84 : vector<16x16x4xf32> to vector<256x4xf32>
    %c1_62 = arith.constant 1 : index
    %c3_63 = arith.constant 3 : index
    %c0_64 = arith.constant 0 : index
    %c0_65 = arith.constant 0 : index
    %86 = vector.load %arg2[%c1_62, %c3_63, %c0_64, %c0_65] : memref<3x9x4x8xf32, #tpu.memory_space<vmem>>, vector<1x1x4x8xf32>
    %87 = vector.shape_cast %86 : vector<1x1x4x8xf32> to vector<4x8xf32>
    %cst_66 = arith.constant dense<0.000000e+00> : vector<256x8xf32>
    %88 = tpu.matmul %85, %87, %cst_66 {dimension_numbers = #tpu.dot_dimension_numbers<[1], [0], [0], [1], [0, 0, 1, 1], [], []>} : vector<256x4xf32>, vector<4x8xf32>, vector<256x8xf32> -> vector<256x8xf32>
    %89 = arith.addf %83, %88 : vector<256x8xf32>
    %90 = vector.extract_strided_slice %1 {offsets = [9, 9, 0], sizes = [16, 16, 4], strides = [1, 1, 1]} : vector<34x34x4xf32> to vector<16x16x4xf32>
    %91 = vector.shape_cast %90 : vector<16x16x4xf32> to vector<256x4xf32>
    %c1_67 = arith.constant 1 : index
    %c4_68 = arith.constant 4 : index
    %c0_69 = arith.constant 0 : index
    %c0_70 = arith.constant 0 : index
    %92 = vector.load %arg2[%c1_67, %c4_68, %c0_69, %c0_70] : memref<3x9x4x8xf32, #tpu.memory_space<vmem>>, vector<1x1x4x8xf32>
    %93 = vector.shape_cast %92 : vector<1x1x4x8xf32> to vector<4x8xf32>
    %cst_71 = arith.constant dense<0.000000e+00> : vector<256x8xf32>
    %94 = tpu.matmul %91, %93, %cst_71 {dimension_numbers = #tpu.dot_dimension_numbers<[1], [0], [0], [1], [0, 0, 1, 1], [], []>} : vector<256x4xf32>, vector<4x8xf32>, vector<256x8xf32> -> vector<256x8xf32>
    %95 = arith.addf %89, %94 : vector<256x8xf32>
    %96 = vector.extract_strided_slice %1 {offsets = [9, 15, 0], sizes = [16, 16, 4], strides = [1, 1, 1]} : vector<34x34x4xf32> to vector<16x16x4xf32>
    %97 = vector.shape_cast %96 : vector<16x16x4xf32> to vector<256x4xf32>
    %c1_72 = arith.constant 1 : index
    %c5_73 = arith.constant 5 : index
    %c0_74 = arith.constant 0 : index
    %c0_75 = arith.constant 0 : index
    %98 = vector.load %arg2[%c1_72, %c5_73, %c0_74, %c0_75] : memref<3x9x4x8xf32, #tpu.memory_space<vmem>>, vector<1x1x4x8xf32>
    %99 = vector.shape_cast %98 : vector<1x1x4x8xf32> to vector<4x8xf32>
    %cst_76 = arith.constant dense<0.000000e+00> : vector<256x8xf32>
    %100 = tpu.matmul %97, %99, %cst_76 {dimension_numbers = #tpu.dot_dimension_numbers<[1], [0], [0], [1], [0, 0, 1, 1], [], []>} : vector<256x4xf32>, vector<4x8xf32>, vector<256x8xf32> -> vector<256x8xf32>
    %101 = arith.addf %95, %100 : vector<256x8xf32>
    %102 = vector.extract_strided_slice %1 {offsets = [15, 3, 0], sizes = [16, 16, 4], strides = [1, 1, 1]} : vector<34x34x4xf32> to vector<16x16x4xf32>
    %103 = vector.shape_cast %102 : vector<16x16x4xf32> to vector<256x4xf32>
    %c1_77 = arith.constant 1 : index
    %c6_78 = arith.constant 6 : index
    %c0_79 = arith.constant 0 : index
    %c0_80 = arith.constant 0 : index
    %104 = vector.load %arg2[%c1_77, %c6_78, %c0_79, %c0_80] : memref<3x9x4x8xf32, #tpu.memory_space<vmem>>, vector<1x1x4x8xf32>
    %105 = vector.shape_cast %104 : vector<1x1x4x8xf32> to vector<4x8xf32>
    %cst_81 = arith.constant dense<0.000000e+00> : vector<256x8xf32>
    %106 = tpu.matmul %103, %105, %cst_81 {dimension_numbers = #tpu.dot_dimension_numbers<[1], [0], [0], [1], [0, 0, 1, 1], [], []>} : vector<256x4xf32>, vector<4x8xf32>, vector<256x8xf32> -> vector<256x8xf32>
    %107 = arith.addf %101, %106 : vector<256x8xf32>
    %108 = vector.extract_strided_slice %1 {offsets = [15, 9, 0], sizes = [16, 16, 4], strides = [1, 1, 1]} : vector<34x34x4xf32> to vector<16x16x4xf32>
    %109 = vector.shape_cast %108 : vector<16x16x4xf32> to vector<256x4xf32>
    %c1_82 = arith.constant 1 : index
    %c7_83 = arith.constant 7 : index
    %c0_84 = arith.constant 0 : index
    %c0_85 = arith.constant 0 : index
    %110 = vector.load %arg2[%c1_82, %c7_83, %c0_84, %c0_85] : memref<3x9x4x8xf32, #tpu.memory_space<vmem>>, vector<1x1x4x8xf32>
    %111 = vector.shape_cast %110 : vector<1x1x4x8xf32> to vector<4x8xf32>
    %cst_86 = arith.constant dense<0.000000e+00> : vector<256x8xf32>
    %112 = tpu.matmul %109, %111, %cst_86 {dimension_numbers = #tpu.dot_dimension_numbers<[1], [0], [0], [1], [0, 0, 1, 1], [], []>} : vector<256x4xf32>, vector<4x8xf32>, vector<256x8xf32> -> vector<256x8xf32>
    %113 = arith.addf %107, %112 : vector<256x8xf32>
    %114 = vector.extract_strided_slice %1 {offsets = [15, 15, 0], sizes = [16, 16, 4], strides = [1, 1, 1]} : vector<34x34x4xf32> to vector<16x16x4xf32>
    %115 = vector.shape_cast %114 : vector<16x16x4xf32> to vector<256x4xf32>
    %c1_87 = arith.constant 1 : index
    %c8_88 = arith.constant 8 : index
    %c0_89 = arith.constant 0 : index
    %c0_90 = arith.constant 0 : index
    %116 = vector.load %arg2[%c1_87, %c8_88, %c0_89, %c0_90] : memref<3x9x4x8xf32, #tpu.memory_space<vmem>>, vector<1x1x4x8xf32>
    %117 = vector.shape_cast %116 : vector<1x1x4x8xf32> to vector<4x8xf32>
    %cst_91 = arith.constant dense<0.000000e+00> : vector<256x8xf32>
    %118 = tpu.matmul %115, %117, %cst_91 {dimension_numbers = #tpu.dot_dimension_numbers<[1], [0], [0], [1], [0, 0, 1, 1], [], []>} : vector<256x4xf32>, vector<4x8xf32>, vector<256x8xf32> -> vector<256x8xf32>
    %119 = arith.addf %113, %118 : vector<256x8xf32>
    %120 = vector.extract_strided_slice %2 {offsets = [0, 8], sizes = [1, 8], strides = [1, 1]} : vector<1x32xf32> to vector<1x8xf32>
    %121 = vector.broadcast %120 : vector<1x8xf32> to vector<256x8xf32>
    %122 = arith.addf %119, %121 : vector<256x8xf32>
    %123 = vector.shape_cast %122 : vector<256x8xf32> to vector<16x16x8xf32>
    %c0_92 = arith.constant 0 : index
    %c0_93 = arith.constant 0 : index
    %c0_94 = arith.constant 0 : index
    %c8_95 = arith.constant 8 : index
    %124 = vector.load %arg5[%c0_92, %c0_93, %c0_94, %c8_95] : memref<1x16x16x32xf32, #tpu.memory_space<vmem>>, vector<1x16x16x8xf32>
    %125 = vector.shape_cast %124 : vector<1x16x16x8xf32> to vector<16x16x8xf32>
    %126 = vector.shape_cast %123 : vector<16x16x8xf32> to vector<1x16x16x8xf32>
    tpu.vector_store %arg5[%c0_92, %c0_93, %c0_94, %c8_95], %126 {strides = array<i32>} : memref<1x16x16x32xf32, #tpu.memory_space<vmem>>, vector<1x16x16x8xf32>,
    %cst_96 = arith.constant 0.000000e+00 : f32
    %127 = vector.broadcast %cst_96 : f32 to vector<256x8xf32>
    %128 = vector.extract_strided_slice %1 {offsets = [0, 0, 0], sizes = [16, 16, 4], strides = [1, 1, 1]} : vector<34x34x4xf32> to vector<16x16x4xf32>
    %129 = vector.shape_cast %128 : vector<16x16x4xf32> to vector<256x4xf32>
    %c2_97 = arith.constant 2 : index
    %c0_98 = arith.constant 0 : index
    %c0_99 = arith.constant 0 : index
    %c0_100 = arith.constant 0 : index
    %130 = vector.load %arg2[%c2_97, %c0_98, %c0_99, %c0_100] : memref<3x9x4x8xf32, #tpu.memory_space<vmem>>, vector<1x1x4x8xf32>
    %131 = vector.shape_cast %130 : vector<1x1x4x8xf32> to vector<4x8xf32>
    %cst_101 = arith.constant dense<0.000000e+00> : vector<256x8xf32>
    %132 = tpu.matmul %129, %131, %cst_101 {dimension_numbers = #tpu.dot_dimension_numbers<[1], [0], [0], [1], [0, 0, 1, 1], [], []>} : vector<256x4xf32>, vector<4x8xf32>, vector<256x8xf32> -> vector<256x8xf32>
    %133 = arith.addf %127, %132 : vector<256x8xf32>
    %134 = vector.extract_strided_slice %1 {offsets = [0, 9, 0], sizes = [16, 16, 4], strides = [1, 1, 1]} : vector<34x34x4xf32> to vector<16x16x4xf32>
    %135 = vector.shape_cast %134 : vector<16x16x4xf32> to vector<256x4xf32>
    %c2_102 = arith.constant 2 : index
    %c1_103 = arith.constant 1 : index
    %c0_104 = arith.constant 0 : index
    %c0_105 = arith.constant 0 : index
    %136 = vector.load %arg2[%c2_102, %c1_103, %c0_104, %c0_105] : memref<3x9x4x8xf32, #tpu.memory_space<vmem>>, vector<1x1x4x8xf32>
    %137 = vector.shape_cast %136 : vector<1x1x4x8xf32> to vector<4x8xf32>
    %cst_106 = arith.constant dense<0.000000e+00> : vector<256x8xf32>
    %138 = tpu.matmul %135, %137, %cst_106 {dimension_numbers = #tpu.dot_dimension_numbers<[1], [0], [0], [1], [0, 0, 1, 1], [], []>} : vector<256x4xf32>, vector<4x8xf32>, vector<256x8xf32> -> vector<256x8xf32>
    %139 = arith.addf %133, %138 : vector<256x8xf32>
    %140 = vector.extract_strided_slice %1 {offsets = [0, 18, 0], sizes = [16, 16, 4], strides = [1, 1, 1]} : vector<34x34x4xf32> to vector<16x16x4xf32>
    %141 = vector.shape_cast %140 : vector<16x16x4xf32> to vector<256x4xf32>
    %c2_107 = arith.constant 2 : index
    %c2_108 = arith.constant 2 : index
    %c0_109 = arith.constant 0 : index
    %c0_110 = arith.constant 0 : index
    %142 = vector.load %arg2[%c2_107, %c2_108, %c0_109, %c0_110] : memref<3x9x4x8xf32, #tpu.memory_space<vmem>>, vector<1x1x4x8xf32>
    %143 = vector.shape_cast %142 : vector<1x1x4x8xf32> to vector<4x8xf32>
    %cst_111 = arith.constant dense<0.000000e+00> : vector<256x8xf32>
    %144 = tpu.matmul %141, %143, %cst_111 {dimension_numbers = #tpu.dot_dimension_numbers<[1], [0], [0], [1], [0, 0, 1, 1], [], []>} : vector<256x4xf32>, vector<4x8xf32>, vector<256x8xf32> -> vector<256x8xf32>
    %145 = arith.addf %139, %144 : vector<256x8xf32>
    %146 = vector.extract_strided_slice %1 {offsets = [9, 0, 0], sizes = [16, 16, 4], strides = [1, 1, 1]} : vector<34x34x4xf32> to vector<16x16x4xf32>
    %147 = vector.shape_cast %146 : vector<16x16x4xf32> to vector<256x4xf32>
    %c2_112 = arith.constant 2 : index
    %c3_113 = arith.constant 3 : index
    %c0_114 = arith.constant 0 : index
    %c0_115 = arith.constant 0 : index
    %148 = vector.load %arg2[%c2_112, %c3_113, %c0_114, %c0_115] : memref<3x9x4x8xf32, #tpu.memory_space<vmem>>, vector<1x1x4x8xf32>
    %149 = vector.shape_cast %148 : vector<1x1x4x8xf32> to vector<4x8xf32>
    %cst_116 = arith.constant dense<0.000000e+00> : vector<256x8xf32>
    %150 = tpu.matmul %147, %149, %cst_116 {dimension_numbers = #tpu.dot_dimension_numbers<[1], [0], [0], [1], [0, 0, 1, 1], [], []>} : vector<256x4xf32>, vector<4x8xf32>, vector<256x8xf32> -> vector<256x8xf32>
    %151 = arith.addf %145, %150 : vector<256x8xf32>
    %152 = vector.extract_strided_slice %1 {offsets = [9, 9, 0], sizes = [16, 16, 4], strides = [1, 1, 1]} : vector<34x34x4xf32> to vector<16x16x4xf32>
    %153 = vector.shape_cast %152 : vector<16x16x4xf32> to vector<256x4xf32>
    %c2_117 = arith.constant 2 : index
    %c4_118 = arith.constant 4 : index
    %c0_119 = arith.constant 0 : index
    %c0_120 = arith.constant 0 : index
    %154 = vector.load %arg2[%c2_117, %c4_118, %c0_119, %c0_120] : memref<3x9x4x8xf32, #tpu.memory_space<vmem>>, vector<1x1x4x8xf32>
    %155 = vector.shape_cast %154 : vector<1x1x4x8xf32> to vector<4x8xf32>
    %cst_121 = arith.constant dense<0.000000e+00> : vector<256x8xf32>
    %156 = tpu.matmul %153, %155, %cst_121 {dimension_numbers = #tpu.dot_dimension_numbers<[1], [0], [0], [1], [0, 0, 1, 1], [], []>} : vector<256x4xf32>, vector<4x8xf32>, vector<256x8xf32> -> vector<256x8xf32>
    %157 = arith.addf %151, %156 : vector<256x8xf32>
    %158 = vector.extract_strided_slice %1 {offsets = [9, 18, 0], sizes = [16, 16, 4], strides = [1, 1, 1]} : vector<34x34x4xf32> to vector<16x16x4xf32>
    %159 = vector.shape_cast %158 : vector<16x16x4xf32> to vector<256x4xf32>
    %c2_122 = arith.constant 2 : index
    %c5_123 = arith.constant 5 : index
    %c0_124 = arith.constant 0 : index
    %c0_125 = arith.constant 0 : index
    %160 = vector.load %arg2[%c2_122, %c5_123, %c0_124, %c0_125] : memref<3x9x4x8xf32, #tpu.memory_space<vmem>>, vector<1x1x4x8xf32>
    %161 = vector.shape_cast %160 : vector<1x1x4x8xf32> to vector<4x8xf32>
    %cst_126 = arith.constant dense<0.000000e+00> : vector<256x8xf32>
    %162 = tpu.matmul %159, %161, %cst_126 {dimension_numbers = #tpu.dot_dimension_numbers<[1], [0], [0], [1], [0, 0, 1, 1], [], []>} : vector<256x4xf32>, vector<4x8xf32>, vector<256x8xf32> -> vector<256x8xf32>
    %163 = arith.addf %157, %162 : vector<256x8xf32>
    %164 = vector.extract_strided_slice %1 {offsets = [18, 0, 0], sizes = [16, 16, 4], strides = [1, 1, 1]} : vector<34x34x4xf32> to vector<16x16x4xf32>
    %165 = vector.shape_cast %164 : vector<16x16x4xf32> to vector<256x4xf32>
    %c2_127 = arith.constant 2 : index
    %c6_128 = arith.constant 6 : index
    %c0_129 = arith.constant 0 : index
    %c0_130 = arith.constant 0 : index
    %166 = vector.load %arg2[%c2_127, %c6_128, %c0_129, %c0_130] : memref<3x9x4x8xf32, #tpu.memory_space<vmem>>, vector<1x1x4x8xf32>
    %167 = vector.shape_cast %166 : vector<1x1x4x8xf32> to vector<4x8xf32>
    %cst_131 = arith.constant dense<0.000000e+00> : vector<256x8xf32>
    %168 = tpu.matmul %165, %167, %cst_131 {dimension_numbers = #tpu.dot_dimension_numbers<[1], [0], [0], [1], [0, 0, 1, 1], [], []>} : vector<256x4xf32>, vector<4x8xf32>, vector<256x8xf32> -> vector<256x8xf32>
    %169 = arith.addf %163, %168 : vector<256x8xf32>
    %170 = vector.extract_strided_slice %1 {offsets = [18, 9, 0], sizes = [16, 16, 4], strides = [1, 1, 1]} : vector<34x34x4xf32> to vector<16x16x4xf32>
    %171 = vector.shape_cast %170 : vector<16x16x4xf32> to vector<256x4xf32>
    %c2_132 = arith.constant 2 : index
    %c7_133 = arith.constant 7 : index
    %c0_134 = arith.constant 0 : index
    %c0_135 = arith.constant 0 : index
    %172 = vector.load %arg2[%c2_132, %c7_133, %c0_134, %c0_135] : memref<3x9x4x8xf32, #tpu.memory_space<vmem>>, vector<1x1x4x8xf32>
    %173 = vector.shape_cast %172 : vector<1x1x4x8xf32> to vector<4x8xf32>
    %cst_136 = arith.constant dense<0.000000e+00> : vector<256x8xf32>
    %174 = tpu.matmul %171, %173, %cst_136 {dimension_numbers = #tpu.dot_dimension_numbers<[1], [0], [0], [1], [0, 0, 1, 1], [], []>} : vector<256x4xf32>, vector<4x8xf32>, vector<256x8xf32> -> vector<256x8xf32>
    %175 = arith.addf %169, %174 : vector<256x8xf32>
    %176 = vector.extract_strided_slice %1 {offsets = [18, 18, 0], sizes = [16, 16, 4], strides = [1, 1, 1]} : vector<34x34x4xf32> to vector<16x16x4xf32>
    %177 = vector.shape_cast %176 : vector<16x16x4xf32> to vector<256x4xf32>
    %c2_137 = arith.constant 2 : index
    %c8_138 = arith.constant 8 : index
    %c0_139 = arith.constant 0 : index
    %c0_140 = arith.constant 0 : index
    %178 = vector.load %arg2[%c2_137, %c8_138, %c0_139, %c0_140] : memref<3x9x4x8xf32, #tpu.memory_space<vmem>>, vector<1x1x4x8xf32>
    %179 = vector.shape_cast %178 : vector<1x1x4x8xf32> to vector<4x8xf32>
    %cst_141 = arith.constant dense<0.000000e+00> : vector<256x8xf32>
    %180 = tpu.matmul %177, %179, %cst_141 {dimension_numbers = #tpu.dot_dimension_numbers<[1], [0], [0], [1], [0, 0, 1, 1], [], []>} : vector<256x4xf32>, vector<4x8xf32>, vector<256x8xf32> -> vector<256x8xf32>
    %181 = arith.addf %175, %180 : vector<256x8xf32>
    %182 = vector.extract_strided_slice %2 {offsets = [0, 16], sizes = [1, 8], strides = [1, 1]} : vector<1x32xf32> to vector<1x8xf32>
    %183 = vector.broadcast %182 : vector<1x8xf32> to vector<256x8xf32>
    %184 = arith.addf %181, %183 : vector<256x8xf32>
    %185 = vector.shape_cast %184 : vector<256x8xf32> to vector<16x16x8xf32>
    %c0_142 = arith.constant 0 : index
    %c0_143 = arith.constant 0 : index
    %c0_144 = arith.constant 0 : index
    %c16 = arith.constant 16 : index
    %186 = vector.load %arg5[%c0_142, %c0_143, %c0_144, %c16] : memref<1x16x16x32xf32, #tpu.memory_space<vmem>>, vector<1x16x16x8xf32>
    %187 = vector.shape_cast %186 : vector<1x16x16x8xf32> to vector<16x16x8xf32>
    %188 = vector.shape_cast %185 : vector<16x16x8xf32> to vector<1x16x16x8xf32>
    tpu.vector_store %arg5[%c0_142, %c0_143, %c0_144, %c16], %188 {strides = array<i32>} : memref<1x16x16x32xf32, #tpu.memory_space<vmem>>, vector<1x16x16x8xf32>,
    %189 = vector.extract_strided_slice %1 {offsets = [9, 9, 0], sizes = [16, 16, 4], strides = [1, 1, 1]} : vector<34x34x4xf32> to vector<16x16x4xf32>
    %190 = vector.shape_cast %189 : vector<16x16x4xf32> to vector<256x4xf32>
    %c0_145 = arith.constant 0 : index
    %c0_146 = arith.constant 0 : index
    %191 = vector.load %arg3[%c0_145, %c0_146] : memref<4x8xf32, #tpu.memory_space<vmem>>, vector<4x8xf32>
    %cst_147 = arith.constant dense<0.000000e+00> : vector<256x8xf32>
    %192 = tpu.matmul %190, %191, %cst_147 {dimension_numbers = #tpu.dot_dimension_numbers<[1], [0], [0], [1], [0, 0, 1, 1], [], []>} : vector<256x4xf32>, vector<4x8xf32>, vector<256x8xf32> -> vector<256x8xf32>
    %193 = vector.extract_strided_slice %2 {offsets = [0, 24], sizes = [1, 8], strides = [1, 1]} : vector<1x32xf32> to vector<1x8xf32>
    %194 = vector.broadcast %193 : vector<1x8xf32> to vector<256x8xf32>
    %195 = arith.addf %192, %194 : vector<256x8xf32>
    %196 = vector.shape_cast %195 : vector<256x8xf32> to vector<16x16x8xf32>
    %c0_148 = arith.constant 0 : index
    %c0_149 = arith.constant 0 : index
    %c0_150 = arith.constant 0 : index
    %c24 = arith.constant 24 : index
    %197 = vector.load %arg5[%c0_148, %c0_149, %c0_150, %c24] : memref<1x16x16x32xf32, #tpu.memory_space<vmem>>, vector<1x16x16x8xf32>
    %198 = vector.shape_cast %197 : vector<1x16x16x8xf32> to vector<16x16x8xf32>
    %199 = vector.shape_cast %196 : vector<16x16x8xf32> to vector<1x16x16x8xf32>
    tpu.vector_store %arg5[%c0_148, %c0_149, %c0_150, %c24], %199 {strides = array<i32>} : memref<1x16x16x32xf32, #tpu.memory_space<vmem>>, vector<1x16x16x8xf32>,
    return
  }
  func.func @transform_0(%arg0: i32) -> (i32, i32, i32, i32) {
    %c0_i32 = arith.constant 0 : i32
    %c0_i32_0 = arith.constant 0 : i32
    %c0_i32_1 = arith.constant 0 : i32
    %c0_i32_2 = arith.constant 0 : i32
    return %arg0, %c0_i32, %c0_i32_0, %c0_i32_1 : i32, i32, i32, i32
  }
  func.func @transform_1(%arg0: i32) -> (i32, i32, i32, i32) {
    %c0_i32 = arith.constant 0 : i32
    %c0_i32_0 = arith.constant 0 : i32
    %c0_i32_1 = arith.constant 0 : i32
    %c0_i32_2 = arith.constant 0 : i32
    %c0_i32_3 = arith.constant 0 : i32
    return %c0_i32, %c0_i32_0, %c0_i32_1, %c0_i32_2 : i32, i32, i32, i32
  }
  func.func @transform_2(%arg0: i32) -> (i32, i32) {
    %c0_i32 = arith.constant 0 : i32
    %c0_i32_0 = arith.constant 0 : i32
    %c0_i32_1 = arith.constant 0 : i32
    return %c0_i32, %c0_i32_0 : i32, i32
  }
  func.func @transform_3(%arg0: i32) -> (i32, i32) {
    %c0_i32 = arith.constant 0 : i32
    %c0_i32_0 = arith.constant 0 : i32
    %c0_i32_1 = arith.constant 0 : i32
    return %c0_i32, %c0_i32_0 : i32, i32
  }
  func.func @transform_4(%arg0: i32) -> (i32, i32, i32, i32) {
    %c0_i32 = arith.constant 0 : i32
    %c0_i32_0 = arith.constant 0 : i32
    %c0_i32_1 = arith.constant 0 : i32
    %c0_i32_2 = arith.constant 0 : i32
    return %arg0, %c0_i32, %c0_i32_0, %c0_i32_1 : i32, i32, i32, i32
  }
}

</mosaic_0001>

<bundles_post_ra>
// kernel: tpu_custom_call.1
= control target key start
LH: loop header
LB: loop body
LE: loop exit
PB: predicated region body
PF: predicated region fallthrough
CT: control target
= control target key end

     0   :  { %9 = vsyncpa [#allocation3], 0  ;;  %s18898_s0 = inlined_call_operand.vmem [shape: f32[2,34,34,4], index: 0, kind: input, shape index: {}]   ;;  %s18899_s1 = inlined_call_operand.vmem [shape: f32[3,9,4,8], index: 1, kind: input, shape index: {}]   ;;  %s18900_s2 = inlined_call_operand.vmem [shape: f32[4,8], index: 2, kind: input, shape index: {}]   ;;  %s18901_s3 = inlined_call_operand.vmem [shape: f32[1,32], index: 3, kind: input, shape index: {}]   ;;  %s18902_s4 = inlined_call_operand.hbm [shape: f32[2,16,16,32], index: 4, kind: output, shape index: {}]  }
   0x1   :  { %11 = vsyncpa [#allocation3 + $0x1], 0  ;;  %s14325_s15 = smov 0   ;;  %s14327_s16 = smov 0  }
   0x2   :  { %s14329_s17 = smov 0   ;;  %s14331_s18 = smov 0  }
   0x3 LB: > { %s14346_s19 = sadd.s32 4294967295, %s14290_s18   ;;  %s10005_s20 = sadd.s32 4294967294, %s14290_s18   ;;  %s14290_s18 = sphi %s14331_s18, %s19611_s18   ;;  %s14286_s17 = sphi %s14329_s17, %s19610_s17   ;;  %s14282_s16 = sphi %s14327_s16, %s19609_s16   ;;  %s14278_s15 = sphi %s14325_s15, %s19608_s15  }
   0x4   : > { %s14350_s21 = sadd.s32 1, %s14290_s18   ;;  %s113_s22 = sadd.s32 1, %s14286_s17 }
   0x5   : > { %s110_s23 = ssub.s32 %s14290_s18, %s14350_s21  ;;  %p123_p0 = scmp.ne.s32.totalorder %s14286_s17, %s14282_s16 }
   0x6   : > { %p111_p1 = scmp.eq.s32.totalorder %s110_s23, 0  ;;  %p124_p2 = scmp.eq.s32.totalorder %s14346_s19, 1 }
   0x7   : > { %p129_p3 = scmp.ne.s32.totalorder %s14282_s16, %s14278_s15  ;;  %p130_p4 = scmp.eq.s32.totalorder %s10005_s20, 1 }
   0x8   : > { %s14361_s24 = scalar_select %p111_p1, %s14286_s17, %s113_s22  }
   0x9   : > { %p14363_p5 = por %p124_p2, %p123_p0  ;;  %p14367_p6 = por %p130_p4, %p129_p3 }
   0xa   : > { %p10008_p7 = scmp.ge.s32.totalorder %s14290_s18, 1  ;;  %p165_p8 = scmp.lt.s32.totalorder %s14290_s18, 3 }
   0xc   : > { %p166_p9 = pnand %p10008_p7, %p165_p8 }
   0xe   : > { %169 = sbr.rel (%p166_p9) target bundleno = 1335 (0x537), region = 36 }
  0x15   : > { %v10011_v0 = vld [vmem:[%s18899_s1 + $0x4] sm:$0xf]  ;;  %vm661_vm0 = vcmask 1043456   ;;  %v10146_v1 = vld [vmem:[%s18899_s1 + $0x10] sm:$0xf]  ;;  %p191_p10 = scmp.lt.s32.totalorder %s14346_s19, 1 }
  0x16   : > { %11892 = vmatprep.subr.msk.mxu1 %vm661_vm0, %v10011_v0  ;;  %12092 = vmatprep.subr.msk.mxu0 %vm661_vm0, %v10146_v1  ;;  %v496_v2 = vld [vmem:[%s18899_s1] sm:$0xf]  ;;  %v10180_v3 = vld [vmem:[%s18899_s1 + $0x14] sm:$0xf]  ;;  %vm513_vm1 = vcmask 1046528   ;;  %vm596_vm2 = vcmask 31744  }
  0x17   : > { %11893 = vmatpush3.msk.msra.mxu1 %vm661_vm0, %v10011_v0  ;;  %s192_s9 = scalar_select %p191_p10, %s14346_s19, 1  ;;  %12093 = vmatpush3.msk.msra.mxu0 %vm661_vm0, %v10146_v1  ;;  %v14449_v26 = vld [vmem:[%s18899_s1 + $0x8] sm:$0xf]  ;;  %v14475_v34 = vld [vmem:[%s18899_s1 + $0x18] sm:$0xf]  ;;  %vm415_vm3 = vcmask 1041408  }
  0x18   : > { %11942 = vmatprep.subr.msk.mxu1 %vm661_vm0, %v496_v2  ;;  %12142 = vmatprep.subr.msk.mxu0 %vm661_vm0, %v10180_v3  ;;  %vm3426_vm4 = vcmask 1044480   ;;  %vm4061_vm5 = vcmask 1040384   ;;  %vm7070_vm6 = vcmask 1045504   ;;  %s188_s14 = sand.u32 1, %s14282_s16   ;;  %vm3384_vm7 = vcmask 64512   ;;  %s14292_s6 = smov 120  }
  0x19   : > { %s14060_s10 = smul.u32 1360, %s192_s9  ;;  %s10009_s20 = sshll.u32 %s188_s14, 8  ;;  %vm6458_vm8 = vcmask 130112   ;;  %vm9503_vm9 = vcmask 195712   ;;  %vm9896_vm10 = vcmask 261312  }
  0x1a   : > { %s16768_s27 = scalar_lea.vmem [#allocation2], %s10009_s20  ;;  %s14293_s7 = smov 112  }
  0x1b   : > { %s14396_s13 = scalar_lea.vmem %s18898_s0, %s14060_s10  ;;  %s14294_s8 = smov 104  }
  0x1c   : > { %v14399_v4 = vld [vmem:[%s14396_s13 + $0xf8] sm:$0xff]  ;;  %v14402_v5 = vld [vmem:[%s14396_s13 + $0x100] sm:$0xff]  ;;  %v14405_v6 = vld [vmem:[%s14396_s13 + $0x170] sm:$0xff]  ;;  %s14296_s9 = smov 24   ;;  %s14297_s10 = smov 16  }
  0x1d   : > { %19192 = vst [vmem:[#allocation5_spill] sm:$0xff] %v14399_v4  ;;  %v514_v7 = vrot.slane %v14399_v4, 1  ;;  %v515_v8 = vrot.slane %v14402_v5, 1  ;;  %v14410_v9 = vld [vmem:[%s14396_s13 + $0x178] sm:$0xff]  ;;  %v529_v10 = vrot.slane %v14405_v6, 1  ;;  %v14414_v11 = vld [vmem:[%s14396_s13 + $0x108] sm:$0xff] }
  0x1e   : > { %19193 = vst [vmem:[#allocation6_spill] sm:$0xff] %v14414_v11  ;;  %v14417_v12 = vld [vmem:[%s14396_s13 + $0x180] sm:$0xff]  ;;  %v530_v13 = vrot.slane %v14410_v9, 1  ;;  %v517_v14 = vrot.slane %v14414_v11, 1  ;;  %v14426_v17 = vld [vmem:[%s14396_s13 + $0x128] sm:$0xff]  ;;  %v14429_v18 = vld [vmem:[%s14396_s13 + $0x198] sm:$0xff] }
  0x1f   : > { %v532_v15 = vrot.slane %v14417_v12, 1  ;;  %v14423_v16 = vld [vmem:[%s14396_s13 + $0x120] sm:$0xff]  ;;  %v14432_v19 = vsel %vm513_vm1, %v514_v7, %v515_v8  ;;  %v520_v21 = vrot.slane %v14426_v17, 1  ;;  %v534_v23 = vrot.slane %v14429_v18, 1  ;;  %v14441_v24 = vld [vmem:[%s14396_s13 + $0x130] sm:$0xff]  ;;  %v14444_v25 = vld [vmem:[%s14396_s13 + $0x1a8] sm:$0xff] }
  0x20   : > { %19194 = vst [vmem:[#allocation7_spill] sm:$0xff] %v14432_v19  ;;  %v519_v20 = vrot.slane %v14423_v16, 1  ;;  %v14437_v22 = vld [vmem:[%s14396_s13 + $0x1a0] sm:$0xff]  ;;  %19195 = vst [vmem:[#allocation8_spill] sm:$0xff] %v14441_v24  ;;  %11894 = vmatprep.mubr.msk.f32.mxu1 %vm596_vm2, %v14432_v19  ;;  %v14454_v27 = vsel %vm513_vm1, %v529_v10, %v530_v13  ;;  %v14457_v28 = vsel %vm513_vm1, %v515_v8, %v517_v14  ;;  %v14464_v31 = vld [vmem:[%s14396_s13 + $0x148] sm:$0xff]  ;;  %v522_v36 = vrot.slane %v14441_v24, 1 }
  0x21   : > { %19196 = vst [vmem:[#allocation9_spill] sm:$0xff] %v14454_v27  ;;  %19197 = vst [vmem:[#allocation10_spill] sm:$0xff] %v14457_v28  ;;  %v14460_v29 = vsel %vm513_vm1, %v530_v13, %v532_v15  ;;  %v535_v30 = vrot.slane %v14437_v22, 1  ;;  %v14467_v32 = vld [vmem:[%s14396_s13 + $0x150] sm:$0xff]  ;;  %v14470_v33 = vld [vmem:[%s14396_s13 + $0x1c0] sm:$0xff]  ;;  %12094 = vmatprep.mubr.msk.f32.mxu0 %vm596_vm2, %v14454_v27  ;;  %11895 = vmatmul.mubr.msk.f32.vlgmr.msra.gmra.mrb[0].mxu1 %vm596_vm2, %v14457_v28  ;;  %v537_v37 = vrot.slane %v14444_v25, 1 }
  0x22   : > { %19198 = vst [vmem:[#allocation11_spill] sm:$0xff] %v14460_v29  ;;  %v14482_v35 = vsel %vm513_vm1, %v519_v20, %v520_v21  ;;  %v524_v38 = vrot.slane %v14464_v31, 1  ;;  %v14488_v39 = vld [vmem:[%s14396_s13 + $0x1c8] sm:$0xff]  ;;  %v14491_v40 = vld [vmem:[%s14396_s13 + $0x158] sm:$0xff]  ;;  %v14494_v41 = vld [vmem:[%s14396_s13 + $0x1d0] sm:$0xff]  ;;  %11943 = vmatpush3.msk.msra.mxu1 %vm661_vm0, %v496_v2  ;;  %12095 = vmatmul.mubr.msk.f32.vlgmr.msra.gmra.mrb[0].mxu0 %vm596_vm2, %v14460_v29  ;;  %v525_v43 = vrot.slane %v14467_v32, 1  ;;  %v14515_v48 = vsel %vm513_vm1, %v520_v21, %v522_v36 }
  0x23   : > { %19199 = vst [vmem:[#allocation12_spill] sm:$0xff] %v14482_v35  ;;  %19200 = vst [vmem:[#allocation13_spill] sm:$0xff] %v14491_v40  ;;  %v14500_v42 = vsel %vm513_vm1, %v534_v23, %v535_v30  ;;  %v539_v44 = vrot.slane %v14470_v33, 1  ;;  %v540_v45 = vrot.slane %v14488_v39, 1  ;;  %v14506_v46 = vld [vmem:[%s14396_s13 + $0x1e8] sm:$0xff]  ;;  %v14509_v47 = vld [vmem:[%s14396_s13 + $0x1f0] sm:$0xff]  ;;  %12143 = vmatpush3.msk.msra.mxu0 %vm661_vm0, %v10180_v3  ;;  %11897 = vmatprep.mubr.msk.f32.mxu1 %vm596_vm2, %v14482_v35 }
  0x24   : > { %19201 = vst [vmem:[#allocation14_spill] sm:$0xff] %v14500_v42  ;;  %19202 = vst [vmem:[#allocation15_spill] sm:$0xff] %v14515_v48  ;;  %v14518_v49 = vsel %vm513_vm1, %v535_v30, %v537_v37  ;;  %v527_v50 = vrot.slane %v14491_v40, 1  ;;  %v542_v51 = vrot.slane %v14494_v41, 1  ;;  %12097 = vmatprep.mubr.msk.f32.mxu0 %vm596_vm2, %v14500_v42  ;;  %v14525_v52 = vsel %vm513_vm1, %v524_v38, %v525_v43  ;;  %v14533_v56 = vld [vmem:[%s14396_s13 + $0x1f8] sm:$0xff]  ;;  %v14540_v57 = vld [vmem:[%s14396_s13 + $0x210] sm:$0xff] }
  0x25   : > { %19203 = vst [vmem:[#allocation16_spill] sm:$0xff] %v14518_v49  ;;  %19204 = vst [vmem:[#allocation17_spill] sm:$0xff] %v14525_v52  ;;  %v14528_v53 = vsel %vm513_vm1, %v539_v44, %v540_v45  ;;  %v544_v54 = vrot.slane %v14506_v46, 1  ;;  %v545_v55 = vrot.slane %v14509_v47, 1  ;;  %11992 = vmatprep.subr.msk.mxu1 %vm661_vm0, %v14449_v26  ;;  %11898 = vmatmul.mubr.msk.f32.gmra.mrb[2].mxu1 %vm596_vm2, %v14515_v48  ;;  %v14543_v58 = vld [vmem:[%s14396_s13 + $0x218] sm:$0xff]  ;;  %v547_v61 = vrot.slane %v14533_v56, 1 }
  0x26   : > { %19205 = vst [vmem:[#allocation18_spill] sm:$0xff] %v14528_v53  ;;  %12192 = vmatprep.subr.msk.mxu0 %vm661_vm0, %v14475_v34  ;;  %12098 = vmatmul.mubr.msk.f32.gmra.mrb[2].mxu0 %vm596_vm2, %v14518_v49  ;;  %v14552_v59 = vsel %vm513_vm1, %v525_v43, %v527_v50  ;;  %v14557_v60 = vsel %vm513_vm1, %v540_v45, %v542_v51  ;;  %v549_v63 = vrot.slane %v14540_v57, 1  ;;  %v550_v0 = vrot.slane %v14543_v58, 1  ;;  %v14566_v1 = vld [vmem:[%s14396_s13 + $0x220] sm:$0xff]  ;;  %v14571_v2 = vld [vmem:[%s14396_s13 + $0x238] sm:$0xff]  ;;  %v14592_v15 = vld [vmem:[%s14396_s13 + $0x248] sm:$0xff] }
  0x27   : > { %11900 = vmatprep.mubr.msk.f32.mxu1 %vm596_vm2, %v14525_v52  ;;  %19206 = vst [vmem:[#allocation19_spill] sm:$0xff] %v14552_v59  ;;  %12100 = vmatprep.mubr.msk.f32.mxu0 %vm596_vm2, %v14528_v53  ;;  %19207 = vst [vmem:[#allocation20_spill] sm:$0xff] %v14557_v60  ;;  %v14561_v62 = vsel %vm513_vm1, %v544_v54, %v545_v55  ;;  %v14574_v3 = vld [vmem:[%s14396_s13 + $0x240] sm:$0xff]  ;;  %v14583_v7 = vsel %vm513_vm1, %v545_v55, %v547_v61  ;;  %v552_v8 = vrot.slane %v14566_v1, 1  ;;  %v14600_v21 = vld [vmem:[%s14396_s13 + $0x268] sm:$0xff]  ;;  %s10967_s11 = sshll.u32 %s14346_s19, 12 }
  0x28   : > { %19208 = vst [vmem:[#allocation21_spill] sm:$0xff] %v14561_v62  ;;  %19209 = vst [vmem:[#allocation22_spill] sm:$0xff] %v14583_v7  ;;  %v14587_v10 = vsel %vm513_vm1, %v549_v63, %v550_v0  ;;  %v554_v13 = vrot.slane %v14571_v2, 1  ;;  %v555_v14 = vrot.slane %v14574_v3, 1  ;;  %v14597_v20 = vld [vmem:[%s14396_s13 + $0x260] sm:$0xff]  ;;  %v557_v30 = vrot.slane %v14592_v15, 1  ;;  %s18846_s23 = scalar_lea.hbm %s18902_s4, %s10967_s11 }
  0x29   : > { %11901 = vmatmul.mubr.msk.f32.gmra.mrb[4].mxu1 %vm596_vm2, %v14552_v59  ;;  %19210 = vst [vmem:[#allocation23_spill] sm:$0xff] %v14587_v10  ;;  %v14609_v23 = vsel %vm513_vm1, %v550_v0, %v552_v8  ;;  %v559_v37 = vrot.slane %v14597_v20, 1  ;;  %v560_v38 = vrot.slane %v14600_v21, 1  ;;  %v14618_v43 = vld [vmem:[%s14396_s13 + $0x270] sm:$0xff]  ;;  %v14623_v44 = vld [vmem:[%s14396_s13 + $0x288] sm:$0xff]  ;;  %v14644_v63 = vld [vmem:[%s14396_s13 + $0x298] sm:$0xff] }
  0x2a   : > { %12101 = vmatmul.mubr.msk.f32.gmra.mrb[4].mxu0 %vm596_vm2, %v14557_v60  ;;  %11903 = vmatprep.mubr.msk.f32.mxu1 %vm596_vm2, %v14454_v27  ;;  %19211 = vst [vmem:[#allocation24_spill] sm:$0xff] %v14609_v23  ;;  %v14613_v36 = vsel %vm513_vm1, %v554_v13, %v555_v14  ;;  %v14626_v45 = vld [vmem:[%s14396_s13 + $0x290] sm:$0xff]  ;;  %v14635_v50 = vsel %vm513_vm1, %v555_v14, %v557_v30  ;;  %v562_v51 = vrot.slane %v14618_v43, 1  ;;  %v564_v55 = vrot.slane %v14623_v44, 1  ;;  %v14652_v8 = vld [vmem:[%s14396_s13 + $0x2b8] sm:$0xff]  ;;  %v14696_v59 = vld [vmem:[%s14396_s13 + $0x2e8] sm:$0xff] }
  0x2b   : > { %12103 = vmatprep.mubr.msk.f32.mxu0 %vm596_vm2, %v14561_v62  ;;  %19212 = vst [vmem:[#allocation25_spill] sm:$0xff] %v14613_v36  ;;  %19213 = vst [vmem:[#allocation26_spill] sm:$0xff] %v14635_v50  ;;  %v14639_v54 = vsel %vm513_vm1, %v559_v37, %v560_v38  ;;  %v565_v61 = vrot.slane %v14626_v45, 1  ;;  %v14649_v0 = vld [vmem:[%s14396_s13 + $0x2b0] sm:$0xff]  ;;  %v567_v14 = vrot.slane %v14644_v63, 1  ;;  %v14701_v52 = vld [vmem:[%s14396_s13 + $0x300] sm:$0xff] }
  0x2c   : > { %19214 = vst [vmem:[#allocation27_spill] sm:$0xff] %v14639_v54  ;;  %v14661_v13 = vsel %vm513_vm1, %v560_v38, %v562_v51  ;;  %v569_v37 = vrot.slane %v14649_v0, 1  ;;  %v14678_v38 = vld [vmem:[%s14396_s13 + $0x2e0] sm:$0xff]  ;;  %v579_v35 = vrot.slane %v14701_v52, 1  ;;  %v14722_v19 = vld [vmem:[%s14396_s13 + $0x310] sm:$0xff]  ;;  %s9943_s12 = sshll.u32 %s16768_s27, 4  ;;  %s18848_s12 = int_to_ptr.vmem [resolvable:$true] %s9943_s12 }
  0x2d   : > { %11904 = vmatmul.mubr.msk.f32.gmra.mrb[6].mxu1 %vm596_vm2, %v14460_v29  ;;  %19215 = vst [vmem:[#allocation28_spill] sm:$0xff] %v14661_v13  ;;  %v14665_v30 = vsel %vm513_vm1, %v564_v55, %v565_v61  ;;  %v14687_v51 = vsel %vm513_vm1, %v565_v61, %v567_v14  ;;  %v575_v27 = vrot.slane %v14678_v38, 1  ;;  %v14704_v61 = vld [vmem:[%s14396_s13 + $0x308] sm:$0xff]  ;;  %v14774_v24 = vld [vmem:[%s14396_s13 + $0x360] sm:$0xff]  ;;  %s18856_s19 = scalar_lea.sflag [#allocation3], %s188_s14  ;;  %s14228_s28 = scalar_lea.vmem %s18848_s12, 4096 }
  0x2e   : > { %12104 = vmatmul.mubr.msk.f32.gmra.mrb[6].mxu0 %vm596_vm2, %v14583_v7  ;;  %11906 = vmatprep.mubr.msk.f32.mxu1 %vm596_vm2, %v14500_v42  ;;  %19216 = vst [vmem:[#allocation29_spill] sm:$0xff] %v14665_v30  ;;  %19217 = vst [vmem:[#allocation30_spill] sm:$0xff] %v14687_v51  ;;  %v580_v28 = vrot.slane %v14704_v61, 1  ;;  %p14229_p11 = scmp.ne.s32.totalorder %s18848_s12, %s14228_s28  ;;  %s14298_s29 = smov [#allocation2]  }
  0x2f   : > { %12106 = vmatprep.mubr.msk.f32.mxu0 %vm596_vm2, %v14587_v10  ;;  %19228 = vst [vmem:[#allocation41_spill] sm:$0xff] %v14774_v24  ;;  %s14232_s30 = sshll.u32 %s14298_s29, 4  ;;  %s14233_s30 = int_to_ptr.vmem [resolvable:$false] %s14232_s30 }
  0x30   : > { %p14230_p12 = pnand %p14229_p11, %p14363_p5  ;;  %s14234_s5 = scalar_lea.vmem %s14233_s30, 8192 }
  0x31   : > { %11907 = vmatmul.mubr.msk.f32.gmra.mrb[8].mxu1 %vm596_vm2, %v14518_v49  ;;  %v14675_v49 = vld [vmem:[%s14396_s13 + $0x2d8] sm:$0xff]  ;;  %p14235_p0 = scmp.lt.s32.totalorder %s18848_s12, %s14233_s30  ;;  %p14236_p1 = scmp.lt.s32.totalorder %s14234_s5, %s14228_s28 }
  0x32   : > { %12107 = vmatmul.mubr.msk.f32.gmra.mrb[8].mxu0 %vm596_vm2, %v14609_v23  ;;  %11909 = vmatprep.mubr.msk.f32.mxu1 %vm596_vm2, %v14528_v53  ;;  %v14670_v53 = vld [vmem:[%s14396_s13 + $0x2c0] sm:$0xff]  ;;  %v574_v29 = vrot.slane %v14675_v49, 1  ;;  %p14231_p13 = pneg %p14230_p12 }
  0x33   : > { %12109 = vmatprep.mubr.msk.f32.mxu0 %vm596_vm2, %v14613_v36  ;;  %v572_v55 = vrot.slane %v14670_v53, 1  ;;  %p14237_p2 = por %p14236_p1, %p14235_p0 }
  0x34   : > { %v14717_v48 = vsel %vm513_vm1, %v574_v29, %v575_v27 }
  0x35   : > { %11910 = vmatmul.mubr.msk.f32.gmra.mrb[10].mxu1 %vm596_vm2, %v14557_v60  ;;  %v570_v60 = vrot.slane %v14652_v8, 1  ;;  %19220 = vst [vmem:[#allocation33_spill] sm:$0xff] %v14717_v48  ;;  %p14238_p3 = pnand %p14237_p2, %p14231_p13 }
  0x36   : > { %12110 = vmatmul.mubr.msk.f32.gmra.mrb[10].mxu0 %vm596_vm2, %v14635_v50  ;;  %11912 = vmatprep.mubr.msk.f32.mxu1 %vm596_vm2, %v14561_v62 }
  0x37   : > { %12112 = vmatprep.mubr.msk.f32.mxu0 %vm596_vm2, %v14639_v54  ;;  %v14691_v42 = vsel %vm513_vm1, %v569_v37, %v570_v60  ;;  %v14713_v14 = vsel %vm513_vm1, %v570_v60, %v572_v55  ;;  %v577_v37 = vrot.slane %v14696_v59, 1  ;;  %v14730_v60 = vld [vmem:[%s14396_s13 + $0x330] sm:$0xff]  ;;  %v582_v55 = vrot.slane %v14722_v19, 1 }
  0x38   : > { %19218 = vst [vmem:[#allocation31_spill] sm:$0xff] %v14691_v42  ;;  %19219 = vst [vmem:[#allocation32_spill] sm:$0xff] %v14713_v14 }
  0x39   : > { %11913 = vmatmul.mubr.msk.f32.gmra.mrb[12].mxu1 %vm596_vm2, %v14583_v7  ;;  %v14739_v29 = vsel %vm513_vm1, %v575_v27, %v577_v37  ;;  %v14748_v7 = vld [vmem:[%s14396_s13 + $0x338] sm:$0xff] }
  0x3a   : > { %12113 = vmatmul.mubr.msk.f32.gmra.mrb[12].mxu0 %vm596_vm2, %v14661_v13  ;;  %11915 = vmatprep.mubr.msk.f32.mxu1 %vm596_vm2, %v14587_v10  ;;  %19221 = vst [vmem:[#allocation34_spill] sm:$0xff] %v14739_v29  ;;  %v585_v10 = vrot.slane %v14730_v60, 1  ;;  %19223 = vst [vmem:[#allocation36_spill] sm:$0xff] %v14748_v7  ;;  %v14756_v27 = vld [vmem:[%s14396_s13 + $0x358] sm:$0xff]  ;;  %v587_v37 = vrot.slane %v14748_v7, 1  ;;  %v226_v7 = vld [vmem:[%s14396_s13 + $0xf0] sm:$0xff] }
  0x3b   : > { %12115 = vmatprep.mubr.msk.f32.mxu0 %vm596_vm2, %v14665_v30  ;;  %19225 = vst [vmem:[#allocation38_spill] sm:$0xff] %v14756_v27  ;;  %v590_v40 = vrot.slane %v14756_v27, 1 }
  0x3d   : > { %11916 = vmatmul.mubr.msk.f32.gmra.mrb[14].mxu1 %vm596_vm2, %v14609_v23 }
  0x3e   : > { %12116 = vmatmul.mubr.msk.f32.gmra.mrb[14].mxu0 %vm596_vm2, %v14687_v51  ;;  %11918 = vmatprep.mubr.msk.f32.mxu1 %vm596_vm2, %v14613_v36  ;;  %v14727_v36 = vld [vmem:[%s14396_s13 + $0x328] sm:$0xff] }
  0x3f   : > { %12118 = vmatprep.mubr.msk.f32.mxu0 %vm596_vm2, %v14691_v42  ;;  %v584_v23 = vrot.slane %v14727_v36, 1 }
  0x41   : > { %11919 = vmatmul.mubr.msk.f32.gmra.mrb[16].mxu1 %vm596_vm2, %v14635_v50  ;;  %v14743_v50 = vsel %vm513_vm1, %v579_v35, %v580_v28  ;;  %v14765_v35 = vsel %vm513_vm1, %v580_v28, %v582_v55  ;;  %v14782_v28 = vld [vmem:[%s14396_s13 + $0x380] sm:$0xff]  ;;  %v592_v55 = vrot.slane %v14774_v24, 1  ;;  %v14826_v24 = vld [vmem:[%s14396_s13 + $0x3b0] sm:$0xff] }
  0x42   : > { %12119 = vmatmul.mubr.msk.f32.gmra.mrb[16].mxu0 %vm596_vm2, %v14713_v14  ;;  %11921 = vmatprep.mubr.msk.f32.mxu1 %vm596_vm2, %v14639_v54  ;;  %19222 = vst [vmem:[#allocation35_spill] sm:$0xff] %v14743_v50  ;;  %v14753_v54 = vld [vmem:[%s14396_s13 + $0x350] sm:$0xff]  ;;  %19226 = vst [vmem:[#allocation39_spill] sm:$0xff] %v14765_v35  ;;  %v1890_v27 = vrot.slane %v14782_v28, 1 }
  0x43   : > { %12121 = vmatprep.mubr.msk.f32.mxu0 %vm596_vm2, %v14717_v48  ;;  %19224 = vst [vmem:[#allocation37_spill] sm:$0xff] %v14753_v54  ;;  %v589_v62 = vrot.slane %v14753_v54, 1  ;;  %19230 = vst [vmem:[#allocation43_spill] sm:$0xff] %v14782_v28  ;;  %v14800_v54 = vld [vmem:[%s14396_s13 + $0x388] sm:$0xff] }
  0x44   : > { %19233 = vst [vmem:[#allocation46_spill] sm:$0xff] %v14800_v54 }
  0x45   : > { %11922 = vmatmul.mubr.msk.f32.gmra.mrb[18].mxu1 %vm596_vm2, %v14661_v13  ;;  %v14769_v13 = vsel %vm513_vm1, %v584_v23, %v585_v10  ;;  %v14791_v23 = vsel %vm513_vm1, %v585_v10, %v587_v37  ;;  %v14808_v10 = vld [vmem:[%s14396_s13 + $0x3a8] sm:$0xff]  ;;  %v1892_v37 = vrot.slane %v14800_v54, 1  ;;  %v14852_v54 = vld [vmem:[%s14396_s13 + $0x3d8] sm:$0xff] }
  0x46   : > { %12122 = vmatmul.mubr.msk.f32.gmra.mrb[18].mxu0 %vm596_vm2, %v14739_v29  ;;  %11924 = vmatprep.mubr.msk.f32.mxu1 %vm596_vm2, %v14665_v30  ;;  %19227 = vst [vmem:[#allocation40_spill] sm:$0xff] %v14769_v13  ;;  %v14779_v30 = vld [vmem:[%s14396_s13 + $0x378] sm:$0xff]  ;;  %19231 = vst [vmem:[#allocation44_spill] sm:$0xff] %v14791_v23 }
  0x47   : > { %12124 = vmatprep.mubr.msk.f32.mxu0 %vm596_vm2, %v14743_v50  ;;  %19229 = vst [vmem:[#allocation42_spill] sm:$0xff] %v14779_v30  ;;  %v1889_v11 = vrot.slane %v14779_v30, 1  ;;  %19235 = vst [vmem:[#allocation48_spill] sm:$0xff] %v14808_v10  ;;  %v1895_v30 = vrot.slane %v14808_v10, 1 }
  0x49   : > { %11925 = vmatmul.mubr.msk.f32.gmra.mrb[20].mxu1 %vm596_vm2, %v14687_v51  ;;  %v14795_v51 = vsel %vm513_vm1, %v589_v62, %v590_v40  ;;  %v14817_v62 = vsel %vm513_vm1, %v590_v40, %v592_v55  ;;  %v14834_v40 = vld [vmem:[%s14396_s13 + $0x3d0] sm:$0xff]  ;;  %v1897_v55 = vrot.slane %v14826_v24, 1 }
  0x4a   : > { %12125 = vmatmul.mubr.msk.f32.gmra.mrb[20].mxu0 %vm596_vm2, %v14765_v35  ;;  %11927 = vmatprep.mubr.msk.f32.mxu1 %vm596_vm2, %v14691_v42  ;;  %19232 = vst [vmem:[#allocation45_spill] sm:$0xff] %v14795_v51  ;;  %v14805_v42 = vld [vmem:[%s14396_s13 + $0x3a0] sm:$0xff]  ;;  %19236 = vst [vmem:[#allocation49_spill] sm:$0xff] %v14817_v62 }
  0x4b   : > { %12127 = vmatprep.mubr.msk.f32.mxu0 %vm596_vm2, %v14769_v13  ;;  %19234 = vst [vmem:[#allocation47_spill] sm:$0xff] %v14805_v42  ;;  %v1894_v28 = vrot.slane %v14805_v42, 1  ;;  %v1900_v42 = vrot.slane %v14834_v40, 1 }
  0x4d   : > { %11928 = vmatmul.mubr.msk.f32.gmra.mrb[22].mxu1 %vm596_vm2, %v14713_v14  ;;  %v14821_v14 = vsel %vm513_vm1, %v1889_v11, %v1890_v27  ;;  %v14843_v11 = vsel %vm513_vm1, %v1890_v27, %v1892_v37  ;;  %v14864_v27 = vsel %vm513_vm1, %v1895_v30, %v1897_v55  ;;  %v416_v37 = vrot.slane %v226_v7, 6 }
  0x4e   : > { %12128 = vmatmul.mubr.msk.f32.gmra.mrb[22].mxu0 %vm596_vm2, %v14791_v23  ;;  %11930 = vmatprep.mubr.msk.f32.mxu1 %vm596_vm2, %v14717_v48  ;;  %19237 = vst [vmem:[#allocation50_spill] sm:$0xff] %v14821_v14  ;;  %v14831_v48 = vld [vmem:[%s14396_s13 + $0x3c8] sm:$0xff]  ;;  %19238 = vst [vmem:[#allocation51_spill] sm:$0xff] %v14843_v11  ;;  %v419_v7 = vrot.slane %v14402_v5, 6  ;;  %v1200_v55 = vrot.slane %v14417_v12, 4 }
  0x4f   : > { %12130 = vmatprep.mubr.msk.f32.mxu0 %vm596_vm2, %v14795_v51  ;;  %v1899_v10 = vrot.slane %v14831_v48, 1  ;;  %19240 = vst [vmem:[#allocation53_spill] sm:$0xff] %v14864_v27 }
  0x51   : > { %11931 = vmatmul.mubr.msk.f32.gmra.mrb[24].mxu1 %vm596_vm2, %v14739_v29  ;;  %v14847_v29 = vsel %vm513_vm1, %v1894_v28, %v1895_v30  ;;  %v1902_v28 = vrot.slane %v14852_v54, 1 }
  0x52   : > { %12131 = vmatmul.mubr.msk.f32.gmra.mrb[24].mxu0 %vm596_vm2, %v14817_v62  ;;  %11933 = vmatprep.mubr.msk.f32.mxu1 %vm596_vm2, %v14743_v50  ;;  %19239 = vst [vmem:[#allocation52_spill] sm:$0xff] %v14847_v29  ;;  %v14869_v50 = vsel %vm513_vm1, %v1899_v10, %v1900_v42 }
  0x53   : > { %12133 = vmatprep.mubr.msk.f32.mxu0 %vm596_vm2, %v14821_v14  ;;  %v417_v14 = vrot.slane %v14399_v4, 6  ;;  %19241 = vst [vmem:[#allocation54_spill] sm:$0xff] %v14869_v50  ;;  %v14884_v30 = vsel %vm513_vm1, %v1900_v42, %v1902_v28  ;;  %v236_v4 = vld [vmem:[%s14396_s13 + $0x140] sm:$0xff]  ;;  %v1203_v42 = vrot.slane %v14437_v22, 4  ;;  %v1205_v28 = vrot.slane %v14444_v25, 4 }
  0x54   : > { %19242 = vst [vmem:[#allocation55_spill] sm:$0xff] %v14884_v30  ;;  %v429_v25 = vrot.slane %v14467_v32, 6 }
  0x55   : > { %11934 = vmatmul.mubr.msk.f32.gmra.mrb[26].mxu1 %vm596_vm2, %v14765_v35  ;;  %v418_v10 = vsel %vm415_vm3, %v416_v37, %v417_v14  ;;  %v420_v12 = vsel %vm415_vm3, %v417_v14, %v419_v7  ;;  %v426_v37 = vrot.slane %v236_v4, 6  ;;  %v241_v14 = vld [vmem:[%s14396_s13 + $0x168] sm:$0xff] }
  0x56   : > { %12134 = vmatmul.mubr.msk.f32.gmra.mrb[26].mxu0 %vm596_vm2, %v14843_v11  ;;  %11936 = vmatprep.mubr.msk.f32.mxu1 %vm596_vm2, %v14769_v13  ;;  %v1197_v11 = vrot.slane %v14405_v6, 4  ;;  %v1198_v13 = vrot.slane %v14410_v9, 4 }
  0x57   : > { %12136 = vmatprep.mubr.msk.f32.mxu0 %vm596_vm2, %v14847_v29  ;;  %v231_v29 = vld [vmem:[%s14396_s13 + $0x118] sm:$0xff] }
  0x58   : > { %v421_v35 = vrot.slane %v231_v29, 6  ;;  %v424_v29 = vrot.slane %v14426_v17, 6 }
  0x59   : > { %11937 = vmatmul.mubr.msk.f32.gmra.mrb[28].mxu1 %vm596_vm2, %v14791_v23  ;;  %v14889_v23 = vsel %vm661_vm0, %v1197_v11, %v1198_v13  ;;  %v14905_v11 = vsel %vm661_vm0, %v1198_v13, %v1200_v55  ;;  %v14920_v13 = vld [vmem:[%s18899_s1 + $0xc] sm:$0xf] }
  0x5a   : > { %12137 = vmatmul.mubr.msk.f32.gmra.mrb[28].mxu0 %vm596_vm2, %v14864_v27  ;;  %11939 = vmatprep.mubr.msk.f32.mxu1 %vm596_vm2, %v14795_v51  ;;  %v422_v27 = vrot.slane %v14423_v16, 6  ;;  %19243 = vst [vmem:[#allocation56_spill] sm:$0xff] %v14905_v11 }
  0x5b   : > { %12139 = vmatprep.mubr.msk.f32.mxu0 %vm596_vm2, %v14869_v50  ;;  %v1202_v50 = vrot.slane %v14429_v18, 4 }
  0x5c   : > { %v423_v51 = vsel %vm415_vm3, %v421_v35, %v422_v27  ;;  %v425_v4 = vsel %vm415_vm3, %v422_v27, %v424_v29  ;;  %v1210_v35 = vrot.slane %v14494_v41, 4  ;;  %v431_v27 = vrot.slane %v241_v14, 6 }
  0x5d   : > { %11940 = vmatmul.mubr.msk.f32.gmra.mrb[30].mxu1 %vm596_vm2, %v14817_v62  ;;  %v427_v62 = vrot.slane %v14464_v31, 6  ;;  %v14915_v7 = vsel %vm661_vm0, %v1202_v50, %v1203_v42  ;;  %v14932_v50 = vld [vmem:[%s18899_s1 + $0x1c] sm:$0xf]  ;;  %v1212_v29 = vrot.slane %v14506_v46, 4  ;;  %v437_v14 = vrot.slane %v14429_v18, 6 }
  0x5e   : > { %12140 = vmatmul.mubr.msk.f32.gmra.mrb[30].mxu0 %vm596_vm2, %v14884_v30  ;;  %11944 = vmatprep.mubr.msk.f32.mxu1 %vm596_vm2, %v418_v10  ;;  %v1207_v30 = vrot.slane %v14470_v33, 4  ;;  %v1208_v10 = vrot.slane %v14488_v39, 4  ;;  %v439_v18 = vrot.slane %v14437_v22, 6  ;;  %v1223_v22 = vrot.slane %v14574_v3, 4 }
  0x5f   : > { %12144 = vmatprep.mubr.msk.f32.mxu0 %vm596_vm2, %v14889_v23  ;;  %v428_v55 = vsel %vm415_vm3, %v426_v37, %v427_v62 }
  0x60   : > { %v14945_v41 = vsel %vm661_vm0, %v1207_v30, %v1208_v10  ;;  %v434_v30 = vrot.slane %v14410_v9, 6  ;;  %v251_v9 = vld [vmem:[%s14396_s13 + $0x1b8] sm:$0xff] }
  0x61   : > { %11945 = vmatmul.mubr.msk.f32.vlgmr.msra.gmra.mrb[0].mxu1 %vm596_vm2, %v420_v12  ;;  %v432_v12 = vrot.slane %v14405_v6, 6  ;;  %v430_v6 = vsel %vm415_vm3, %v427_v62, %v429_v25  ;;  %v1217_v62 = vrot.slane %v14540_v57, 4 }
  0x62   : > { %11993 = vmatpush3.msk.msra.mxu1 %vm661_vm0, %v14449_v26  ;;  %12145 = vmatmul.mubr.msk.f32.vlgmr.msra.gmra.mrb[0].mxu0 %vm596_vm2, %v14905_v11  ;;  %v14938_v26 = vsel %vm661_vm0, %v1203_v42, %v1205_v28  ;;  %v246_v11 = vld [vmem:[%s14396_s13 + $0x190] sm:$0xff]  ;;  %v1215_v28 = vrot.slane %v14533_v56, 4 }
  0x63   : > { %12193 = vmatpush3.msk.msra.mxu0 %vm661_vm0, %v14475_v34  ;;  %11947 = vmatprep.mubr.msk.f32.mxu1 %vm596_vm2, %v423_v51  ;;  %v1213_v34 = vrot.slane %v14509_v47, 4  ;;  %v14960_v51 = vsel %vm661_vm0, %v1208_v10, %v1210_v35  ;;  %v14966_v42 = vsel %vm415_vm3, %v431_v27, %v432_v12  ;;  %v436_v37 = vrot.slane %v246_v11, 6 }
  0x64   : > { %12147 = vmatprep.mubr.msk.f32.mxu0 %vm596_vm2, %v14915_v7  ;;  %12042 = vmatprep.subr.msk.mxu1 %vm661_vm0, %v14920_v13  ;;  %19244 = vst [vmem:[#allocation57_spill] sm:$0xff] %v14966_v42  ;;  %v1218_v10 = vrot.slane %v14543_v58, 4  ;;  %v14982_v56 = vsel %vm415_vm3, %v432_v12, %v434_v30  ;;  %v1220_v11 = vrot.slane %v14566_v1, 4  ;;  %v442_v27 = vrot.slane %v14470_v33, 6  ;;  %v256_v1 = vld [vmem:[%s14396_s13 + $0x1e0] sm:$0xff] }
  0x65   : > { %11948 = vmatmul.mubr.msk.f32.gmra.mrb[2].mxu1 %vm596_vm2, %v425_v4  ;;  %12242 = vmatprep.subr.msk.mxu0 %vm661_vm0, %v14932_v50  ;;  %v14971_v4 = vsel %vm661_vm0, %v1212_v29, %v1213_v34  ;;  %19245 = vst [vmem:[#allocation58_spill] sm:$0xff] %v14982_v56  ;;  %v14989_v25 = vsel %vm661_vm0, %v1213_v34, %v1215_v28  ;;  %v1222_v12 = vrot.slane %v14571_v2, 4  ;;  %v1225_v28 = vrot.slane %v14592_v15, 4 }
  0x66   : > { %12148 = vmatmul.mubr.msk.f32.gmra.mrb[2].mxu0 %vm596_vm2, %v14938_v26  ;;  %11950 = vmatprep.mubr.msk.f32.mxu1 %vm596_vm2, %v428_v55  ;;  %v14992_v35 = vsel %vm415_vm3, %v436_v37, %v437_v14  ;;  %v441_v55 = vrot.slane %v251_v9, 6  ;;  %v14996_v29 = vsel %vm661_vm0, %v1217_v62, %v1218_v10  ;;  %v15008_v33 = vsel %vm415_vm3, %v437_v14, %v439_v18 }
  0x67   : > { %12150 = vmatprep.mubr.msk.f32.mxu0 %vm596_vm2, %v14945_v41  ;;  %19246 = vst [vmem:[#allocation59_spill] sm:$0xff] %v14992_v35  ;;  %19247 = vst [vmem:[#allocation60_spill] sm:$0xff] %v15008_v33  ;;  %v15011_v34 = vsel %vm661_vm0, %v1218_v10, %v1220_v11  ;;  %v446_v37 = vrot.slane %v256_v1, 6  ;;  %v447_v62 = vrot.slane %v14506_v46, 6  ;;  %v15022_v9 = vsel %vm661_vm0, %v1222_v12, %v1223_v22 }
  0x68   : > { %v15017_v30 = vsel %vm415_vm3, %v441_v55, %v442_v27  ;;  %v1227_v14 = vrot.slane %v14597_v20, 4  ;;  %v1228_v10 = vrot.slane %v14600_v21, 4  ;;  %v449_v15 = vrot.slane %v14509_v47, 6 }
  0x69   : > { %11951 = vmatmul.mubr.msk.f32.gmra.mrb[4].mxu1 %vm596_vm2, %v430_v6  ;;  %v444_v6 = vrot.slane %v14488_v39, 6  ;;  %19248 = vst [vmem:[#allocation61_spill] sm:$0xff] %v15017_v30  ;;  %v261_v39 = vld [vmem:[%s14396_s13 + $0x208] sm:$0xff]  ;;  %v1230_v18 = vrot.slane %v14618_v43, 4  ;;  %v15041_v11 = vsel %vm661_vm0, %v1223_v22, %v1225_v28  ;;  %v15044_v55 = vsel %vm415_vm3, %v446_v37, %v447_v62  ;;  %v266_v43 = vld [vmem:[%s14396_s13 + $0x230] sm:$0xff] }
  0x6a   : > { %12151 = vmatmul.mubr.msk.f32.gmra.mrb[4].mxu0 %vm596_vm2, %v14960_v51  ;;  %11953 = vmatprep.mubr.msk.f32.mxu1 %vm596_vm2, %v14966_v42  ;;  %v451_v12 = vrot.slane %v261_v39, 6  ;;  %v452_v1 = vrot.slane %v14540_v57, 6  ;;  %v1233_v47 = vrot.slane %v14626_v45, 4  ;;  %v15060_v57 = vsel %vm415_vm3, %v447_v62, %v449_v15 }
  0x6b   : > { %12153 = vmatprep.mubr.msk.f32.mxu0 %vm596_vm2, %v14971_v4  ;;  %v15034_v46 = vsel %vm415_vm3, %v442_v27, %v444_v6  ;;  %v1232_v27 = vrot.slane %v14623_v44, 4  ;;  %v15063_v22 = vsel %vm661_vm0, %v1228_v10, %v1230_v18  ;;  %v454_v6 = vrot.slane %v14543_v58, 6  ;;  %v271_v58 = vld [vmem:[%s14396_s13 + $0x258] sm:$0xff] }
  0x6c   : > { %19249 = vst [vmem:[#allocation62_spill] sm:$0xff] %v15034_v46  ;;  %v15069_v28 = vsel %vm415_vm3, %v451_v12, %v452_v1  ;;  %v1235_v37 = vrot.slane %v14644_v63, 4  ;;  %v457_v39 = vrot.slane %v14571_v2, 6  ;;  %v1237_v62 = vrot.slane %v14649_v0, 4 }
  0x6d   : > { %11954 = vmatmul.mubr.msk.f32.gmra.mrb[6].mxu1 %vm596_vm2, %v14982_v56  ;;  %v15086_v2 = vsel %vm415_vm3, %v452_v1, %v454_v6  ;;  %v459_v63 = vrot.slane %v14574_v3, 6  ;;  %v1240_v15 = vrot.slane %v14670_v53, 4  ;;  %v1242_v1 = vrot.slane %v14675_v49, 4  ;;  %v276_v53 = vld [vmem:[%s14396_s13 + $0x280] sm:$0xff] }
  0x6e   : > { %12154 = vmatmul.mubr.msk.f32.gmra.mrb[6].mxu0 %vm596_vm2, %v14989_v25  ;;  %11956 = vmatprep.mubr.msk.f32.mxu1 %vm596_vm2, %v14992_v35  ;;  %v15093_v18 = vsel %vm661_vm0, %v1233_v47, %v1235_v37  ;;  %v1243_v3 = vrot.slane %v14678_v38, 4  ;;  %v464_v6 = vrot.slane %v14600_v21, 6  ;;  %v281_v21 = vld [vmem:[%s14396_s13 + $0x2a8] sm:$0xff]  ;;  %v477_v42 = vrot.slane %v14675_v49, 6 }
  0x6f   : > { %12156 = vmatprep.mubr.msk.f32.mxu0 %vm596_vm2, %v14996_v29  ;;  %19251 = vst [vmem:[#allocation64_spill] sm:$0xff] %v15093_v18 }
  0x70   : > { %v15126_v35 = vsel %vm661_vm0, %v1242_v1, %v1243_v3  ;;  %v471_v1 = vrot.slane %v281_v21, 6 }
  0x71   : > { %11957 = vmatmul.mubr.msk.f32.gmra.mrb[8].mxu1 %vm596_vm2, %v15008_v33  ;;  %19254 = vst [vmem:[#allocation67_spill] sm:$0xff] %v15126_v35 }
  0x72   : > { %12157 = vmatmul.mubr.msk.f32.gmra.mrb[8].mxu0 %vm596_vm2, %v15011_v34  ;;  %11959 = vmatprep.mubr.msk.f32.mxu1 %vm596_vm2, %v15017_v30  ;;  %v15048_v30 = vsel %vm661_vm0, %v1227_v14, %v1228_v10  ;;  %v456_v14 = vrot.slane %v266_v43, 6  ;;  %v1238_v10 = vrot.slane %v14652_v8, 4  ;;  %v462_v43 = vrot.slane %v14597_v20, 6 }
  0x73   : > { %12159 = vmatprep.mubr.msk.f32.mxu0 %vm596_vm2, %v15022_v9  ;;  %v15112_v20 = vsel %vm415_vm3, %v457_v39, %v459_v63  ;;  %v1250_v63 = vrot.slane %v14722_v19, 4  ;;  %v286_v19 = vld [vmem:[%s14396_s13 + $0x2d0] sm:$0xff] }
  0x74   : > { %v15096_v12 = vsel %vm415_vm3, %v456_v14, %v457_v39  ;;  %v15100_v33 = vsel %vm661_vm0, %v1237_v62, %v1238_v10  ;;  %v1245_v14 = vrot.slane %v14696_v59, 4  ;;  %v466_v62 = vrot.slane %v276_v53, 6 }
  0x75   : > { %11960 = vmatmul.mubr.msk.f32.gmra.mrb[10].mxu1 %vm596_vm2, %v15034_v46  ;;  %v15074_v46 = vsel %vm661_vm0, %v1232_v27, %v1233_v47  ;;  %v461_v27 = vrot.slane %v271_v58, 6  ;;  %19252 = vst [vmem:[#allocation65_spill] sm:$0xff] %v15100_v33  ;;  %v15115_v47 = vsel %vm661_vm0, %v1238_v10, %v1240_v15  ;;  %v467_v58 = vrot.slane %v14623_v44, 6 }
  0x76   : > { %12160 = vmatmul.mubr.msk.f32.gmra.mrb[10].mxu0 %vm596_vm2, %v15041_v11  ;;  %11962 = vmatprep.mubr.msk.f32.mxu1 %vm596_vm2, %v15044_v55  ;;  %19250 = vst [vmem:[#allocation63_spill] sm:$0xff] %v15074_v46  ;;  %19253 = vst [vmem:[#allocation66_spill] sm:$0xff] %v15115_v47  ;;  %v1247_v39 = vrot.slane %v14701_v52, 4  ;;  %v1248_v10 = vrot.slane %v14704_v61, 4  ;;  %v15138_v59 = vsel %vm415_vm3, %v462_v43, %v464_v6  ;;  %v469_v44 = vrot.slane %v14626_v45, 6 }
  0x77   : > { %12162 = vmatprep.mubr.msk.f32.mxu0 %vm596_vm2, %v15048_v30  ;;  %v15121_v37 = vsel %vm415_vm3, %v461_v27, %v462_v43  ;;  %v15145_v15 = vsel %vm661_vm0, %v1243_v3, %v1245_v14  ;;  %v15148_v27 = vsel %vm415_vm3, %v466_v62, %v467_v58  ;;  %v472_v53 = vrot.slane %v14649_v0, 6  ;;  %v19258_v62 = vld [vmem:[#allocation36_spill] sm:$0xff] }
  0x78   : > { %19255 = vst [vmem:[#allocation68_spill] sm:$0xff] %v15145_v15  ;;  %v15152_v56 = vsel %vm661_vm0, %v1247_v39, %v1248_v10  ;;  %v1252_v43 = vrot.slane %v14727_v36, 4  ;;  %v1253_v45 = vrot.slane %v14730_v60, 4  ;;  %v15164_v0 = vsel %vm415_vm3, %v467_v58, %v469_v44  ;;  %v19260_v58 = vld [vmem:[#allocation37_spill] sm:$0xff] }
  0x79   : > { %11963 = vmatmul.mubr.msk.f32.gmra.mrb[12].mxu1 %vm596_vm2, %v15060_v57  ;;  %19256 = vst [vmem:[#allocation69_spill] sm:$0xff] %v15152_v56  ;;  %v15167_v3 = vsel %vm661_vm0, %v1248_v10, %v1250_v63  ;;  %v474_v6 = vrot.slane %v14652_v8, 6  ;;  %v15173_v14 = vsel %vm415_vm3, %v471_v1, %v472_v53  ;;  %v1255_v39 = vrot.slane %v19258_v62, 4  ;;  %v19261_v10 = vld [vmem:[#allocation38_spill] sm:$0xff]  ;;  %v291_v8 = vld [vmem:[%s14396_s13 + $0x2f8] sm:$0xff] }
  0x7a   : > { %12163 = vmatmul.mubr.msk.f32.gmra.mrb[12].mxu0 %vm596_vm2, %v15063_v22  ;;  %11965 = vmatprep.mubr.msk.f32.mxu1 %vm596_vm2, %v15069_v28  ;;  %19257 = vst [vmem:[#allocation70_spill] sm:$0xff] %v15167_v3  ;;  %v476_v21 = vrot.slane %v286_v19, 6  ;;  %v1257_v44 = vrot.slane %v19260_v58, 4  ;;  %v1258_v63 = vrot.slane %v19261_v10, 4  ;;  %v479_v1 = vrot.slane %v14678_v38, 6  ;;  %v19266_v38 = vld [vmem:[#allocation43_spill] sm:$0xff] }
  0x7b   : > { %12165 = vmatprep.mubr.msk.f32.mxu0 %vm596_vm2, %v15074_v46  ;;  %v15190_v49 = vsel %vm415_vm3, %v472_v53, %v474_v6  ;;  %v15197_v62 = vsel %vm661_vm0, %v1253_v45, %v1255_v39  ;;  %v19265_v53 = vld [vmem:[#allocation42_spill] sm:$0xff]  ;;  %v484_v39 = vrot.slane %v14704_v61, 6 }
  0x7c   : > { %19263 = vst [vmem:[#allocation37_spill] sm:$0xff] %v15197_v62  ;;  %v2178_v6 = vrot.slane %v19265_v53, 4  ;;  %v301_v46 = vld [vmem:[%s14396_s13 + $0x348] sm:$0xff] }
  0x7d   : > { %11966 = vmatmul.mubr.msk.f32.gmra.mrb[14].mxu1 %vm596_vm2, %v15086_v2 }
  0x7e   : > { %12166 = vmatmul.mubr.msk.f32.gmra.mrb[14].mxu0 %vm596_vm2, %v15093_v18  ;;  %11968 = vmatprep.mubr.msk.f32.mxu1 %vm596_vm2, %v15096_v12 }
  0x7f   : > { %12168 = vmatprep.mubr.msk.f32.mxu0 %vm596_vm2, %v15100_v33  ;;  %v2179_v33 = vrot.slane %v19266_v38, 4 }
  0x81   : > { %11969 = vmatmul.mubr.msk.f32.gmra.mrb[16].mxu1 %vm596_vm2, %v15112_v20  ;;  %v15230_v18 = vsel %vm661_vm0, %v2178_v6, %v2179_v33 }
  0x82   : > { %12169 = vmatmul.mubr.msk.f32.gmra.mrb[16].mxu0 %vm596_vm2, %v15115_v47  ;;  %11971 = vmatprep.mubr.msk.f32.mxu1 %vm596_vm2, %v15121_v37  ;;  %v15204_v47 = vsel %vm661_vm0, %v1257_v44, %v1258_v63  ;;  %v19268_v44 = vld [vmem:[#allocation46_spill] sm:$0xff] }
  0x83   : > { %12171 = vmatprep.mubr.msk.f32.mxu0 %vm596_vm2, %v15126_v35  ;;  %v482_v35 = vrot.slane %v14701_v52, 6  ;;  %19264 = vst [vmem:[#allocation38_spill] sm:$0xff] %v15204_v47  ;;  %v15216_v52 = vsel %vm415_vm3, %v477_v42, %v479_v1 }
  0x85   : > { %11972 = vmatmul.mubr.msk.f32.gmra.mrb[18].mxu1 %vm596_vm2, %v15138_v59  ;;  %v15242_v61 = vsel %vm415_vm3, %v482_v35, %v484_v39  ;;  %v19274_v39 = vld [vmem:[#allocation5_spill] sm:$0xff] }
  0x86   : > { %12172 = vmatmul.mubr.msk.f32.gmra.mrb[18].mxu0 %vm596_vm2, %v15145_v15  ;;  %11974 = vmatprep.mubr.msk.f32.mxu1 %vm596_vm2, %v15148_v27  ;;  %v15178_v15 = vsel %vm661_vm0, %v1252_v43, %v1253_v45  ;;  %v19262_v43 = vld [vmem:[#allocation41_spill] sm:$0xff] }
  0x87   : > { %12174 = vmatprep.mubr.msk.f32.mxu0 %vm596_vm2, %v15152_v56  ;;  %19259 = vst [vmem:[#allocation36_spill] sm:$0xff] %v15178_v15  ;;  %v1260_v19 = vrot.slane %v19262_v43, 4  ;;  %v15200_v56 = vsel %vm415_vm3, %v476_v21, %v477_v42  ;;  %v296_v43 = vld [vmem:[%s14396_s13 + $0x320] sm:$0xff]  ;;  %v19269_v42 = vld [vmem:[#allocation47_spill] sm:$0xff] }
  0x88   : > { %v2183_v1 = vrot.slane %v19269_v42, 4 }
  0x89   : > { %11975 = vmatmul.mubr.msk.f32.gmra.mrb[20].mxu1 %vm596_vm2, %v15164_v0  ;;  %v15219_v45 = vsel %vm661_vm0, %v1258_v63, %v1260_v19  ;;  %v19270_v63 = vld [vmem:[#allocation48_spill] sm:$0xff] }
  0x8a   : > { %12175 = vmatmul.mubr.msk.f32.gmra.mrb[20].mxu0 %vm596_vm2, %v15167_v3  ;;  %11977 = vmatprep.mubr.msk.f32.mxu1 %vm596_vm2, %v15173_v14  ;;  %v481_v3 = vrot.slane %v291_v8, 6  ;;  %19267 = vst [vmem:[#allocation41_spill] sm:$0xff] %v15219_v45  ;;  %v2181_v8 = vrot.slane %v19268_v44, 4  ;;  %v2184_v19 = vrot.slane %v19270_v63, 4  ;;  %v491_v44 = vrot.slane %v301_v46, 6 }
  0x8b   : > { %12177 = vmatprep.mubr.msk.f32.mxu0 %vm596_vm2, %v15178_v15  ;;  %v487_v15 = vrot.slane %v14727_v36, 6  ;;  %v489_v36 = vrot.slane %v14730_v60, 6  ;;  %v2189_v60 = vrot.slane %v14834_v40, 4  ;;  %v494_v46 = vrot.slane %v19261_v10, 6 }
  0x8c   : > { %v15225_v21 = vsel %vm415_vm3, %v481_v3, %v482_v35  ;;  %v2186_v3 = vrot.slane %v14826_v24, 4  ;;  %v15249_v6 = vsel %vm661_vm0, %v2179_v33, %v2181_v8  ;;  %v2188_v35 = vrot.slane %v14831_v48, 4 }
  0x8d   : > { %11978 = vmatmul.mubr.msk.f32.gmra.mrb[22].mxu1 %vm596_vm2, %v15190_v49  ;;  %19271 = vst [vmem:[#allocation42_spill] sm:$0xff] %v15249_v6  ;;  %v15267_v24 = vsel %vm415_vm3, %v487_v15, %v489_v36  ;;  %v1182_v8 = vrot.slane %v19274_v39, 4 }
  0x8e   : > { %12178 = vmatmul.mubr.msk.f32.gmra.mrb[22].mxu0 %vm596_vm2, %v15197_v62  ;;  %11980 = vmatprep.mubr.msk.f32.mxu1 %vm596_vm2, %v15200_v56  ;;  %v486_v62 = vrot.slane %v296_v43, 6  ;;  %v15270_v33 = vsel %vm661_vm0, %v2184_v19, %v2186_v3  ;;  %v1187_v3 = vrot.slane %v14423_v16, 4  ;;  %v1193_v16 = vrot.slane %v14467_v32, 4  ;;  %v15329_v32 = vld [vmem:[%s18899_s1 + $0x20] sm:$0xf] }
  0x8f   : > { %12180 = vmatprep.mubr.msk.f32.mxu0 %vm596_vm2, %v15204_v47  ;;  %v15256_v47 = vsel %vm661_vm0, %v2183_v1, %v2184_v19  ;;  %19273 = vst [vmem:[#allocation46_spill] sm:$0xff] %v15270_v33  ;;  %v1183_v1 = vrot.slane %v14402_v5, 4 }
  0x90   : > { %v15252_v43 = vsel %vm415_vm3, %v486_v62, %v487_v15  ;;  %19272 = vst [vmem:[#allocation43_spill] sm:$0xff] %v15256_v47  ;;  %v2191_v62 = vrot.slane %v14852_v54, 4  ;;  %v15282_v15 = vsel %vm661_vm0, %v2188_v35, %v2189_v60  ;;  %v19276_v54 = vld [vmem:[#allocation6_spill] sm:$0xff]  ;;  %v19278_v35 = vld [vmem:[#allocation8_spill] sm:$0xff] }
  0x91   : > { %11981 = vmatmul.mubr.msk.f32.gmra.mrb[24].mxu1 %vm596_vm2, %v15216_v52  ;;  %19275 = vst [vmem:[#allocation47_spill] sm:$0xff] %v15282_v15  ;;  %v1185_v19 = vrot.slane %v19276_v54, 4  ;;  %v1184_v36 = vsel %vm661_vm0, %v1182_v8, %v1183_v1 }
  0x92   : > { %12181 = vmatmul.mubr.msk.f32.gmra.mrb[24].mxu0 %vm596_vm2, %v15219_v45  ;;  %11983 = vmatprep.mubr.msk.f32.mxu1 %vm596_vm2, %v15225_v21  ;;  %v492_v45 = vrot.slane %v19260_v58, 6  ;;  %v15297_v5 = vsel %vm661_vm0, %v2189_v60, %v2191_v62  ;;  %v1192_v60 = vrot.slane %v14464_v31, 4  ;;  %v15318_v62 = vld [vmem:[%s18899_s1 + $0x28] sm:$0xf]  ;;  %v19279_v31 = vld [vmem:[#allocation13_spill] sm:$0xff] }
  0x93   : > { %12183 = vmatprep.mubr.msk.f32.mxu0 %vm596_vm2, %v15230_v18  ;;  %19277 = vst [vmem:[#allocation48_spill] sm:$0xff] %v15297_v5  ;;  %v1195_v8 = vrot.slane %v19279_v31, 4 }
  0x94   : > { %v15276_v58 = vsel %vm415_vm3, %v491_v44, %v492_v45  ;;  %v15291_v10 = vsel %vm415_vm3, %v492_v45, %v494_v46  ;;  %v1188_v44 = vrot.slane %v14426_v17, 4  ;;  %v1186_v45 = vsel %vm661_vm0, %v1183_v1, %v1185_v19 }
  0x95   : > { %11984 = vmatmul.mubr.msk.f32.gmra.mrb[26].mxu1 %vm596_vm2, %v15242_v61  ;;  %v1190_v46 = vrot.slane %v19278_v35, 4  ;;  %v1194_v1 = vsel %vm661_vm0, %v1192_v60, %v1193_v16  ;;  %v1603_v19 = vrot.slane %v19269_v42, 6  ;;  %v1608_v35 = vrot.slane %v14831_v48, 6  ;;  %v321_v60 = vld [vmem:[%s14396_s13 + $0x3e8] sm:$0xff] }
  0x96   : > { %12184 = vmatmul.mubr.msk.f32.gmra.mrb[26].mxu0 %vm596_vm2, %v15249_v6  ;;  %11986 = vmatprep.mubr.msk.f32.mxu1 %vm596_vm2, %v15252_v43  ;;  %v1189_v17 = vsel %vm661_vm0, %v1187_v3, %v1188_v44  ;;  %v19281_v3 = vld [vmem:[#allocation63_spill] sm:$0xff]  ;;  %v1610_v48 = vrot.slane %v14834_v40, 6  ;;  %v2476_v31 = vrot.slane %v321_v60, 6  ;;  %v19292_v6 = vld [vmem:[#allocation41_spill] sm:$0xff] }
  0x97   : > { %12186 = vmatprep.mubr.msk.f32.mxu0 %vm596_vm2, %v15256_v47  ;;  %v1191_v39 = vsel %vm661_vm0, %v1188_v44, %v1190_v46  ;;  %v1605_v44 = vrot.slane %v19270_v63, 6  ;;  %v19282_v46 = vld [vmem:[#allocation64_spill] sm:$0xff]  ;;  %v19285_v40 = vld [vmem:[#allocation67_spill] sm:$0xff] }
  0x98   : > { %v19289_v47 = vld [vmem:[#allocation36_spill] sm:$0xff] }
  0x99   : > { %11987 = vmatmul.mubr.msk.f32.gmra.mrb[28].mxu1 %vm596_vm2, %v15267_v24  ;;  %v15441_v63 = vsel %vm415_vm3, %v1603_v19, %v1605_v44  ;;  %v331_v44 = vld [vmem:[%s14396_s13 + $0x438] sm:$0xff] }
  0x9a   : > { %12187 = vmatmul.mubr.msk.f32.gmra.mrb[28].mxu0 %vm596_vm2, %v15270_v33  ;;  %11989 = vmatprep.mubr.msk.f32.mxu1 %vm596_vm2, %v15276_v58  ;;  %v19288_v33 = vld [vmem:[#allocation70_spill] sm:$0xff] }
  0x9b   : > { %12189 = vmatprep.mubr.msk.f32.mxu0 %vm596_vm2, %v15282_v15  ;;  %v15488_v15 = vld [vmem:[%s14396_s13 + $0x448] sm:$0xff] }
  0x9d   : > { %11990 = vmatmul.mubr.msk.f32.gmra.mrb[30].mxu1 %vm596_vm2, %v15291_v10 }
  0x9e   : > { %12190 = vmatmul.mubr.msk.f32.gmra.mrb[30].mxu0 %vm596_vm2, %v15297_v5  ;;  %11994 = vmatprep.mubr.msk.f32.mxu1 %vm596_vm2, %v1184_v36  ;;  %v316_v36 = vld [vmem:[%s14396_s13 + $0x3c0] sm:$0xff] }
  0x9f   : > { %12194 = vmatprep.mubr.msk.f32.mxu0 %vm596_vm2, %v15044_v55 }
  0xa1   : > { %11995 = vmatmul.mubr.msk.f32.vlgmr.msra.gmra.mrb[0].mxu1 %vm596_vm2, %v1186_v45  ;;  %v1607_v45 = vrot.slane %v316_v36, 6  ;;  %v19286_v36 = vld [vmem:[#allocation68_spill] sm:$0xff] }
  0xa2   : > { %12043 = vmatpush3.msk.msra.mxu1 %vm661_vm0, %v14920_v13  ;;  %12195 = vmatmul.mubr.msk.f32.vlgmr.msra.gmra.mrb[0].mxu0 %vm596_vm2, %v15060_v57  ;;  %v1196_v13 = vsel %vm661_vm0, %v1193_v16, %v1195_v8  ;;  %v15432_v16 = vld [vmem:[%s14396_s13 + $0x3f0] sm:$0xff] }
  0xa3   : > { %12243 = vmatpush3.msk.msra.mxu0 %vm661_vm0, %v14932_v50  ;;  %11997 = vmatprep.mubr.msk.f32.mxu1 %vm596_vm2, %v1189_v17  ;;  %v19280_v50 = vld [vmem:[#allocation56_spill] sm:$0xff]  ;;  %v19283_v17 = vld [vmem:[#allocation65_spill] sm:$0xff]  ;;  %v2477_v8 = vrot.slane %v15432_v16, 6 }
  0xa4   : > { %12197 = vmatprep.mubr.msk.f32.mxu0 %vm596_vm2, %v15069_v28  ;;  %12342 = vmatprep.subr.msk.mxu1 %vm661_vm0, %v15318_v62 }
  0xa5   : > { %11998 = vmatmul.mubr.msk.f32.gmra.mrb[2].mxu1 %vm596_vm2, %v1191_v39  ;;  %12292 = vmatprep.subr.msk.mxu0 %vm661_vm0, %v15329_v32  ;;  %v15445_v39 = vsel %vm415_vm3, %v1607_v45, %v1608_v35  ;;  %v15476_v45 = vld [vmem:[%s14396_s13 + $0x440] sm:$0xff] }
  0xa6   : > { %12198 = vmatmul.mubr.msk.f32.gmra.mrb[2].mxu0 %vm596_vm2, %v15086_v2  ;;  %12000 = vmatprep.mubr.msk.f32.mxu1 %vm596_vm2, %v1194_v1  ;;  %v15449_v1 = vld [vmem:[%s14396_s13 + $0x3f8] sm:$0xff]  ;;  %v2487_v5 = vrot.slane %v15476_v45, 6 }
  0xa7   : > { %12200 = vmatprep.mubr.msk.f32.mxu0 %vm596_vm2, %v15096_v12 }
  0xa9   : > { %12001 = vmatmul.mubr.msk.f32.gmra.mrb[4].mxu1 %vm596_vm2, %v1196_v13  ;;  %v19284_v13 = vld [vmem:[#allocation66_spill] sm:$0xff] }
  0xaa   : > { %12201 = vmatmul.mubr.msk.f32.gmra.mrb[4].mxu0 %vm596_vm2, %v15112_v20  ;;  %12003 = vmatprep.mubr.msk.f32.mxu1 %vm596_vm2, %v14889_v23  ;;  %v306_v23 = vld [vmem:[%s14396_s13 + $0x370] sm:$0xff] }
  0xab   : > { %12203 = vmatprep.mubr.msk.f32.mxu0 %vm596_vm2, %v15121_v37 }
  0xad   : > { %12004 = vmatmul.mubr.msk.f32.gmra.mrb[6].mxu1 %vm596_vm2, %v19280_v50  ;;  %v326_v50 = vld [vmem:[%s14396_s13 + $0x410] sm:$0xff] }
  0xae   : > { %12204 = vmatmul.mubr.msk.f32.gmra.mrb[6].mxu0 %vm596_vm2, %v15138_v59  ;;  %12006 = vmatprep.mubr.msk.f32.mxu1 %vm596_vm2, %v14915_v7  ;;  %v1597_v7 = vrot.slane %v306_v23, 6  ;;  %v15455_v23 = vld [vmem:[%s14396_s13 + $0x418] sm:$0xff] }
  0xaf   : > { %12206 = vmatprep.mubr.msk.f32.mxu0 %vm596_vm2, %v15148_v27 }
  0xb1   : > { %12007 = vmatmul.mubr.msk.f32.gmra.mrb[8].mxu1 %vm596_vm2, %v14938_v26  ;;  %v1598_v26 = vrot.slane %v19265_v53, 6 }
  0xb2   : > { %12207 = vmatmul.mubr.msk.f32.gmra.mrb[8].mxu0 %vm596_vm2, %v15164_v0  ;;  %12009 = vmatprep.mubr.msk.f32.mxu1 %vm596_vm2, %v14945_v41  ;;  %v311_v41 = vld [vmem:[%s14396_s13 + $0x398] sm:$0xff] }
  0xb3   : > { %12209 = vmatprep.mubr.msk.f32.mxu0 %vm596_vm2, %v15173_v14  ;;  %v15408_v54 = vsel %vm415_vm3, %v1597_v7, %v1598_v26  ;;  %v1602_v53 = vrot.slane %v311_v41, 6  ;;  %v15464_v7 = vsel %vm415_vm3, %v1608_v35, %v1610_v48  ;;  %v2478_v41 = vsel %vm415_vm3, %v2476_v31, %v2477_v8  ;;  %v19287_v35 = vld [vmem:[#allocation69_spill] sm:$0xff] }
  0xb5   : > { %12010 = vmatmul.mubr.msk.f32.gmra.mrb[10].mxu1 %vm596_vm2, %v14960_v51  ;;  %v1600_v51 = vrot.slane %v19266_v38, 6  ;;  %v15425_v42 = vsel %vm415_vm3, %v1602_v53, %v1603_v19  ;;  %v2482_v53 = vrot.slane %v15455_v23, 6  ;;  %v15470_v19 = vld [vmem:[%s14396_s13 + $0x420] sm:$0xff] }
  0xb6   : > { %12210 = vmatmul.mubr.msk.f32.gmra.mrb[10].mxu0 %vm596_vm2, %v15190_v49  ;;  %12012 = vmatprep.mubr.msk.f32.mxu1 %vm596_vm2, %v14971_v4  ;;  %v2484_v48 = vrot.slane %v15470_v19, 6 }
  0xb7   : > { %12212 = vmatprep.mubr.msk.f32.mxu0 %vm596_vm2, %v15200_v56  ;;  %v15421_v38 = vsel %vm415_vm3, %v1598_v26, %v1600_v51  ;;  %v2479_v26 = vrot.slane %v15449_v1, 6  ;;  %v2481_v51 = vrot.slane %v326_v50, 6  ;;  %v2486_v50 = vrot.slane %v331_v44, 6  ;;  %v19291_v44 = vld [vmem:[#allocation38_spill] sm:$0xff] }
  0xb9   : > { %12013 = vmatmul.mubr.msk.f32.gmra.mrb[12].mxu1 %vm596_vm2, %v14989_v25  ;;  %v2480_v60 = vsel %vm415_vm3, %v2477_v8, %v2479_v26  ;;  %v2483_v31 = vsel %vm415_vm3, %v2481_v51, %v2482_v53  ;;  %v2485_v8 = vsel %vm415_vm3, %v2482_v53, %v2484_v48  ;;  %v2489_v26 = vrot.slane %v15488_v15, 6  ;;  %v19290_v51 = vld [vmem:[#allocation37_spill] sm:$0xff] }
  0xba   : > { %12213 = vmatmul.mubr.msk.f32.gmra.mrb[12].mxu0 %vm596_vm2, %v15216_v52  ;;  %12015 = vmatprep.mubr.msk.f32.mxu1 %vm596_vm2, %v14996_v29  ;;  %v19293_v53 = vld [vmem:[#allocation57_spill] sm:$0xff] }
  0xbb   : > { %12215 = vmatprep.mubr.msk.f32.mxu0 %vm596_vm2, %v15225_v21  ;;  %v19294_v48 = vld [vmem:[#allocation21_spill] sm:$0xff] }
  0xbd   : > { %12016 = vmatmul.mubr.msk.f32.gmra.mrb[14].mxu1 %vm596_vm2, %v15011_v34 }
  0xbe   : > { %12216 = vmatmul.mubr.msk.f32.gmra.mrb[14].mxu0 %vm596_vm2, %v15242_v61  ;;  %12018 = vmatprep.mubr.msk.f32.mxu1 %vm596_vm2, %v15022_v9 }
  0xbf   : > { %12218 = vmatprep.mubr.msk.f32.mxu0 %vm596_vm2, %v15252_v43 }
  0xc1   : > { %12019 = vmatmul.mubr.msk.f32.gmra.mrb[16].mxu1 %vm596_vm2, %v15041_v11 }
  0xc2   : > { %12219 = vmatmul.mubr.msk.f32.gmra.mrb[16].mxu0 %vm596_vm2, %v15267_v24  ;;  %12021 = vmatprep.mubr.msk.f32.mxu1 %vm596_vm2, %v15048_v30 }
  0xc3   : > { %12221 = vmatprep.mubr.msk.f32.mxu0 %vm596_vm2, %v15276_v58 }
  0xc5   : > { %12022 = vmatmul.mubr.msk.f32.gmra.mrb[18].mxu1 %vm596_vm2, %v15063_v22 }
  0xc6   : > { %12222 = vmatmul.mubr.msk.f32.gmra.mrb[18].mxu0 %vm596_vm2, %v15291_v10  ;;  %12024 = vmatprep.mubr.msk.f32.mxu1 %vm596_vm2, %v19281_v3 }
  0xc7   : > { %12224 = vmatprep.mubr.msk.f32.mxu0 %vm596_vm2, %v15408_v54 }
  0xc9   : > { %12025 = vmatmul.mubr.msk.f32.gmra.mrb[20].mxu1 %vm596_vm2, %v19282_v46 }
  0xca   : > { %12225 = vmatmul.mubr.msk.f32.gmra.mrb[20].mxu0 %vm596_vm2, %v15421_v38  ;;  %12027 = vmatprep.mubr.msk.f32.mxu1 %vm596_vm2, %v19283_v17 }
  0xcb   : > { %12227 = vmatprep.mubr.msk.f32.mxu0 %vm596_vm2, %v15425_v42 }
  0xcd   : > { %12028 = vmatmul.mubr.msk.f32.gmra.mrb[22].mxu1 %vm596_vm2, %v19284_v13 }
  0xce   : > { %12228 = vmatmul.mubr.msk.f32.gmra.mrb[22].mxu0 %vm596_vm2, %v15441_v63  ;;  %12030 = vmatprep.mubr.msk.f32.mxu1 %vm596_vm2, %v19285_v40 }
  0xcf   : > { %12230 = vmatprep.mubr.msk.f32.mxu0 %vm596_vm2, %v15445_v39 }
  0xd1   : > { %12031 = vmatmul.mubr.msk.f32.gmra.mrb[24].mxu1 %vm596_vm2, %v19286_v36 }
  0xd2   : > { %12231 = vmatmul.mubr.msk.f32.gmra.mrb[24].mxu0 %vm596_vm2, %v15464_v7  ;;  %12033 = vmatprep.mubr.msk.f32.mxu1 %vm596_vm2, %v19287_v35 }
  0xd3   : > { %12233 = vmatprep.mubr.msk.f32.mxu0 %vm596_vm2, %v2478_v41  ;;  %v2488_v41 = vsel %vm415_vm3, %v2486_v50, %v2487_v5  ;;  %v15518_v50 = vld [vmem:[%s18899_s1 + $0x24] sm:$0xf] }
  0xd5   : > { %12034 = vmatmul.mubr.msk.f32.gmra.mrb[26].mxu1 %vm596_vm2, %v19288_v33 }
  0xd6   : > { %12234 = vmatmul.mubr.msk.f32.gmra.mrb[26].mxu0 %vm596_vm2, %v2480_v60  ;;  %12036 = vmatprep.mubr.msk.f32.mxu1 %vm596_vm2, %v19289_v47  ;;  %v2490_v60 = vsel %vm415_vm3, %v2487_v5, %v2489_v26  ;;  %v19296_v5 = vld [vmem:[#allocation22_spill] sm:$0xff]  ;;  %v19297_v26 = vld [vmem:[#allocation59_spill] sm:$0xff] }
  0xd7   : > { %12236 = vmatprep.mubr.msk.f32.mxu0 %vm596_vm2, %v2483_v31  ;;  %v19295_v31 = vld [vmem:[#allocation58_spill] sm:$0xff] }
  0xd9   : > { %12037 = vmatmul.mubr.msk.f32.gmra.mrb[28].mxu1 %vm596_vm2, %v19290_v51 }
  0xda   : > { %12237 = vmatmul.mubr.msk.f32.gmra.mrb[28].mxu0 %vm596_vm2, %v2485_v8  ;;  %12039 = vmatprep.mubr.msk.f32.mxu1 %vm596_vm2, %v19291_v44  ;;  %v15527_v8 = vld [vmem:[%s18899_s1 + $0x4c] sm:$0xf] }
  0xdb   : > { %12239 = vmatprep.mubr.msk.f32.mxu0 %vm596_vm2, %v2488_v41  ;;  %v19298_v41 = vld [vmem:[#allocation23_spill] sm:$0xff] }
  0xdd   : > { %12040 = vmatmul.mubr.msk.f32.gmra.mrb[30].mxu1 %vm596_vm2, %v19292_v6 }
  0xde   : > { %12240 = vmatmul.mubr.msk.f32.gmra.mrb[30].mxu0 %vm596_vm2, %v2490_v60  ;;  %12044 = vmatprep.mubr.msk.f32.mxu1 %vm596_vm2, %v19293_v53  ;;  %v19299_v60 = vld [vmem:[#allocation60_spill] sm:$0xff]  ;;  %v19301_v53 = vld [vmem:[#allocation61_spill] sm:$0xff] }
  0xdf   : > { %12244 = vmatprep.mubr.msk.f32.mxu0 %vm596_vm2, %v19294_v48 }
  0xe1   : > { %12045 = vmatmul.mubr.msk.f32.vlgmr.msra.gmra.mrb[0].mxu1 %vm596_vm2, %v19295_v31  ;;  %v19303_v31 = vld [vmem:[#allocation62_spill] sm:$0xff] }
  0xe2   : > { %12245 = vmatmul.mubr.msk.f32.vlgmr.msra.gmra.mrb[0].mxu0 %vm596_vm2, %v19296_v5  ;;  %12343 = vmatpush3.msk.msra.mxu1 %vm661_vm0, %v15318_v62  ;;  %v19300_v62 = vld [vmem:[#allocation24_spill] sm:$0xff] }
  0xe3   : > { %12293 = vmatpush3.msk.msra.mxu0 %vm661_vm0, %v15329_v32  ;;  %12047 = vmatprep.mubr.msk.f32.mxu1 %vm596_vm2, %v19297_v26  ;;  %v19302_v32 = vld [vmem:[#allocation25_spill] sm:$0xff]  ;;  %v19304_v26 = vld [vmem:[#allocation26_spill] sm:$0xff] }
  0xe4   : > { %12247 = vmatprep.mubr.msk.f32.mxu0 %vm596_vm2, %v19298_v41  ;;  %12392 = vmatprep.subr.msk.mxu1 %vm661_vm0, %v15518_v50 }
  0xe5   : > { %12048 = vmatmul.mubr.msk.f32.gmra.mrb[2].mxu1 %vm596_vm2, %v19299_v60  ;;  %12792 = vmatprep.subr.msk.mxu0 %vm661_vm0, %v15527_v8  ;;  %v19305_v60 = vld [vmem:[#allocation27_spill] sm:$0xff] }
  0xe6   : > { %12248 = vmatmul.mubr.msk.f32.gmra.mrb[2].mxu0 %vm596_vm2, %v19300_v62  ;;  %12050 = vmatprep.mubr.msk.f32.mxu1 %vm596_vm2, %v19301_v53  ;;  %v19306_v62 = vld [vmem:[#allocation28_spill] sm:$0xff]  ;;  %v19307_v53 = vld [vmem:[#allocation29_spill] sm:$0xff] }
  0xe7   : > { %12250 = vmatprep.mubr.msk.f32.mxu0 %vm596_vm2, %v19302_v32 }
  0xe9   : > { %12051 = vmatmul.mubr.msk.f32.gmra.mrb[4].mxu1 %vm596_vm2, %v19303_v31  ;;  %v19308_v31 = vld [vmem:[#allocation30_spill] sm:$0xff] }
  0xea   : > { %12251 = vmatmul.mubr.msk.f32.gmra.mrb[4].mxu0 %vm596_vm2, %v19304_v26  ;;  %12053 = vmatprep.mubr.msk.f32.mxu1 %vm596_vm2, %v15044_v55  ;;  %v19309_v55 = vld [vmem:[#allocation31_spill] sm:$0xff] }
  0xeb   : > { %12253 = vmatprep.mubr.msk.f32.mxu0 %vm596_vm2, %v19305_v60 }
  0xed   : > { %12054 = vmatmul.mubr.msk.f32.gmra.mrb[6].mxu1 %vm596_vm2, %v15060_v57  ;;  %v19310_v57 = vld [vmem:[#allocation32_spill] sm:$0xff] }
  0xee   : > { %12254 = vmatmul.mubr.msk.f32.gmra.mrb[6].mxu0 %vm596_vm2, %v19306_v62  ;;  %12056 = vmatprep.mubr.msk.f32.mxu1 %vm596_vm2, %v15069_v28  ;;  %v19311_v28 = vld [vmem:[#allocation33_spill] sm:$0xff] }
  0xef   : > { %12256 = vmatprep.mubr.msk.f32.mxu0 %vm596_vm2, %v19307_v53 }
  0xf1   : > { %12057 = vmatmul.mubr.msk.f32.gmra.mrb[8].mxu1 %vm596_vm2, %v15086_v2  ;;  %v19312_v2 = vld [vmem:[#allocation34_spill] sm:$0xff] }
  0xf2   : > { %12257 = vmatmul.mubr.msk.f32.gmra.mrb[8].mxu0 %vm596_vm2, %v19308_v31  ;;  %12059 = vmatprep.mubr.msk.f32.mxu1 %vm596_vm2, %v15096_v12  ;;  %v19313_v12 = vld [vmem:[#allocation35_spill] sm:$0xff] }
  0xf3   : > { %12259 = vmatprep.mubr.msk.f32.mxu0 %vm596_vm2, %v19309_v55 }
  0xf5   : > { %12060 = vmatmul.mubr.msk.f32.gmra.mrb[10].mxu1 %vm596_vm2, %v15112_v20  ;;  %v19314_v20 = vld [vmem:[#allocation39_spill] sm:$0xff] }
  0xf6   : > { %12260 = vmatmul.mubr.msk.f32.gmra.mrb[10].mxu0 %vm596_vm2, %v19310_v57  ;;  %12062 = vmatprep.mubr.msk.f32.mxu1 %vm596_vm2, %v15121_v37  ;;  %v19315_v37 = vld [vmem:[#allocation40_spill] sm:$0xff] }
  0xf7   : > { %12262 = vmatprep.mubr.msk.f32.mxu0 %vm596_vm2, %v19311_v28 }
  0xf9   : > { %12063 = vmatmul.mubr.msk.f32.gmra.mrb[12].mxu1 %vm596_vm2, %v15138_v59  ;;  %v19316_v59 = vld [vmem:[#allocation44_spill] sm:$0xff] }
  0xfa   : > { %12263 = vmatmul.mubr.msk.f32.gmra.mrb[12].mxu0 %vm596_vm2, %v19312_v2  ;;  %12065 = vmatprep.mubr.msk.f32.mxu1 %vm596_vm2, %v15148_v27  ;;  %v19317_v27 = vld [vmem:[#allocation45_spill] sm:$0xff] }
  0xfb   : > { %12265 = vmatprep.mubr.msk.f32.mxu0 %vm596_vm2, %v19313_v12  ;;  %v15734_v12 = vld [vmem:[%s14396_s13 + $0xe0] sm:$0xff] }
  0xfd   : > { %12066 = vmatmul.mubr.msk.f32.gmra.mrb[14].mxu1 %vm596_vm2, %v15164_v0  ;;  %v19318_v0 = vld [vmem:[#allocation49_spill] sm:$0xff] }
  0xfe   : > { %12266 = vmatmul.mubr.msk.f32.gmra.mrb[14].mxu0 %vm596_vm2, %v19314_v20  ;;  %12068 = vmatprep.mubr.msk.f32.mxu1 %vm596_vm2, %v15173_v14  ;;  %v19319_v14 = vld [vmem:[#allocation50_spill] sm:$0xff] }
  0xff   : > { %12268 = vmatprep.mubr.msk.f32.mxu0 %vm596_vm2, %v19315_v37  ;;  %v15662_v37 = vld [vmem:[%s14396_s13 + $0x80] sm:$0xff] }
 0x101   : > { %12069 = vmatmul.mubr.msk.f32.gmra.mrb[16].mxu1 %vm596_vm2, %v15190_v49  ;;  %v19321_v49 = vld [vmem:[#allocation52_spill] sm:$0xff] }
 0x102   : > { %12269 = vmatmul.mubr.msk.f32.gmra.mrb[16].mxu0 %vm596_vm2, %v19316_v59  ;;  %12071 = vmatprep.mubr.msk.f32.mxu1 %vm596_vm2, %v15200_v56  ;;  %v19320_v56 = vld [vmem:[#allocation51_spill] sm:$0xff]  ;;  %v2779_v59 = vrot.slane %v15488_v15, 1 }
 0x103   : > { %12271 = vmatprep.mubr.msk.f32.mxu0 %vm596_vm2, %v19317_v27  ;;  %v15639_v27 = vld [vmem:[%s14396_s13 + $0x428] sm:$0xff] }
 0x105   : > { %12072 = vmatmul.mubr.msk.f32.gmra.mrb[18].mxu1 %vm596_vm2, %v15216_v52  ;;  %v2768_v52 = vrot.slane %v15432_v16, 1 }
 0x106   : > { %12272 = vmatmul.mubr.msk.f32.gmra.mrb[18].mxu0 %vm596_vm2, %v19318_v0  ;;  %12074 = vmatprep.mubr.msk.f32.mxu1 %vm596_vm2, %v15225_v21  ;;  %v2769_v21 = vrot.slane %v15449_v1, 1  ;;  %v15622_v0 = vld [vmem:[%s14396_s13 + $0x400] sm:$0xff] }
 0x107   : > { %12274 = vmatprep.mubr.msk.f32.mxu0 %vm596_vm2, %v19319_v14  ;;  %v19322_v14 = vld [vmem:[#allocation53_spill] sm:$0xff] }
 0x109   : > { %12075 = vmatmul.mubr.msk.f32.gmra.mrb[20].mxu1 %vm596_vm2, %v15242_v61  ;;  %v19323_v61 = vld [vmem:[#allocation54_spill] sm:$0xff] }
 0x10a   : > { %12275 = vmatmul.mubr.msk.f32.gmra.mrb[20].mxu0 %vm596_vm2, %v19320_v56  ;;  %12077 = vmatprep.mubr.msk.f32.mxu1 %vm596_vm2, %v15252_v43  ;;  %v2771_v43 = vrot.slane %v15622_v0, 1  ;;  %v2773_v56 = vrot.slane %v15455_v23, 1 }
 0x10b   : > { %12277 = vmatprep.mubr.msk.f32.mxu0 %vm596_vm2, %v19321_v49  ;;  %v15634_v49 = vsel %vm513_vm1, %v2768_v52, %v2769_v21 }
 0x10c   : > { %19324 = vst [vmem:[#allocation5_spill] sm:$0xff] %v15634_v49  ;;  %v15650_v52 = vsel %vm513_vm1, %v2769_v21, %v2771_v43  ;;  %v3512_v43 = vrot.slane %v15662_v37, 1 }
 0x10d   : > { %12078 = vmatmul.mubr.msk.f32.gmra.mrb[22].mxu1 %vm596_vm2, %v15267_v24  ;;  %v2774_v24 = vrot.slane %v15470_v19, 1  ;;  %19326 = vst [vmem:[#allocation6_spill] sm:$0xff] %v15650_v52 }
 0x10e   : > { %12278 = vmatmul.mubr.msk.f32.gmra.mrb[22].mxu0 %vm596_vm2, %v19322_v14  ;;  %12080 = vmatprep.mubr.msk.f32.mxu1 %vm596_vm2, %v15276_v58  ;;  %v19325_v58 = vld [vmem:[#allocation55_spill] sm:$0xff] }
 0x10f   : > { %12280 = vmatprep.mubr.msk.f32.mxu0 %vm596_vm2, %v19323_v61  ;;  %v2776_v61 = vrot.slane %v15639_v27, 1  ;;  %v15654_v14 = vsel %vm513_vm1, %v2773_v56, %v2774_v24 }
 0x110   : > { %19327 = vst [vmem:[#allocation8_spill] sm:$0xff] %v15654_v14 }
 0x111   : > { %12081 = vmatmul.mubr.msk.f32.gmra.mrb[24].mxu1 %vm596_vm2, %v15291_v10  ;;  %v2778_v10 = vrot.slane %v15476_v45, 1  ;;  %v15676_v56 = vsel %vm513_vm1, %v2774_v24, %v2776_v61  ;;  %v15695_v61 = vld [vmem:[%s14396_s13 + $0xa8] sm:$0xff]  ;;  %v15698_v24 = vld [vmem:[%s14396_s13 + $0xb0] sm:$0xff] }
 0x112   : > { %12281 = vmatmul.mubr.msk.f32.gmra.mrb[24].mxu0 %vm596_vm2, %v19325_v58  ;;  %12083 = vmatprep.mubr.msk.f32.mxu1 %vm596_vm2, %v15408_v54  ;;  %v15659_v58 = vld [vmem:[%s14396_s13 + $0x450] sm:$0xff]  ;;  %v15665_v54 = vld [vmem:[%s14396_s13 + $0x88] sm:$0xff]  ;;  %19328 = vst [vmem:[#allocation13_spill] sm:$0xff] %v15676_v56  ;;  %v3517_v20 = vrot.slane %v15695_v61, 1 }
 0x113   : > { %12283 = vmatprep.mubr.msk.f32.mxu0 %vm596_vm2, %v15634_v49  ;;  %v2781_v21 = vrot.slane %v15659_v58, 1  ;;  %v15682_v49 = vld [vmem:[%s14396_s13 + $0x90] sm:$0xff] }
 0x115   : > { %12084 = vmatmul.mubr.msk.f32.gmra.mrb[26].mxu1 %vm596_vm2, %v15421_v38  ;;  %v3513_v38 = vrot.slane %v15665_v54, 1 }
 0x116   : > { %12284 = vmatmul.mubr.msk.f32.gmra.mrb[26].mxu0 %vm596_vm2, %v15650_v52  ;;  %12086 = vmatprep.mubr.msk.f32.mxu1 %vm596_vm2, %v15425_v42  ;;  %v15685_v52 = vsel %vm513_vm1, %v2778_v10, %v2779_v59  ;;  %v3515_v42 = vrot.slane %v15682_v49, 1  ;;  %v15703_v10 = vsel %vm513_vm1, %v2779_v59, %v2781_v21 }
 0x117   : > { %12286 = vmatprep.mubr.msk.f32.mxu0 %vm596_vm2, %v15654_v14  ;;  %19329 = vst [vmem:[#allocation56_spill] sm:$0xff] %v15685_v52  ;;  %19330 = vst [vmem:[#allocation63_spill] sm:$0xff] %v15703_v10  ;;  %v15712_v14 = vld [vmem:[%s14396_s13 + $0xd0] sm:$0xff] }
 0x118   : > { %v15726_v59 = vsel %vm513_vm1, %v3513_v38, %v3515_v42  ;;  %v3525_v42 = vrot.slane %v15734_v12, 1 }
 0x119   : > { %12087 = vmatmul.mubr.msk.f32.gmra.mrb[28].mxu1 %vm596_vm2, %v15441_v63  ;;  %v15706_v63 = vsel %vm513_vm1, %v3512_v43, %v3513_v38  ;;  %v15744_v38 = vld [vmem:[%s18899_s1 + $0x2c] sm:$0xf] }
 0x11a   : > { %12287 = vmatmul.mubr.msk.f32.gmra.mrb[28].mxu0 %vm596_vm2, %v15676_v56  ;;  %12089 = vmatprep.mubr.msk.f32.mxu1 %vm596_vm2, %v15445_v39  ;;  %v15709_v56 = vld [vmem:[%s14396_s13 + $0xb8] sm:$0xff] }
 0x11b   : > { %12289 = vmatprep.mubr.msk.f32.mxu0 %vm596_vm2, %v15685_v52  ;;  %v15715_v39 = vld [vmem:[%s14396_s13 + $0xd8] sm:$0xff]  ;;  %v3518_v52 = vrot.slane %v15698_v24, 1  ;;  %v3520_v21 = vrot.slane %v15709_v56, 1 }
 0x11c   : > { %v3523_v43 = vrot.slane %v15715_v39, 1 }
 0x11d   : > { %12090 = vmatmul.mubr.msk.f32.gmra.mrb[30].mxu1 %vm596_vm2, %v15464_v7  ;;  %v3522_v7 = vrot.slane %v15712_v14, 1 }
 0x11e   : > { %12290 = vmatmul.mubr.msk.f32.gmra.mrb[30].mxu0 %vm596_vm2, %v15703_v10  ;;  %12344 = vmatprep.mubr.msk.f32.mxu1 %vm596_vm2, %v15706_v63  ;;  %v15739_v10 = vsel %vm513_vm1, %v3517_v20, %v3518_v52  ;;  %v15757_v20 = vld [vmem:[%s18899_s1 + $0x48] sm:$0xf] }
 0x11f   : > { %12294 = vmatprep.mubr.msk.f32.mxu0 %vm596_vm2, %v14971_v4  ;;  %v15751_v4 = vsel %vm513_vm1, %v3518_v52, %v3520_v21  ;;  %v3063_v52 = vrot.slane %v15470_v19, 4  ;;  %v19348_v21 = vld [vmem:[#allocation48_spill] sm:$0xff]  ;;  %v3068_v19 = vrot.slane %v15488_v15, 4 }
 0x121   : > { %12345 = vmatmul.mubr.msk.f32.vlgmr.msra.gmra.mrb[32].mxu1 %vm596_vm2, %v15726_v59 }
 0x122   : > { %12295 = vmatmul.mubr.msk.f32.vlgmr.msra.gmra.mrb[0].mxu0 %vm596_vm2, %v14989_v25  ;;  %12393 = vmatpush3.msk.msra.mxu1 %vm661_vm0, %v15518_v50  ;;  %v15764_v25 = vsel %vm513_vm1, %v3522_v7, %v3523_v43  ;;  %v19331_v50 = vld [vmem:[#allocation7_spill] sm:$0xff]  ;;  %v3065_v7 = vrot.slane %v15639_v27, 4 }
 0x123   : > { %12793 = vmatpush3.msk.msra.mxu0 %vm661_vm0, %v15527_v8  ;;  %12297 = vmatprep.mubr.msk.f32.mxu0 %vm596_vm2, %v14996_v29  ;;  %v15779_v29 = vsel %vm513_vm1, %v3523_v43, %v3525_v42  ;;  %v19333_v8 = vld [vmem:[#allocation12_spill] sm:$0xff] }
 0x124   : > { %12347 = vmatprep.mubr.msk.f32.mxu1 %vm596_vm2, %v15739_v10  ;;  %12442 = vmatprep.subr.msk.mxu1 %vm661_vm0, %v15744_v38  ;;  %v15882_v42 = vld [vmem:[%s14396_s13 + $0x78] sm:$0xff]  ;;  %v3066_v15 = vsel %vm661_vm0, %v3063_v52, %v3065_v7 }
 0x125   : > { %12348 = vmatmul.mubr.msk.f32.gmra.mrb[34].mxu1 %vm596_vm2, %v15751_v4  ;;  %12842 = vmatprep.subr.msk.mxu0 %vm661_vm0, %v15757_v20  ;;  %v3427_v27 = vrot.slane %v15882_v42, 3 }
 0x126   : > { %12298 = vmatmul.mubr.msk.f32.gmra.mrb[2].mxu0 %vm596_vm2, %v15011_v34  ;;  %12350 = vmatprep.mubr.msk.f32.mxu1 %vm596_vm2, %v15764_v25  ;;  %v19332_v34 = vld [vmem:[#allocation10_spill] sm:$0xff] }
 0x127   : > { %12300 = vmatprep.mubr.msk.f32.mxu0 %vm596_vm2, %v15022_v9  ;;  %v19334_v9 = vld [vmem:[#allocation15_spill] sm:$0xff] }
 0x129   : > { %12351 = vmatmul.mubr.msk.f32.gmra.mrb[36].mxu1 %vm596_vm2, %v15779_v29 }
 0x12a   : > { %12301 = vmatmul.mubr.msk.f32.gmra.mrb[4].mxu0 %vm596_vm2, %v15041_v11  ;;  %12353 = vmatprep.mubr.msk.f32.mxu1 %vm596_vm2, %v19331_v50  ;;  %v19335_v11 = vld [vmem:[#allocation17_spill] sm:$0xff] }
 0x12b   : > { %12303 = vmatprep.mubr.msk.f32.mxu0 %vm596_vm2, %v15048_v30  ;;  %v19336_v30 = vld [vmem:[#allocation19_spill] sm:$0xff] }
 0x12d   : > { %12354 = vmatmul.mubr.msk.f32.gmra.mrb[38].mxu1 %vm596_vm2, %v19332_v34 }
 0x12e   : > { %12304 = vmatmul.mubr.msk.f32.gmra.mrb[6].mxu0 %vm596_vm2, %v15063_v22  ;;  %12356 = vmatprep.mubr.msk.f32.mxu1 %vm596_vm2, %v19333_v8  ;;  %v19337_v22 = vld [vmem:[#allocation9_spill] sm:$0xff] }
 0x12f   : > { %12306 = vmatprep.mubr.msk.f32.mxu0 %vm596_vm2, %v19281_v3  ;;  %v19338_v3 = vld [vmem:[#allocation11_spill] sm:$0xff] }
 0x131   : > { %12357 = vmatmul.mubr.msk.f32.gmra.mrb[40].mxu1 %vm596_vm2, %v19334_v9 }
 0x132   : > { %12307 = vmatmul.mubr.msk.f32.gmra.mrb[8].mxu0 %vm596_vm2, %v19282_v46  ;;  %12359 = vmatprep.mubr.msk.f32.mxu1 %vm596_vm2, %v19335_v11  ;;  %v19339_v46 = vld [vmem:[#allocation14_spill] sm:$0xff] }
 0x133   : > { %12309 = vmatprep.mubr.msk.f32.mxu0 %vm596_vm2, %v19283_v17  ;;  %v19340_v17 = vld [vmem:[#allocation16_spill] sm:$0xff] }
 0x135   : > { %12360 = vmatmul.mubr.msk.f32.gmra.mrb[42].mxu1 %vm596_vm2, %v19336_v30 }
 0x136   : > { %12310 = vmatmul.mubr.msk.f32.gmra.mrb[10].mxu0 %vm596_vm2, %v19284_v13  ;;  %12362 = vmatprep.mubr.msk.f32.mxu1 %vm596_vm2, %v19337_v22  ;;  %v19341_v13 = vld [vmem:[#allocation18_spill] sm:$0xff] }
 0x137   : > { %12312 = vmatprep.mubr.msk.f32.mxu0 %vm596_vm2, %v19285_v40  ;;  %v19342_v40 = vld [vmem:[#allocation20_spill] sm:$0xff] }
 0x139   : > { %12363 = vmatmul.mubr.msk.f32.gmra.mrb[44].mxu1 %vm596_vm2, %v19338_v3 }
 0x13a   : > { %12313 = vmatmul.mubr.msk.f32.gmra.mrb[12].mxu0 %vm596_vm2, %v19286_v36  ;;  %12365 = vmatprep.mubr.msk.f32.mxu1 %vm596_vm2, %v19339_v46  ;;  %v19345_v36 = vld [vmem:[#allocation43_spill] sm:$0xff] }
 0x13b   : > { %12315 = vmatprep.mubr.msk.f32.mxu0 %vm596_vm2, %v19287_v35  ;;  %v3058_v35 = vrot.slane %v15449_v1, 4  ;;  %v3062_v1 = vrot.slane %v15455_v23, 4  ;;  %v3067_v23 = vrot.slane %v15476_v45, 4  ;;  %v3070_v45 = vrot.slane %v15659_v58, 4 }
 0x13c   : > { %v3430_v58 = vrot.slane %v15665_v54, 3 }
 0x13d   : > { %12366 = vmatmul.mubr.msk.f32.gmra.mrb[46].mxu1 %vm596_vm2, %v19340_v17  ;;  %v3064_v43 = vsel %vm661_vm0, %v3062_v1, %v3063_v52  ;;  %v15916_v1 = vld [vmem:[%s14396_s13 + $0x30] sm:$0xff]  ;;  %v15919_v52 = vld [vmem:[%s14396_s13 + $0x38] sm:$0xff] }
 0x13e   : > { %12316 = vmatmul.mubr.msk.f32.gmra.mrb[14].mxu0 %vm596_vm2, %v19288_v33  ;;  %12368 = vmatprep.mubr.msk.f32.mxu1 %vm596_vm2, %v19341_v13  ;;  %v19344_v33 = vld [vmem:[#allocation42_spill] sm:$0xff]  ;;  %19351 = vst [vmem:[#allocation66_spill] sm:$0xff] %v15919_v52 }
 0x13f   : > { %12318 = vmatprep.mubr.msk.f32.mxu0 %vm596_vm2, %v19289_v47  ;;  %v19343_v47 = vld [vmem:[#allocation24_spill] sm:$0xff] }
 0x141   : > { %12369 = vmatmul.mubr.msk.f32.gmra.mrb[48].mxu1 %vm596_vm2, %v19342_v40 }
 0x142   : > { %12319 = vmatmul.mubr.msk.f32.gmra.mrb[16].mxu0 %vm596_vm2, %v19290_v51  ;;  %12371 = vmatprep.mubr.msk.f32.mxu1 %vm596_vm2, %v19294_v48  ;;  %v19347_v51 = vld [vmem:[#allocation47_spill] sm:$0xff] }
 0x143   : > { %12321 = vmatprep.mubr.msk.f32.mxu0 %vm596_vm2, %v19291_v44  ;;  %v3060_v44 = vrot.slane %v15622_v0, 4 }
 0x145   : > { %12372 = vmatmul.mubr.msk.f32.gmra.mrb[50].mxu1 %vm596_vm2, %v19296_v5  ;;  %v3061_v0 = vsel %vm661_vm0, %v3058_v35, %v3060_v44  ;;  %v15904_v44 = vld [vmem:[%s14396_s13 + $0x18] sm:$0xff] }
 0x146   : > { %12322 = vmatmul.mubr.msk.f32.gmra.mrb[18].mxu0 %vm596_vm2, %v19292_v6  ;;  %12374 = vmatprep.mubr.msk.f32.mxu1 %vm596_vm2, %v19298_v41  ;;  %v3057_v6 = vrot.slane %v15432_v16, 4  ;;  %19350 = vst [vmem:[#allocation65_spill] sm:$0xff] %v15904_v44  ;;  %v6505_v7 = vrot.slane %v15904_v44, 1 }
 0x147   : > { %12324 = vmatprep.mubr.msk.f32.mxu0 %vm596_vm2, %v15230_v18  ;;  %v19346_v18 = vld [vmem:[#allocation46_spill] sm:$0xff] }
 0x148   : > { %v3059_v16 = vsel %vm661_vm0, %v3057_v6, %v3058_v35  ;;  %v3428_v6 = vrot.slane %v15662_v37, 3  ;;  %v3069_v35 = vsel %vm661_vm0, %v3067_v23, %v3068_v19 }
 0x149   : > { %12375 = vmatmul.mubr.msk.f32.gmra.mrb[52].mxu1 %vm596_vm2, %v19343_v47 }
 0x14a   : > { %12325 = vmatmul.mubr.msk.f32.gmra.mrb[20].mxu0 %vm596_vm2, %v19344_v33  ;;  %12377 = vmatprep.mubr.msk.f32.mxu1 %vm596_vm2, %v19302_v32  ;;  %v15887_v33 = vld [vmem:[%s14396_s13 + $0x8] sm:$0xff] }
 0x14b   : > { %12327 = vmatprep.mubr.msk.f32.mxu0 %vm596_vm2, %v19345_v36  ;;  %v15890_v36 = vld [vmem:[%s14396_s13 + $0x10] sm:$0xff] }
 0x14c   : > { %19349 = vst [vmem:[#allocation64_spill] sm:$0xff] %v15890_v36 }
 0x14d   : > { %12378 = vmatmul.mubr.msk.f32.gmra.mrb[54].mxu1 %vm596_vm2, %v19304_v26 }
 0x14e   : > { %12328 = vmatmul.mubr.msk.f32.gmra.mrb[22].mxu0 %vm596_vm2, %v19346_v18  ;;  %12380 = vmatprep.mubr.msk.f32.mxu1 %vm596_vm2, %v19305_v60  ;;  %v6502_v18 = vrot.slane %v15887_v33, 1 }
 0x14f   : > { %12330 = vmatprep.mubr.msk.f32.mxu0 %vm596_vm2, %v19347_v51  ;;  %v6503_v51 = vrot.slane %v15890_v36, 1  ;;  %v16146_v36 = vld [vmem:[%s14396_s13 + $0x208] sm:$0xff] }
 0x150   : > { %19363 = vst [vmem:[#allocation60_spill] sm:$0xff] %v16146_v36 }
 0x151   : > { %12381 = vmatmul.mubr.msk.f32.gmra.mrb[56].mxu1 %vm596_vm2, %v19306_v62  ;;  %v6504_v23 = vsel %vm513_vm1, %v6502_v18, %v6503_v51  ;;  %v3431_v18 = vsel %vm3426_vm4, %v3428_v6, %v3430_v58 }
 0x152   : > { %12331 = vmatmul.mubr.msk.f32.gmra.mrb[24].mxu0 %vm596_vm2, %v19348_v21  ;;  %12383 = vmatprep.mubr.msk.f32.mxu1 %vm596_vm2, %v19307_v53  ;;  %v3071_v21 = vsel %vm661_vm0, %v3068_v19, %v3070_v45  ;;  %v6508_v19 = vrot.slane %v15919_v52, 1  ;;  %v15939_v45 = vld [vmem:[%s14396_s13 + $0x58] sm:$0xff]  ;;  %v3438_v52 = vrot.slane %v15712_v14, 3 }
 0x153   : > { %12333 = vmatprep.mubr.msk.f32.mxu0 %vm596_vm2, %v3059_v16  ;;  %v15909_v16 = vld [vmem:[%s14396_s13 + $0xa0] sm:$0xff] }
 0x155   : > { %12384 = vmatmul.mubr.msk.f32.gmra.mrb[58].mxu1 %vm596_vm2, %v19308_v31 }
 0x156   : > { %12334 = vmatmul.mubr.msk.f32.gmra.mrb[26].mxu0 %vm596_vm2, %v3061_v0  ;;  %12386 = vmatprep.mubr.msk.f32.mxu1 %vm596_vm2, %v19309_v55  ;;  %v3429_v0 = vsel %vm3426_vm4, %v3427_v27, %v3428_v6  ;;  %v15942_v27 = vld [vmem:[%s14396_s13 + $0x60] sm:$0xff]  ;;  %v3435_v55 = vrot.slane %v15698_v24, 3  ;;  %v15957_v6 = vld [vmem:[%s14396_s13 + $0x68] sm:$0xff] }
 0x157   : > { %12336 = vmatprep.mubr.msk.f32.mxu0 %vm596_vm2, %v3064_v43  ;;  %v15926_v43 = vld [vmem:[%s14396_s13 + $0x40] sm:$0xff]  ;;  %19353 = vst [vmem:[#allocation68_spill] sm:$0xff] %v15942_v27  ;;  %19354 = vst [vmem:[#allocation69_spill] sm:$0xff] %v15957_v6 }
 0x158   : > { %19352 = vst [vmem:[#allocation67_spill] sm:$0xff] %v15926_v43  ;;  %v6510_v31 = vrot.slane %v15926_v43, 1  ;;  %v16120_v43 = vld [vmem:[%s14396_s13 + $0x1e0] sm:$0xff] }
 0x159   : > { %12387 = vmatmul.mubr.msk.f32.gmra.mrb[60].mxu1 %vm596_vm2, %v19310_v57  ;;  %v15932_v57 = vld [vmem:[%s14396_s13 + $0xc8] sm:$0xff]  ;;  %19360 = vst [vmem:[#allocation57_spill] sm:$0xff] %v16120_v43 }
 0x15a   : > { %12337 = vmatmul.mubr.msk.f32.gmra.mrb[28].mxu0 %vm596_vm2, %v3066_v15  ;;  %12389 = vmatprep.mubr.msk.f32.mxu1 %vm596_vm2, %v19311_v28  ;;  %v3432_v15 = vrot.slane %v15909_v16, 3  ;;  %v3433_v28 = vrot.slane %v15695_v61, 3  ;;  %v3437_v53 = vrot.slane %v15932_v57, 3 }
 0x15b   : > { %12339 = vmatprep.mubr.msk.f32.mxu0 %vm596_vm2, %v3069_v35  ;;  %v6507_v35 = vrot.slane %v15916_v1, 1 }
 0x15c   : > { %v3434_v44 = vsel %vm3426_vm4, %v3432_v15, %v3433_v28  ;;  %v3440_v15 = vrot.slane %v15715_v39, 3 }
 0x15d   : > { %12390 = vmatmul.mubr.msk.f32.gmra.mrb[62].mxu1 %vm596_vm2, %v19312_v2  ;;  %v6506_v2 = vsel %vm513_vm1, %v6503_v51, %v6505_v7  ;;  %v6509_v58 = vsel %vm513_vm1, %v6507_v35, %v6508_v19  ;;  %v15964_v51 = vld [vmem:[%s18899_s1 + $0x30] sm:$0xf]  ;;  %v3436_v7 = vsel %vm3426_vm4, %v3433_v28, %v3435_v55  ;;  %v15987_v28 = vld [vmem:[%s14396_s13 + $0xf8] sm:$0xff] }
 0x15e   : > { %12340 = vmatmul.mubr.msk.f32.gmra.mrb[30].mxu0 %vm596_vm2, %v3071_v21  ;;  %12394 = vmatprep.mubr.msk.f32.mxu1 %vm596_vm2, %v3429_v0  ;;  %v6512_v21 = vrot.slane %v15939_v45, 1  ;;  %v6513_v0 = vrot.slane %v15942_v27, 1  ;;  %v15975_v35 = vld [vmem:[%s18899_s1 + $0x50] sm:$0xf]  ;;  %v16073_v27 = vld [vmem:[%s14396_s13 + $0x198] sm:$0xff] }
 0x15f   : > { %12794 = vmatprep.mubr.msk.f32.mxu0 %vm596_vm2, %v6504_v23  ;;  %v6511_v23 = vsel %vm513_vm1, %v6508_v19, %v6510_v31  ;;  %v15983_v55 = vld [vmem:[%s14396_s13 + $0xf0] sm:$0xff]  ;;  %v3443_v19 = vrot.slane %v15987_v28, 3 }
 0x160   : > { %v3442_v31 = vrot.slane %v15983_v55, 3 }
 0x161   : > { %12395 = vmatmul.mubr.msk.f32.vlgmr.msra.gmra.mrb[32].mxu1 %vm596_vm2, %v3431_v18 }
 0x162   : > { %12443 = vmatpush3.msk.msra.mxu1 %vm661_vm0, %v15744_v38  ;;  %12795 = vmatmul.mubr.msk.f32.vlgmr.msra.gmra.mrb[32].mxu0 %vm596_vm2, %v6506_v2  ;;  %v3439_v38 = vsel %vm3426_vm4, %v3437_v53, %v3438_v52  ;;  %v6515_v2 = vrot.slane %v15957_v6, 1  ;;  %v3441_v53 = vsel %vm3426_vm4, %v3438_v52, %v3440_v15  ;;  %v16012_v6 = vld [vmem:[%s14396_s13 + $0x120] sm:$0xff]  ;;  %v16020_v15 = vld [vmem:[%s14396_s13 + $0x128] sm:$0xff] }
 0x163   : > { %12843 = vmatpush3.msk.msra.mxu0 %vm661_vm0, %v15757_v20  ;;  %12397 = vmatprep.mubr.msk.f32.mxu1 %vm596_vm2, %v3434_v44  ;;  %v6514_v20 = vsel %vm513_vm1, %v6512_v21, %v6513_v0  ;;  %v16001_v44 = vld [vmem:[%s14396_s13 + $0x100] sm:$0xff]  ;;  %v3448_v52 = vrot.slane %v16012_v6, 3 }
 0x164   : > { %12797 = vmatprep.mubr.msk.f32.mxu0 %vm596_vm2, %v6509_v58  ;;  %12492 = vmatprep.subr.msk.mxu1 %vm661_vm0, %v15964_v51  ;;  %v3445_v18 = vrot.slane %v16001_v44, 3  ;;  %v6516_v21 = vsel %vm513_vm1, %v6513_v0, %v6515_v2  ;;  %v3444_v58 = vsel %vm3426_vm4, %v3442_v31, %v3443_v19  ;;  %v16027_v31 = vld [vmem:[%s14396_s13 + $0x140] sm:$0xff] }
 0x165   : > { %12398 = vmatmul.mubr.msk.f32.gmra.mrb[34].mxu1 %vm596_vm2, %v3436_v7  ;;  %12892 = vmatprep.subr.msk.mxu0 %vm661_vm0, %v15975_v35  ;;  %v16008_v7 = vld [vmem:[%s14396_s13 + $0x118] sm:$0xff] }
 0x166   : > { %12798 = vmatmul.mubr.msk.f32.gmra.mrb[34].mxu0 %vm596_vm2, %v6511_v23  ;;  %12400 = vmatprep.mubr.msk.f32.mxu1 %vm596_vm2, %v3439_v38  ;;  %v3447_v23 = vrot.slane %v16008_v7, 3  ;;  %v3446_v0 = vsel %vm3426_vm4, %v3443_v19, %v3445_v18  ;;  %v3450_v38 = vrot.slane %v16020_v15, 3  ;;  %v16040_v19 = vld [vmem:[%s14396_s13 + $0x150] sm:$0xff] }
 0x167   : > { %12800 = vmatprep.mubr.msk.f32.mxu0 %vm596_vm2, %v6514_v20  ;;  %v3452_v20 = vrot.slane %v16027_v31, 3  ;;  %v3455_v18 = vrot.slane %v16040_v19, 3 }
 0x168   : > { %v3449_v2 = vsel %vm3426_vm4, %v3447_v23, %v3448_v52  ;;  %v16047_v23 = vld [vmem:[%s14396_s13 + $0x168] sm:$0xff] }
 0x169   : > { %12401 = vmatmul.mubr.msk.f32.gmra.mrb[36].mxu1 %vm596_vm2, %v3441_v53  ;;  %v16031_v53 = vld [vmem:[%s14396_s13 + $0x148] sm:$0xff] }
 0x16a   : > { %12801 = vmatmul.mubr.msk.f32.gmra.mrb[36].mxu0 %vm596_vm2, %v6516_v21  ;;  %12403 = vmatprep.mubr.msk.f32.mxu1 %vm596_vm2, %v3444_v58  ;;  %v3453_v21 = vrot.slane %v16031_v53, 3 }
 0x16b   : > { %12803 = vmatprep.mubr.msk.f32.mxu0 %vm596_vm2, %v15706_v63  ;;  %v3451_v63 = vsel %vm3426_vm4, %v3448_v52, %v3450_v38  ;;  %v16060_v52 = vld [vmem:[%s14396_s13 + $0x178] sm:$0xff] }
 0x16c   : > { %v3454_v58 = vsel %vm3426_vm4, %v3452_v20, %v3453_v21  ;;  %v3460_v38 = vrot.slane %v16060_v52, 3 }
 0x16d   : > { %12404 = vmatmul.mubr.msk.f32.gmra.mrb[38].mxu1 %vm596_vm2, %v3446_v0  ;;  %v3457_v0 = vrot.slane %v16047_v23, 3 }
 0x16e   : > { %12804 = vmatmul.mubr.msk.f32.gmra.mrb[38].mxu0 %vm596_vm2, %v15726_v59  ;;  %12406 = vmatprep.mubr.msk.f32.mxu1 %vm596_vm2, %v3449_v2  ;;  %v16051_v59 = vld [vmem:[%s14396_s13 + $0x170] sm:$0xff] }
 0x16f   : > { %12806 = vmatprep.mubr.msk.f32.mxu0 %vm596_vm2, %v15739_v10  ;;  %v3458_v2 = vrot.slane %v16051_v59, 3  ;;  %v3456_v10 = vsel %vm3426_vm4, %v3453_v21, %v3455_v18  ;;  %v3463_v21 = vrot.slane %v16073_v27, 3  ;;  %v16085_v18 = vld [vmem:[%s14396_s13 + $0x1a0] sm:$0xff] }
 0x171   : > { %12407 = vmatmul.mubr.msk.f32.gmra.mrb[40].mxu1 %vm596_vm2, %v3451_v63  ;;  %v16066_v20 = vsel %vm3426_vm4, %v3457_v0, %v3458_v2  ;;  %v16069_v63 = vld [vmem:[%s14396_s13 + $0x190] sm:$0xff] }
 0x172   : > { %12807 = vmatmul.mubr.msk.f32.gmra.mrb[40].mxu0 %vm596_vm2, %v15751_v4  ;;  %12409 = vmatprep.mubr.msk.f32.mxu1 %vm596_vm2, %v3454_v58  ;;  %19355 = vst [vmem:[#allocation70_spill] sm:$0xff] %v16066_v20  ;;  %v3462_v4 = vrot.slane %v16069_v63, 3  ;;  %v3465_v58 = vrot.slane %v16085_v18, 3 }
 0x173   : > { %12809 = vmatprep.mubr.msk.f32.mxu0 %vm596_vm2, %v15764_v25  ;;  %v16082_v25 = vsel %vm3426_vm4, %v3458_v2, %v3460_v38  ;;  %v16111_v38 = vld [vmem:[%s14396_s13 + $0x1c8] sm:$0xff] }
 0x174   : > { %19356 = vst [vmem:[#allocation36_spill] sm:$0xff] %v16082_v25  ;;  %v16091_v0 = vsel %vm3426_vm4, %v3462_v4, %v3463_v21  ;;  %v3470_v4 = vrot.slane %v16111_v38, 3 }
 0x175   : > { %12410 = vmatmul.mubr.msk.f32.gmra.mrb[42].mxu1 %vm596_vm2, %v3456_v10  ;;  %19357 = vst [vmem:[#allocation37_spill] sm:$0xff] %v16091_v0  ;;  %v16094_v10 = vld [vmem:[%s14396_s13 + $0x1b8] sm:$0xff] }
 0x176   : > { %12810 = vmatmul.mubr.msk.f32.gmra.mrb[42].mxu0 %vm596_vm2, %v15779_v29  ;;  %12412 = vmatprep.mubr.msk.f32.mxu1 %vm596_vm2, %v16066_v20  ;;  %v3467_v29 = vrot.slane %v16094_v10, 3  ;;  %v16098_v20 = vld [vmem:[%s14396_s13 + $0x1c0] sm:$0xff] }
 0x177   : > { %12812 = vmatprep.mubr.msk.f32.mxu0 %vm596_vm2, %v19331_v50  ;;  %v3468_v2 = vrot.slane %v16098_v20, 3  ;;  %v16108_v50 = vsel %vm3426_vm4, %v3463_v21, %v3465_v58  ;;  %v16137_v58 = vld [vmem:[%s14396_s13 + $0x1f0] sm:$0xff] }
 0x178   : > { %19358 = vst [vmem:[#allocation38_spill] sm:$0xff] %v16108_v50 }
 0x179   : > { %12413 = vmatmul.mubr.msk.f32.gmra.mrb[44].mxu1 %vm596_vm2, %v16082_v25  ;;  %v16117_v25 = vsel %vm3426_vm4, %v3467_v29, %v3468_v2  ;;  %v3475_v29 = vrot.slane %v16137_v58, 3 }
 0x17a   : > { %12813 = vmatmul.mubr.msk.f32.gmra.mrb[44].mxu0 %vm596_vm2, %v19332_v34  ;;  %12415 = vmatprep.mubr.msk.f32.mxu1 %vm596_vm2, %v16091_v0  ;;  %19359 = vst [vmem:[#allocation41_spill] sm:$0xff] %v16117_v25  ;;  %v3472_v34 = vrot.slane %v16120_v43, 3  ;;  %v16124_v0 = vld [vmem:[%s14396_s13 + $0x1e8] sm:$0xff] }
 0x17b   : > { %12815 = vmatprep.mubr.msk.f32.mxu0 %vm596_vm2, %v19333_v8  ;;  %v3473_v21 = vrot.slane %v16124_v0, 3  ;;  %v16134_v8 = vsel %vm3426_vm4, %v3468_v2, %v3470_v4  ;;  %v16163_v4 = vld [vmem:[%s14396_s13 + $0x218] sm:$0xff]  ;;  %v16225_v43 = vld [vmem:[%s14396_s13 + $0x288] sm:$0xff] }
 0x17c   : > { %19361 = vst [vmem:[#allocation58_spill] sm:$0xff] %v16134_v8 }
 0x17d   : > { %12416 = vmatmul.mubr.msk.f32.gmra.mrb[46].mxu1 %vm596_vm2, %v16108_v50  ;;  %v16143_v50 = vsel %vm3426_vm4, %v3472_v34, %v3473_v21  ;;  %v3480_v34 = vrot.slane %v16163_v4, 3 }
 0x17e   : > { %12816 = vmatmul.mubr.msk.f32.gmra.mrb[46].mxu0 %vm596_vm2, %v19334_v9  ;;  %12418 = vmatprep.mubr.msk.f32.mxu1 %vm596_vm2, %v16117_v25  ;;  %19362 = vst [vmem:[#allocation59_spill] sm:$0xff] %v16143_v50  ;;  %v3477_v9 = vrot.slane %v16146_v36, 3  ;;  %v16150_v25 = vld [vmem:[%s14396_s13 + $0x210] sm:$0xff] }
 0x17f   : > { %12818 = vmatprep.mubr.msk.f32.mxu0 %vm596_vm2, %v19335_v11  ;;  %v3478_v2 = vrot.slane %v16150_v25, 3  ;;  %v16160_v11 = vsel %vm3426_vm4, %v3473_v21, %v3475_v29  ;;  %v16172_v36 = vld [vmem:[%s14396_s13 + $0x230] sm:$0xff] }
 0x180   : > { %19364 = vst [vmem:[#allocation61_spill] sm:$0xff] %v16160_v11  ;;  %19366 = vst [vmem:[#allocation7_spill] sm:$0xff] %v16172_v36 }
 0x181   : > { %12419 = vmatmul.mubr.msk.f32.gmra.mrb[48].mxu1 %vm596_vm2, %v16134_v8  ;;  %v16169_v8 = vsel %vm3426_vm4, %v3477_v9, %v3478_v2  ;;  %v16186_v29 = vsel %vm3426_vm4, %v3478_v2, %v3480_v34  ;;  %v16189_v9 = vld [vmem:[%s14396_s13 + $0x240] sm:$0xff] }
 0x182   : > { %12819 = vmatmul.mubr.msk.f32.gmra.mrb[48].mxu0 %vm596_vm2, %v19336_v30  ;;  %12421 = vmatprep.mubr.msk.f32.mxu1 %vm596_vm2, %v16143_v50  ;;  %19365 = vst [vmem:[#allocation62_spill] sm:$0xff] %v16169_v8  ;;  %v3482_v30 = vrot.slane %v16172_v36, 3  ;;  %v16176_v50 = vld [vmem:[%s14396_s13 + $0x238] sm:$0xff]  ;;  %19367 = vst [vmem:[#allocation10_spill] sm:$0xff] %v16186_v29 }
 0x183   : > { %12821 = vmatprep.mubr.msk.f32.mxu0 %vm596_vm2, %v19337_v22  ;;  %v3483_v21 = vrot.slane %v16176_v50, 3  ;;  %v3485_v22 = vrot.slane %v16189_v9, 3  ;;  %v16198_v36 = vld [vmem:[%s14396_s13 + $0x258] sm:$0xff] }
 0x184   : > { %19369 = vst [vmem:[#allocation15_spill] sm:$0xff] %v16198_v36 }
 0x185   : > { %12422 = vmatmul.mubr.msk.f32.gmra.mrb[50].mxu1 %vm596_vm2, %v16160_v11  ;;  %v16195_v11 = vsel %vm3426_vm4, %v3482_v30, %v3483_v21  ;;  %v16212_v34 = vsel %vm3426_vm4, %v3483_v21, %v3485_v22  ;;  %v16215_v30 = vld [vmem:[%s14396_s13 + $0x268] sm:$0xff] }
 0x186   : > { %12822 = vmatmul.mubr.msk.f32.gmra.mrb[50].mxu0 %vm596_vm2, %v19338_v3  ;;  %12424 = vmatprep.mubr.msk.f32.mxu1 %vm596_vm2, %v16169_v8  ;;  %19368 = vst [vmem:[#allocation12_spill] sm:$0xff] %v16195_v11  ;;  %v3487_v3 = vrot.slane %v16198_v36, 3  ;;  %v16202_v8 = vld [vmem:[%s14396_s13 + $0x260] sm:$0xff]  ;;  %19370 = vst [vmem:[#allocation17_spill] sm:$0xff] %v16212_v34 }
 0x187   : > { %12824 = vmatprep.mubr.msk.f32.mxu0 %vm596_vm2, %v19339_v46  ;;  %v3488_v2 = vrot.slane %v16202_v8, 3  ;;  %19371 = vst [vmem:[#allocation19_spill] sm:$0xff] %v16215_v30  ;;  %v3490_v46 = vrot.slane %v16215_v30, 3  ;;  %v14137_v36 = vld [vmem:[%s14396_s13 + $0x280] sm:$0xff] }
 0x189   : > { %12425 = vmatmul.mubr.msk.f32.gmra.mrb[52].mxu1 %vm596_vm2, %v16186_v29  ;;  %v16221_v29 = vsel %vm3426_vm4, %v3487_v3, %v3488_v2  ;;  %v16235_v22 = vsel %vm3426_vm4, %v3488_v2, %v3490_v46  ;;  %v16238_v3 = vld [vmem:[%s14396_s13 + $0x290] sm:$0xff] }
 0x18a   : > { %12825 = vmatmul.mubr.msk.f32.gmra.mrb[52].mxu0 %vm596_vm2, %v19340_v17  ;;  %12427 = vmatprep.mubr.msk.f32.mxu1 %vm596_vm2, %v16195_v11  ;;  %19372 = vst [vmem:[#allocation42_spill] sm:$0xff] %v16221_v29  ;;  %v3492_v17 = vrot.slane %v14137_v36, 3  ;;  %v3493_v11 = vrot.slane %v16225_v43, 3  ;;  %19373 = vst [vmem:[#allocation43_spill] sm:$0xff] %v16235_v22  ;;  %v3495_v36 = vrot.slane %v16238_v3, 3 }
 0x18b   : > { %12827 = vmatprep.mubr.msk.f32.mxu0 %vm596_vm2, %v19341_v13  ;;  %v14140_v13 = vld [vmem:[%s14396_s13 + $0x2a8] sm:$0xff] }
 0x18c   : > { %v16244_v21 = vsel %vm3426_vm4, %v3492_v17, %v3493_v11  ;;  %v16258_v46 = vsel %vm3426_vm4, %v3493_v11, %v3495_v36  ;;  %v16261_v17 = vld [vmem:[%s14396_s13 + $0x2b8] sm:$0xff] }
 0x18d   : > { %12428 = vmatmul.mubr.msk.f32.gmra.mrb[54].mxu1 %vm596_vm2, %v16212_v34  ;;  %v16248_v34 = vld [vmem:[%s14396_s13 + $0x2b0] sm:$0xff] }
 0x18e   : > { %12828 = vmatmul.mubr.msk.f32.gmra.mrb[54].mxu0 %vm596_vm2, %v19342_v40  ;;  %12430 = vmatprep.mubr.msk.f32.mxu1 %vm596_vm2, %v16221_v29  ;;  %v3497_v40 = vrot.slane %v14140_v13, 3  ;;  %19374 = vst [vmem:[#allocation46_spill] sm:$0xff] %v16248_v34  ;;  %v3498_v29 = vrot.slane %v16248_v34, 3  ;;  %v3500_v13 = vrot.slane %v16261_v17, 3  ;;  %v16271_v34 = vld [vmem:[%s14396_s13 + $0x2d8] sm:$0xff] }
 0x18f   : > { %12830 = vmatprep.mubr.msk.f32.mxu0 %vm596_vm2, %v19294_v48  ;;  %v14143_v48 = vld [vmem:[%s14396_s13 + $0x2d0] sm:$0xff] }
 0x190   : > { %v16267_v2 = vsel %vm3426_vm4, %v3497_v40, %v3498_v29  ;;  %v16281_v11 = vsel %vm3426_vm4, %v3498_v29, %v3500_v13  ;;  %v16284_v40 = vld [vmem:[%s14396_s13 + $0x2e0] sm:$0xff] }
 0x191   : > { %12431 = vmatmul.mubr.msk.f32.gmra.mrb[56].mxu1 %vm596_vm2, %v16235_v22  ;;  %19375 = vst [vmem:[#allocation47_spill] sm:$0xff] %v16267_v2  ;;  %v3502_v22 = vrot.slane %v14143_v48, 3  ;;  %19376 = vst [vmem:[#allocation48_spill] sm:$0xff] %v16281_v11  ;;  %v3505_v48 = vrot.slane %v16284_v40, 3 }
 0x192   : > { %12831 = vmatmul.mubr.msk.f32.gmra.mrb[56].mxu0 %vm596_vm2, %v19296_v5  ;;  %12433 = vmatprep.mubr.msk.f32.mxu1 %vm596_vm2, %v16244_v21  ;;  %v3503_v5 = vrot.slane %v16271_v34, 3 }
 0x193   : > { %12833 = vmatprep.mubr.msk.f32.mxu0 %vm596_vm2, %v19298_v41  ;;  %v4062_v41 = vrot.slane %v15662_v37, 7 }
 0x194   : > { %v16290_v36 = vsel %vm3426_vm4, %v3502_v22, %v3503_v5  ;;  %v16301_v29 = vsel %vm3426_vm4, %v3503_v5, %v3505_v48  ;;  %v4065_v22 = vrot.slane %v15682_v49, 7  ;;  %v4070_v48 = vrot.slane %v15709_v56, 7 }
 0x195   : > { %12434 = vmatmul.mubr.msk.f32.gmra.mrb[58].mxu1 %vm596_vm2, %v16258_v46  ;;  %19377 = vst [vmem:[#allocation71_spill] sm:$0xff] %v16290_v36  ;;  %19378 = vst [vmem:[#allocation72_spill] sm:$0xff] %v16301_v29 }
 0x196   : > { %12834 = vmatmul.mubr.msk.f32.gmra.mrb[58].mxu0 %vm596_vm2, %v19343_v47  ;;  %12436 = vmatprep.mubr.msk.f32.mxu1 %vm596_vm2, %v16267_v2  ;;  %v4063_v47 = vrot.slane %v15665_v54, 7  ;;  %v4068_v2 = vrot.slane %v15698_v24, 7 }
 0x197   : > { %12836 = vmatprep.mubr.msk.f32.mxu0 %vm596_vm2, %v19302_v32  ;;  %v196_v32 = vld [vmem:[%s14396_s13] sm:$0xff] }
 0x198   : > { %v4064_v13 = vsel %vm4061_vm5, %v4062_v41, %v4063_v47  ;;  %v4066_v5 = vsel %vm4061_vm5, %v4063_v47, %v4065_v22  ;;  %v4072_v41 = vrot.slane %v15712_v14, 7  ;;  %v4075_v47 = vrot.slane %v15734_v12, 7 }
 0x199   : > { %12437 = vmatmul.mubr.msk.f32.gmra.mrb[60].mxu1 %vm596_vm2, %v16281_v11  ;;  %v4067_v11 = vrot.slane %v15695_v61, 7  ;;  %v4077_v22 = vrot.slane %v15987_v28, 7 }
 0x19a   : > { %12837 = vmatmul.mubr.msk.f32.gmra.mrb[60].mxu0 %vm596_vm2, %v19304_v26  ;;  %12439 = vmatprep.mubr.msk.f32.mxu1 %vm596_vm2, %v16290_v36 }
 0x19b   : > { %12839 = vmatprep.mubr.msk.f32.mxu0 %vm596_vm2, %v19305_v60  ;;  %v4073_v60 = vrot.slane %v15715_v39, 7  ;;  %v4069_v26 = vsel %vm4061_vm5, %v4067_v11, %v4068_v2  ;;  %v16337_v11 = vld [vmem:[%s18899_s1 + $0x54] sm:$0xf] }
 0x19d   : > { %12440 = vmatmul.mubr.msk.f32.gmra.mrb[62].mxu1 %vm596_vm2, %v16301_v29  ;;  %v201_v29 = vld [vmem:[%s14396_s13 + $0x28] sm:$0xff] }
 0x19e   : > { %12840 = vmatmul.mubr.msk.f32.gmra.mrb[62].mxu0 %vm596_vm2, %v19306_v62  ;;  %12444 = vmatprep.mubr.msk.f32.mxu1 %vm596_vm2, %v4064_v13  ;;  %v16326_v13 = vld [vmem:[%s18899_s1 + $0x34] sm:$0xf] }
 0x19f   : > { %12844 = vmatprep.mubr.msk.f32.mxu0 %vm596_vm2, %v196_v32  ;;  %v4071_v32 = vsel %vm4061_vm5, %v4068_v2, %v4070_v48  ;;  %v206_v2 = vld [vmem:[%s14396_s13 + $0x50] sm:$0xff]  ;;  %v4082_v48 = vrot.slane %v16012_v6, 7 }
 0x1a1   : > { %12445 = vmatmul.mubr.msk.f32.vlgmr.msra.gmra.mrb[32].mxu1 %vm596_vm2, %v4066_v5 }
 0x1a2   : > { %12493 = vmatpush3.msk.msra.mxu1 %vm661_vm0, %v15964_v51  ;;  %12845 = vmatmul.mubr.msk.f32.vlgmr.msra.gmra.mrb[32].mxu0 %vm596_vm2, %v15887_v33  ;;  %v4074_v51 = vsel %vm4061_vm5, %v4072_v41, %v4073_v60  ;;  %v4078_v33 = vrot.slane %v16001_v44, 7  ;;  %v4083_v41 = vrot.slane %v16020_v15, 7 }
 0x1a3   : > { %12893 = vmatpush3.msk.msra.mxu0 %vm661_vm0, %v15975_v35  ;;  %12447 = vmatprep.mubr.msk.f32.mxu1 %vm596_vm2, %v4069_v26  ;;  %v4076_v26 = vsel %vm4061_vm5, %v4073_v60, %v4075_v47  ;;  %v16357_v35 = vld [vmem:[%s14396_s13 + $0x108] sm:$0xff] }
 0x1a4   : > { %12847 = vmatprep.mubr.msk.f32.mxu0 %vm596_vm2, %v201_v29  ;;  %12542 = vmatprep.subr.msk.mxu1 %vm661_vm0, %v16326_v13  ;;  %v4080_v29 = vrot.slane %v16357_v35, 7  ;;  %v4079_v5 = vsel %vm4061_vm5, %v4077_v22, %v4078_v33  ;;  %v4084_v47 = vsel %vm4061_vm5, %v4082_v48, %v4083_v41  ;;  %v4088_v22 = vrot.slane %v16040_v19, 7 }
 0x1a5   : > { %12448 = vmatmul.mubr.msk.f32.gmra.mrb[34].mxu1 %vm596_vm2, %v4071_v32  ;;  %12942 = vmatprep.subr.msk.mxu0 %vm661_vm0, %v16337_v11 }
 0x1a6   : > { %12848 = vmatmul.mubr.msk.f32.gmra.mrb[34].mxu0 %vm596_vm2, %v15916_v1  ;;  %12450 = vmatprep.mubr.msk.f32.mxu1 %vm596_vm2, %v4074_v51  ;;  %v4081_v60 = vsel %vm4061_vm5, %v4078_v33, %v4080_v29  ;;  %v16370_v1 = vld [vmem:[%s14396_s13 + $0x130] sm:$0xff]  ;;  %v4087_v51 = vrot.slane %v16031_v53, 7  ;;  %v16384_v33 = vld [vmem:[%s14396_s13 + $0x158] sm:$0xff]  ;;  %v4093_v29 = vrot.slane %v16060_v52, 7 }
 0x1a7   : > { %12850 = vmatprep.mubr.msk.f32.mxu0 %vm596_vm2, %v206_v2  ;;  %v4085_v32 = vrot.slane %v16370_v1, 7 }
 0x1a8   : > { %v4089_v2 = vsel %vm4061_vm5, %v4087_v51, %v4088_v22 }
 0x1a9   : > { %12451 = vmatmul.mubr.msk.f32.gmra.mrb[36].mxu1 %vm596_vm2, %v4076_v26  ;;  %v4092_v26 = vrot.slane %v16051_v59, 7 }
 0x1aa   : > { %12851 = vmatmul.mubr.msk.f32.gmra.mrb[36].mxu0 %vm596_vm2, %v15939_v45  ;;  %12453 = vmatprep.mubr.msk.f32.mxu1 %vm596_vm2, %v4079_v5  ;;  %v4086_v45 = vsel %vm4061_vm5, %v4083_v41, %v4085_v32  ;;  %v16398_v5 = vld [vmem:[%s14396_s13 + $0x180] sm:$0xff]  ;;  %v4097_v41 = vrot.slane %v16073_v27, 7 }
 0x1ab   : > { %12853 = vmatprep.mubr.msk.f32.mxu0 %vm596_vm2, %v15882_v42  ;;  %v4090_v42 = vrot.slane %v16384_v33, 7  ;;  %v16404_v48 = vsel %vm4061_vm5, %v4092_v26, %v4093_v29  ;;  %v16445_v26 = vld [vmem:[%s14396_s13 + $0x1d0] sm:$0xff] }
 0x1ac   : > { %19379 = vst [vmem:[#allocation73_spill] sm:$0xff] %v16404_v48 }
 0x1ad   : > { %12454 = vmatmul.mubr.msk.f32.gmra.mrb[38].mxu1 %vm596_vm2, %v4081_v60  ;;  %v4098_v60 = vrot.slane %v16085_v18, 7 }
 0x1ae   : > { %12854 = vmatmul.mubr.msk.f32.gmra.mrb[38].mxu0 %vm596_vm2, %v15662_v37  ;;  %12456 = vmatprep.mubr.msk.f32.mxu1 %vm596_vm2, %v4084_v47  ;;  %v4091_v37 = vsel %vm4061_vm5, %v4088_v22, %v4090_v42  ;;  %v16421_v47 = vld [vmem:[%s14396_s13 + $0x1a8] sm:$0xff] }
 0x1af   : > { %12856 = vmatprep.mubr.msk.f32.mxu0 %vm596_vm2, %v15909_v16  ;;  %v4095_v16 = vrot.slane %v16398_v5, 7  ;;  %v4100_v51 = vrot.slane %v16421_v47, 7  ;;  %v16427_v22 = vsel %vm4061_vm5, %v4097_v41, %v4098_v60 }
 0x1b0   : > { %19381 = vst [vmem:[#allocation75_spill] sm:$0xff] %v16427_v22 }
 0x1b1   : > { %12457 = vmatmul.mubr.msk.f32.gmra.mrb[40].mxu1 %vm596_vm2, %v4086_v45  ;;  %v4102_v45 = vrot.slane %v16098_v20, 7 }
 0x1b2   : > { %12857 = vmatmul.mubr.msk.f32.gmra.mrb[40].mxu0 %vm596_vm2, %v15695_v61  ;;  %12459 = vmatprep.mubr.msk.f32.mxu1 %vm596_vm2, %v4089_v2 }
 0x1b3   : > { %12859 = vmatprep.mubr.msk.f32.mxu0 %vm596_vm2, %v15932_v57  ;;  %v16418_v57 = vsel %vm4061_vm5, %v4093_v29, %v4095_v16  ;;  %v4105_v29 = vrot.slane %v16445_v26, 7  ;;  %v4107_v16 = vrot.slane %v16124_v0, 7 }
 0x1b4   : > { %v16408_v32 = vpop.f32.mrb[0].mxu1  ;;  %19380 = vst [vmem:[#allocation74_spill] sm:$0xff] %v16418_v57 }
 0x1b5   : > { %v16410_v61 = vpop.f32.mrb[1].mxu1  ;;  %12460 = vmatmul.mubr.msk.f32.gmra.mrb[42].mxu1 %vm596_vm2, %v4091_v37 }
 0x1b6   : > { %12860 = vmatmul.mubr.msk.f32.gmra.mrb[42].mxu0 %vm596_vm2, %v15712_v14  ;;  %12462 = vmatprep.mubr.msk.f32.mxu1 %vm596_vm2, %v16404_v48  ;;  %v4103_v14 = vrot.slane %v16111_v38, 7 }
 0x1b7   : > { %12862 = vmatprep.mubr.msk.f32.mxu0 %vm596_vm2, %v15983_v55  ;;  %v16442_v55 = vsel %vm4061_vm5, %v4098_v60, %v4100_v51  ;;  %v16469_v60 = vld [vmem:[%s14396_s13 + $0x1f8] sm:$0xff] }
 0x1b8   : > { %v16431_v42 = vpop.f32.mrb[2].mxu1  ;;  %19382 = vst [vmem:[#allocation76_spill] sm:$0xff] %v16442_v55  ;;  %v16451_v37 = vsel %vm4061_vm5, %v4102_v45, %v4103_v14  ;;  %v4110_v51 = vrot.slane %v16469_v60, 7 }
 0x1b9   : > { %v16433_v2 = vpop.f32.mrb[3].mxu1  ;;  %12463 = vmatmul.mubr.msk.f32.gmra.mrb[44].mxu1 %vm596_vm2, %v16418_v57  ;;  %19383 = vst [vmem:[#allocation77_spill] sm:$0xff] %v16451_v37 }
 0x1ba   : > { %12863 = vmatmul.mubr.msk.f32.gmra.mrb[44].mxu0 %vm596_vm2, %v15987_v28  ;;  %12465 = vmatprep.mubr.msk.f32.mxu1 %vm596_vm2, %v16427_v22  ;;  %v4108_v28 = vrot.slane %v16137_v58, 7 }
 0x1bb   : > { %12865 = vmatprep.mubr.msk.f32.mxu0 %vm596_vm2, %v16008_v7  ;;  %v16466_v7 = vsel %vm4061_vm5, %v4103_v14, %v4105_v29  ;;  %v16493_v14 = vld [vmem:[%s14396_s13 + $0x220] sm:$0xff] }
 0x1bc   : > { %v16455_v41 = vpop.f32.mrb[4].mxu1  ;;  %19384 = vst [vmem:[#allocation78_spill] sm:$0xff] %v16466_v7  ;;  %v16475_v45 = vsel %vm4061_vm5, %v4107_v16, %v4108_v28  ;;  %v4115_v29 = vrot.slane %v16493_v14, 7 }
 0x1bd   : > { %v16457_v22 = vpop.f32.mrb[5].mxu1  ;;  %12466 = vmatmul.mubr.msk.f32.gmra.mrb[46].mxu1 %vm596_vm2, %v16442_v55  ;;  %19385 = vst [vmem:[#allocation79_spill] sm:$0xff] %v16475_v45  ;;  %v4112_v55 = vrot.slane %v16150_v25, 7 }
 0x1be   : > { %12866 = vmatmul.mubr.msk.f32.gmra.mrb[46].mxu0 %vm596_vm2, %v16012_v6  ;;  %12468 = vmatprep.mubr.msk.f32.mxu1 %vm596_vm2, %v16451_v37  ;;  %v4113_v6 = vrot.slane %v16163_v4, 7 }
 0x1bf   : > { %12868 = vmatprep.mubr.msk.f32.mxu0 %vm596_vm2, %v16027_v31  ;;  %v16490_v31 = vsel %vm4061_vm5, %v4108_v28, %v4110_v51 }
 0x1c0   : > { %v16479_v57 = vpop.f32.mrb[6].mxu1  ;;  %19386 = vst [vmem:[#allocation80_spill] sm:$0xff] %v16490_v31  ;;  %v16499_v16 = vsel %vm4061_vm5, %v4112_v55, %v4113_v6  ;;  %v16517_v55 = vld [vmem:[%s14396_s13 + $0x248] sm:$0xff] }
 0x1c1   : > { %v16481_v37 = vpop.f32.mrb[7].mxu1  ;;  %12469 = vmatmul.mubr.msk.f32.gmra.mrb[48].mxu1 %vm596_vm2, %v16466_v7  ;;  %19387 = vst [vmem:[#allocation81_spill] sm:$0xff] %v16499_v16  ;;  %v4117_v7 = vrot.slane %v16176_v50, 7  ;;  %19389 = vst [vmem:[#allocation83_spill] sm:$0xff] %v16517_v55  ;;  %v4120_v28 = vrot.slane %v16517_v55, 7 }
 0x1c2   : > { %12869 = vmatmul.mubr.msk.f32.gmra.mrb[48].mxu0 %vm596_vm2, %v16031_v53  ;;  %12471 = vmatprep.mubr.msk.f32.mxu1 %vm596_vm2, %v16475_v45  ;;  %v4118_v53 = vrot.slane %v16189_v9, 7 }
 0x1c3   : > { %12871 = vmatprep.mubr.msk.f32.mxu0 %vm596_vm2, %v16047_v23  ;;  %v16514_v23 = vsel %vm4061_vm5, %v4113_v6, %v4115_v29 }
 0x1c4   : > { %v16503_v48 = vpop.f32.mrb[8].mxu1  ;;  %19388 = vst [vmem:[#allocation82_spill] sm:$0xff] %v16514_v23  ;;  %v16523_v51 = vsel %vm4061_vm5, %v4117_v7, %v4118_v53  ;;  %v16541_v7 = vld [vmem:[%s14396_s13 + $0x270] sm:$0xff] }
 0x1c5   : > { %v16505_v45 = vpop.f32.mrb[9].mxu1  ;;  %12472 = vmatmul.mubr.msk.f32.gmra.mrb[50].mxu1 %vm596_vm2, %v16490_v31  ;;  %19390 = vst [vmem:[#allocation84_spill] sm:$0xff] %v16523_v51  ;;  %v4122_v31 = vrot.slane %v16202_v8, 7  ;;  %19392 = vst [vmem:[#allocation86_spill] sm:$0xff] %v16541_v7  ;;  %v4125_v6 = vrot.slane %v16541_v7, 7  ;;  %v4133_v7 = vrot.slane %v16261_v17, 7 }
 0x1c6   : > { %12872 = vmatmul.mubr.msk.f32.gmra.mrb[50].mxu0 %vm596_vm2, %v16051_v59  ;;  %12474 = vmatprep.mubr.msk.f32.mxu1 %vm596_vm2, %v16499_v16  ;;  %v4123_v59 = vrot.slane %v16215_v30, 7  ;;  %v19399_v17 = vld [vmem:[#allocation60_spill] sm:$0xff] }
 0x1c7   : > { %12874 = vmatprep.mubr.msk.f32.mxu0 %vm596_vm2, %v16069_v63  ;;  %v16538_v63 = vsel %vm4061_vm5, %v4118_v53, %v4120_v28  ;;  %v19397_v28 = vld [vmem:[#allocation46_spill] sm:$0xff] }
 0x1c8   : > { %v16527_v62 = vpop.f32.mrb[10].mxu1  ;;  %19391 = vst [vmem:[#allocation85_spill] sm:$0xff] %v16538_v63  ;;  %v16547_v29 = vsel %vm4061_vm5, %v4122_v31, %v4123_v59 }
 0x1c9   : > { %v16529_v16 = vpop.f32.mrb[11].mxu1  ;;  %12475 = vmatmul.mubr.msk.f32.gmra.mrb[52].mxu1 %vm596_vm2, %v16514_v23  ;;  %19393 = vst [vmem:[#allocation87_spill] sm:$0xff] %v16547_v29  ;;  %v4127_v23 = vrot.slane %v16225_v43, 7  ;;  %v14156_v43 = vld [vmem:[%s14396_s13 + $0x298] sm:$0xff] }
 0x1ca   : > { %12875 = vmatmul.mubr.msk.f32.gmra.mrb[52].mxu0 %vm596_vm2, %v16073_v27  ;;  %12477 = vmatprep.mubr.msk.f32.mxu1 %vm596_vm2, %v16523_v51  ;;  %v4128_v27 = vrot.slane %v16238_v3, 7  ;;  %v4130_v31 = vrot.slane %v14156_v43, 7  ;;  %v19395_v3 = vld [vmem:[#allocation57_spill] sm:$0xff] }
 0x1cb   : > { %12877 = vmatprep.mubr.msk.f32.mxu0 %vm596_vm2, %v16094_v10  ;;  %v16562_v10 = vsel %vm4061_vm5, %v4123_v59, %v4125_v6  ;;  %v14157_v59 = vld [vmem:[%s14396_s13 + $0x2c0] sm:$0xff] }
 0x1cc   : > { %v16551_v30 = vpop.f32.mrb[12].mxu1  ;;  %19394 = vst [vmem:[#allocation88_spill] sm:$0xff] %v16562_v10  ;;  %v16568_v53 = vsel %vm4061_vm5, %v4127_v23, %v4128_v27  ;;  %v16583_v23 = vsel %vm4061_vm5, %v4128_v27, %v4130_v31  ;;  %v4135_v6 = vrot.slane %v14157_v59, 7  ;;  %v14158_v27 = vld [vmem:[%s14396_s13 + $0x2e8] sm:$0xff]  ;;  %v19402_v31 = vld [vmem:[#allocation7_spill] sm:$0xff] }
 0x1cd   : > { %v16553_v51 = vpop.f32.mrb[13].mxu1  ;;  %12478 = vmatmul.mubr.msk.f32.gmra.mrb[54].mxu1 %vm596_vm2, %v16538_v63  ;;  %19396 = vst [vmem:[#allocation57_spill] sm:$0xff] %v16568_v53  ;;  %v4132_v63 = vrot.slane %v19397_v28, 7  ;;  %19398 = vst [vmem:[#allocation46_spill] sm:$0xff] %v16583_v23  ;;  %v4138_v28 = vrot.slane %v16284_v40, 7 }
 0x1ce   : > { %12878 = vmatmul.mubr.msk.f32.gmra.mrb[54].mxu0 %vm596_vm2, %v16098_v20  ;;  %12480 = vmatprep.mubr.msk.f32.mxu1 %vm596_vm2, %v16547_v29  ;;  %v200_v29 = vld [vmem:[%s14396_s13 + $0x20] sm:$0x3] }
 0x1cf   : > { %12880 = vmatprep.mubr.msk.f32.mxu0 %vm596_vm2, %v19395_v3  ;;  %v16589_v43 = vsel %vm4061_vm5, %v4132_v63, %v4133_v7  ;;  %v4137_v3 = vrot.slane %v16271_v34, 7  ;;  %v16604_v63 = vsel %vm4061_vm5, %v4133_v7, %v4135_v6  ;;  %v4140_v34 = vrot.slane %v14158_v27, 7  ;;  %v19409_v6 = vld [vmem:[#allocation15_spill] sm:$0xff] }
 0x1d0   : > { %v16572_v55 = vpop.f32.mrb[14].mxu1  ;;  %19400 = vst [vmem:[#allocation60_spill] sm:$0xff] %v16589_v43  ;;  %19401 = vst [vmem:[#allocation89_spill] sm:$0xff] %v16604_v63 }
 0x1d1   : > { %v16574_v20 = vpop.f32.mrb[15].mxu1  ;;  %12481 = vmatmul.mubr.msk.f32.gmra.mrb[56].mxu1 %vm596_vm2, %v16562_v10  ;;  %v16610_v40 = vsel %vm4061_vm5, %v4137_v3, %v4138_v28  ;;  %v16626_v7 = vsel %vm4061_vm5, %v4138_v28, %v4140_v34  ;;  %v7074_v3 = vrot.slane %v200_v29, 2  ;;  %v19414_v34 = vld [vmem:[#allocation70_spill] sm:$0xff] }
 0x1d2   : > { %12881 = vmatmul.mubr.msk.f32.gmra.mrb[56].mxu0 %vm596_vm2, %v16124_v0  ;;  %12483 = vmatprep.mubr.msk.f32.mxu1 %vm596_vm2, %v16568_v53  ;;  %19403 = vst [vmem:[#allocation7_spill] sm:$0xff] %v16610_v40 }
 0x1d3   : > { %12883 = vmatprep.mubr.msk.f32.mxu0 %vm596_vm2, %v19399_v17  ;;  %v19405_v17 = vld [vmem:[#allocation64_spill] sm:$0xff] }
 0x1d4   : > { %v16593_v0 = vpop.f32.mrb[16].mxu1 }
 0x1d5   : > { %v16595_v10 = vpop.f32.mrb[17].mxu1  ;;  %12484 = vmatmul.mubr.msk.f32.gmra.mrb[58].mxu1 %vm596_vm2, %v16583_v23  ;;  %v7071_v23 = vrot.slane %v19405_v17, 2  ;;  %v205_v17 = vld [vmem:[%s14396_s13 + $0x48] sm:$0x3] }
 0x1d6   : > { %12884 = vmatmul.mubr.msk.f32.gmra.mrb[58].mxu0 %vm596_vm2, %v16150_v25  ;;  %12486 = vmatprep.mubr.msk.f32.mxu1 %vm596_vm2, %v16589_v43  ;;  %v19406_v25 = vld [vmem:[#allocation65_spill] sm:$0xff] }
 0x1d7   : > { %12886 = vmatprep.mubr.msk.f32.mxu0 %vm596_vm2, %v19402_v31  ;;  %v7072_v53 = vrot.slane %v19406_v25, 2  ;;  %19408 = vst [vmem:[#allocation65_spill] sm:$0xff] %v16626_v7 }
 0x1d8   : > { %v16612_v59 = vpop.f32.mrb[18].mxu1 }
 0x1d9   : > { %19404 = vst [vmem:[#allocation90_spill] sm:$0xff] %v16612_v59  ;;  %v16617_v43 = vpop.f32.mrb[19].mxu1  ;;  %12487 = vmatmul.mubr.msk.f32.gmra.mrb[60].mxu1 %vm596_vm2, %v16604_v63  ;;  %v7073_v31 = vsel %vm7070_vm6, %v7071_v23, %v7072_v53  ;;  %v19413_v63 = vld [vmem:[#allocation67_spill] sm:$0xff]  ;;  %v7075_v29 = vsel %vm7070_vm6, %v7072_v53, %v7074_v3  ;;  %v7079_v23 = vrot.slane %v205_v17, 2  ;;  %v16659_v53 = vld [vmem:[%s18899_s1 + $0x38] sm:$0xf] }
 0x1da   : > { %19407 = vst [vmem:[#allocation64_spill] sm:$0xff] %v16617_v43  ;;  %12887 = vmatmul.mubr.msk.f32.gmra.mrb[60].mxu0 %vm596_vm2, %v16176_v50  ;;  %12489 = vmatprep.mubr.msk.f32.mxu1 %vm596_vm2, %v16610_v40  ;;  %v19412_v50 = vld [vmem:[#allocation66_spill] sm:$0xff]  ;;  %v7077_v28 = vrot.slane %v19413_v63, 2  ;;  %v19417_v63 = vld [vmem:[#allocation36_spill] sm:$0xff]  ;;  %v19418_v3 = vld [vmem:[#allocation37_spill] sm:$0xff] }
 0x1db   : > { %12889 = vmatprep.mubr.msk.f32.mxu0 %vm596_vm2, %v19409_v6  ;;  %v7076_v40 = vrot.slane %v19412_v50, 2  ;;  %v210_v50 = vld [vmem:[%s14396_s13 + $0x70] sm:$0x3] }
 0x1dc   : > { %v16630_v27 = vpop.f32.mrb[20].mxu1 }
 0x1dd   : > { %19410 = vst [vmem:[#allocation15_spill] sm:$0xff] %v16630_v27  ;;  %v16634_v25 = vpop.f32.mrb[21].mxu1  ;;  %12490 = vmatmul.mubr.msk.f32.gmra.mrb[62].mxu1 %vm596_vm2, %v16626_v7  ;;  %v19416_v7 = vld [vmem:[#allocation69_spill] sm:$0xff] }
 0x1de   : > { %19411 = vst [vmem:[#allocation91_spill] sm:$0xff] %v16634_v25  ;;  %12890 = vmatmul.mubr.msk.f32.gmra.mrb[62].mxu0 %vm596_vm2, %v16202_v8  ;;  %12494 = vmatprep.mubr.msk.f32.mxu1 %vm596_vm2, %v19414_v34  ;;  %v19415_v25 = vld [vmem:[#allocation68_spill] sm:$0xff]  ;;  %v7082_v43 = vrot.slane %v19416_v7, 2  ;;  %v7078_v8 = vsel %vm7070_vm6, %v7076_v40, %v7077_v28  ;;  %v7080_v40 = vsel %vm7070_vm6, %v7077_v28, %v7079_v23  ;;  %v7087_v34 = vrot.slane %v15682_v49, 2 }
 0x1df   : > { %12894 = vmatprep.mubr.msk.f32.mxu0 %vm596_vm2, %v7073_v31  ;;  %v7081_v27 = vrot.slane %v19415_v25, 2  ;;  %v16667_v7 = vld [vmem:[%s18899_s1 + $0x58] sm:$0xf]  ;;  %v7084_v31 = vrot.slane %v210_v50, 2  ;;  %v7086_v25 = vrot.slane %v15665_v54, 2  ;;  %v7091_v50 = vrot.slane %v15698_v24, 2 }
 0x1e0   : > { %v16646_v6 = vpop.f32.mrb[22].mxu1  ;;  %v7096_v24 = vrot.slane %v15715_v39, 2 }
 0x1e1   : > { %v16651_v59 = vpop.f32.mrb[23].mxu1  ;;  %12495 = vmatmul.mubr.msk.f32.vlgmr.msra.gmra.mrb[32].mxu1 %vm596_vm2, %v19417_v63  ;;  %v19419_v63 = vld [vmem:[#allocation38_spill] sm:$0xff]  ;;  %v7085_v49 = vsel %vm7070_vm6, %v7082_v43, %v7084_v31  ;;  %v7088_v23 = vsel %vm7070_vm6, %v7086_v25, %v7087_v34 }
 0x1e2   : > { %12543 = vmatpush3.msk.msra.mxu1 %vm661_vm0, %v16326_v13  ;;  %12895 = vmatmul.mubr.msk.f32.vlgmr.msra.gmra.mrb[32].mxu0 %vm596_vm2, %v7075_v29  ;;  %v7083_v13 = vsel %vm7070_vm6, %v7081_v27, %v7082_v43  ;;  %v215_v29 = vld [vmem:[%s14396_s13 + $0x98] sm:$0x3]  ;;  %v19420_v27 = vld [vmem:[#allocation41_spill] sm:$0xff] }
 0x1e3   : > { %12943 = vmatpush3.msk.msra.mxu0 %vm661_vm0, %v16337_v11  ;;  %12497 = vmatprep.mubr.msk.f32.mxu1 %vm596_vm2, %v19418_v3  ;;  %v7089_v54 = vrot.slane %v215_v29, 2  ;;  %v220_v3 = vld [vmem:[%s14396_s13 + $0xc0] sm:$0x3]  ;;  %v7097_v29 = vrot.slane %v15734_v12, 2 }
 0x1e4   : > { %v16674_v17 = vpop.f32.mrb[24].mxu1  ;;  %12897 = vmatprep.mubr.msk.f32.mxu0 %vm596_vm2, %v7078_v8  ;;  %12592 = vmatprep.subr.msk.mxu1 %vm661_vm0, %v16659_v53  ;;  %v7092_v8 = vrot.slane %v15709_v56, 2  ;;  %v7094_v31 = vrot.slane %v220_v3, 2  ;;  %v7102_v3 = vrot.slane %v16357_v35, 2  ;;  %v7106_v35 = vrot.slane %v16020_v15, 2 }
 0x1e5   : > { %v16683_v11 = vpop.f32.mrb[25].mxu1  ;;  %12498 = vmatmul.mubr.msk.f32.gmra.mrb[34].mxu1 %vm596_vm2, %v19419_v63  ;;  %12992 = vmatprep.subr.msk.mxu0 %vm661_vm0, %v16667_v7  ;;  %v7090_v43 = vsel %vm7070_vm6, %v7087_v34, %v7089_v54  ;;  %v19424_v34 = vld [vmem:[#allocation62_spill] sm:$0xff]  ;;  %v7098_v12 = vsel %vm7070_vm6, %v7096_v24, %v7097_v29  ;;  %v7107_v24 = vrot.slane %v16370_v1, 2 }
 0x1e6   : > { %12898 = vmatmul.mubr.msk.f32.gmra.mrb[34].mxu0 %vm596_vm2, %v7080_v40  ;;  %12500 = vmatprep.mubr.msk.f32.mxu1 %vm596_vm2, %v19420_v27  ;;  %v19421_v40 = vld [vmem:[#allocation58_spill] sm:$0xff]  ;;  %v7093_v56 = vsel %vm7070_vm6, %v7091_v50, %v7092_v8  ;;  %v7095_v54 = vsel %vm7070_vm6, %v7092_v8, %v7094_v31  ;;  %v7101_v50 = vrot.slane %v16001_v44, 2  ;;  %v19427_v8 = vld [vmem:[#allocation12_spill] sm:$0xff] }
 0x1e7   : > { %12900 = vmatprep.mubr.msk.f32.mxu0 %vm596_vm2, %v7083_v13  ;;  %v19422_v13 = vld [vmem:[#allocation59_spill] sm:$0xff]  ;;  %v225_v27 = vld [vmem:[%s14396_s13 + $0xe8] sm:$0x3] }
 0x1e8   : > { %v16694_v28 = vpop.f32.mrb[26].mxu1  ;;  %v7099_v39 = vrot.slane %v225_v27, 2  ;;  %v7103_v44 = vsel %vm7070_vm6, %v7101_v50, %v7102_v3  ;;  %v235_v27 = vld [vmem:[%s14396_s13 + $0x138] sm:$0x3]  ;;  %v19429_v50 = vld [vmem:[#allocation42_spill] sm:$0xff] }
 0x1e9   : > { %v16700_v63 = vpop.f32.mrb[27].mxu1  ;;  %12501 = vmatmul.mubr.msk.f32.gmra.mrb[36].mxu1 %vm596_vm2, %v19421_v40  ;;  %v19423_v40 = vld [vmem:[#allocation61_spill] sm:$0xff] }
 0x1ea   : > { %12901 = vmatmul.mubr.msk.f32.gmra.mrb[36].mxu0 %vm596_vm2, %v7085_v49  ;;  %12503 = vmatprep.mubr.msk.f32.mxu1 %vm596_vm2, %v19422_v13  ;;  %v230_v13 = vld [vmem:[%s14396_s13 + $0x110] sm:$0x3]  ;;  %v7100_v31 = vsel %vm7070_vm6, %v7097_v29, %v7099_v39 }
 0x1eb   : > { %12903 = vmatprep.mubr.msk.f32.mxu0 %vm596_vm2, %v7088_v23 }
 0x1ec   : > { %v16709_v25 = vpop.f32.mrb[28].mxu1 }
 0x1ed   : > { %v16715_v49 = vpop.f32.mrb[29].mxu1  ;;  %12504 = vmatmul.mubr.msk.f32.gmra.mrb[38].mxu1 %vm596_vm2, %v19423_v40  ;;  %v19426_v40 = vld [vmem:[#allocation10_spill] sm:$0xff] }
 0x1ee   : > { %12904 = vmatmul.mubr.msk.f32.gmra.mrb[38].mxu0 %vm596_vm2, %v7090_v43  ;;  %12506 = vmatprep.mubr.msk.f32.mxu1 %vm596_vm2, %v19424_v34  ;;  %v16749_v34 = vld [vmem:[%s18901_s3] ss:$0 sm:$0xff] }
 0x1ef   : > { %12906 = vmatprep.mubr.msk.f32.mxu0 %vm596_vm2, %v7093_v56  ;;  %v7104_v56 = vrot.slane %v230_v13, 2  ;;  %v7109_v13 = vrot.slane %v235_v27, 2  ;;  %v7116_v27 = vrot.slane %v16060_v52, 2 }
 0x1f0   : > { %v16724_v23 = vpop.f32.mrb[30].mxu1 }
 0x1f1   : > { %v16730_v43 = vpop.f32.mrb[31].mxu1  ;;  %12507 = vmatmul.mubr.msk.f32.gmra.mrb[40].mxu1 %vm596_vm2, %v19426_v40  ;;  %v7105_v1 = vsel %vm7070_vm6, %v7102_v3, %v7104_v56 }
 0x1f2   : > { %19425 = vst [vmem:[#allocation66_spill] sm:$0xff] %v16730_v43  ;;  %12907 = vmatmul.mubr.msk.f32.gmra.mrb[40].mxu0 %vm596_vm2, %v7095_v54  ;;  %12509 = vmatprep.mubr.msk.f32.mxu1 %vm596_vm2, %v19427_v8  ;;  %v7108_v8 = vsel %vm7070_vm6, %v7106_v35, %v7107_v24  ;;  %v19430_v43 = vld [vmem:[#allocation43_spill] sm:$0xff] }
 0x1f3   : > { %12909 = vmatprep.mubr.msk.f32.mxu0 %vm596_vm2, %v7098_v12  ;;  %v19428_v12 = vld [vmem:[#allocation17_spill] sm:$0xff] }
 0x1f5   : > { %v12296_v54 = vpop.f32.mrb[0].mxu0  ;;  %12510 = vmatmul.mubr.msk.f32.gmra.mrb[42].mxu1 %vm596_vm2, %v19428_v12 }
 0x1f6   : > { %v13292_v29 = vadd.f32 %v12296_v54, %v16408_v32  ;;  %v3155_v39 = vpop.f32.mrb[1].mxu0  ;;  %12910 = vmatmul.mubr.msk.f32.gmra.mrb[42].mxu0 %vm596_vm2, %v7100_v31  ;;  %12512 = vmatprep.mubr.msk.f32.mxu1 %vm596_vm2, %v19429_v50  ;;  %v7111_v32 = vrot.slane %v16040_v19, 2  ;;  %v7112_v54 = vrot.slane %v16384_v33, 2  ;;  %v240_v31 = vld [vmem:[%s14396_s13 + $0x160] sm:$0x3]  ;;  %v7110_v33 = vsel %vm7070_vm6, %v7107_v24, %v7109_v13  ;;  %v16801_v13 = vld [vmem:[%s14396_s13 + $0x2f8] sm:$0xff] }
 0x1f7   : > { %v13293_v15 = vadd.f32 %v3155_v39, %v16410_v61  ;;  %12912 = vmatprep.mubr.msk.f32.mxu0 %vm596_vm2, %v7103_v44  ;;  %v7114_v56 = vrot.slane %v240_v31, 2  ;;  %v245_v44 = vld [vmem:[%s14396_s13 + $0x188] sm:$0x3] }
 0x1f8   : > { %v3353_v40 = vadd.f32 %v13292_v29, %v16749_v34  ;;  %v7113_v35 = vsel %vm7070_vm6, %v7111_v32, %v7112_v54  ;;  %v7117_v29 = vrot.slane %v16398_v5, 2  ;;  %v7119_v52 = vrot.slane %v245_v44, 2  ;;  %v250_v32 = vld [vmem:[%s14396_s13 + $0x1b0] sm:$0x3] }
 0x1f9   : > { %v3352_v12 = vadd.f32 %v13293_v15, %v16749_v34  ;;  %v12299_v50 = vpop.f32.mrb[2].mxu0  ;;  %12513 = vmatmul.mubr.msk.f32.gmra.mrb[44].mxu1 %vm596_vm2, %v19430_v43  ;;  %v19431_v15 = vld [vmem:[#allocation47_spill] sm:$0xff] }
 0x1fa   : > { %3386 = vst.msk [vmem:[%s16768_s27 + $0x8] sm:$0xff] %vm3384_vm7, %v3353_v40  ;;  %v13294_v61 = vadd.f32 %v12299_v50, %v16431_v42  ;;  %v3165_v3 = vpop.f32.mrb[3].mxu0  ;;  %12913 = vmatmul.mubr.msk.f32.gmra.mrb[44].mxu0 %vm596_vm2, %v7105_v1  ;;  %12515 = vmatprep.mubr.msk.f32.mxu1 %vm596_vm2, %v16244_v21  ;;  %v7115_v1 = vsel %vm7070_vm6, %v7112_v54, %v7114_v56  ;;  %v16805_v40 = vld [vmem:[%s14396_s13 + $0x300] sm:$0xff]  ;;  %v7122_v54 = vrot.slane %v16421_v47, 2  ;;  %v16828_v47 = vld [vmem:[%s14396_s13 + $0x308] sm:$0xff] }
 0x1fb   : > { %3385 = vst.msk [vmem:[%s16768_s27] sm:$0xff] %vm3384_vm7, %v3352_v12  ;;  %v13295_v19 = vadd.f32 %v3165_v3, %v16433_v2  ;;  %12915 = vmatprep.mubr.msk.f32.mxu0 %vm596_vm2, %v7108_v8  ;;  %v4469_v8 = vrot.slane %v16805_v40, 3  ;;  %v16811_v12 = vsel %vm7070_vm6, %v7116_v27, %v7117_v29  ;;  %v4471_v44 = vrot.slane %v16828_v47, 3  ;;  %v16840_v27 = vld [vmem:[%s14396_s13 + $0x320] sm:$0xff] }
 0x1fc   : > { %v3355_v42 = vadd.f32 %v13294_v61, %v16749_v34 }
 0x1fd   : > { %v3354_v39 = vadd.f32 %v13295_v19, %v16749_v34  ;;  %v12302_v2 = vpop.f32.mrb[4].mxu0  ;;  %12516 = vmatmul.mubr.msk.f32.gmra.mrb[46].mxu1 %vm596_vm2, %v16258_v46  ;;  %v19432_v19 = vld [vmem:[#allocation48_spill] sm:$0xff] }
 0x1fe   : > { %3388 = vst.msk [vmem:[%s16768_s27 + $0x18] sm:$0xff] %vm3384_vm7, %v3355_v42  ;;  %v13296_v24 = vadd.f32 %v12302_v2, %v16455_v41  ;;  %v3175_v50 = vpop.f32.mrb[5].mxu0  ;;  %12916 = vmatmul.mubr.msk.f32.gmra.mrb[46].mxu0 %vm596_vm2, %v7110_v33  ;;  %12518 = vmatprep.mubr.msk.f32.mxu1 %vm596_vm2, %v19431_v15  ;;  %v4468_v41 = vrot.slane %v16801_v13, 3  ;;  %v7124_v42 = vrot.slane %v250_v32, 2  ;;  %v19434_v32 = vld [vmem:[#allocation72_spill] sm:$0xff] }
 0x1ff   : > { %3387 = vst.msk [vmem:[%s16768_s27 + $0x10] sm:$0xff] %vm3384_vm7, %v3354_v39  ;;  %v13297_v5 = vadd.f32 %v3175_v50, %v16457_v22  ;;  %12918 = vmatprep.mubr.msk.f32.mxu0 %vm596_vm2, %v7113_v35  ;;  %v7121_v22 = vrot.slane %v16085_v18, 2  ;;  %v16825_v18 = vsel %vm7070_vm6, %v7117_v29, %v7119_v52  ;;  %v4473_v29 = vrot.slane %v16840_v27, 3  ;;  %v16844_v39 = vld [vmem:[%s14396_s13 + $0x328] sm:$0xff] }
 0x200   : > { %v3357_v31 = vadd.f32 %v13296_v24, %v16749_v34  ;;  %v16837_v35 = vsel %vm3426_vm4, %v4468_v41, %v4469_v8  ;;  %v4474_v2 = vrot.slane %v16844_v39, 3  ;;  %v255_v24 = vld [vmem:[%s14396_s13 + $0x1d8] sm:$0x3]  ;;  %v7126_v52 = vrot.slane %v16111_v38, 2 }
 0x201   : > { %v3356_v61 = vadd.f32 %v13297_v5, %v16749_v34  ;;  %v12305_v3 = vpop.f32.mrb[6].mxu0  ;;  %12519 = vmatmul.mubr.msk.f32.gmra.mrb[48].mxu1 %vm596_vm2, %v19432_v19  ;;  %19433 = vst [vmem:[#allocation67_spill] sm:$0xff] %v16837_v35  ;;  %v7127_v5 = vrot.slane %v16445_v26, 2  ;;  %v16869_v26 = vsel %vm3426_vm4, %v4469_v8, %v4471_v44  ;;  %v16887_v44 = vld [vmem:[%s14396_s13 + $0x350] sm:$0xff] }
 0x202   : > { %3390 = vst.msk [vmem:[%s16768_s27 + $0x28] sm:$0xff] %vm3384_vm7, %v3357_v31  ;;  %v13298_v33 = vadd.f32 %v12305_v3, %v16479_v57  ;;  %v3185_v56 = vpop.f32.mrb[7].mxu0  ;;  %12919 = vmatmul.mubr.msk.f32.gmra.mrb[48].mxu0 %vm596_vm2, %v7115_v1  ;;  %12521 = vmatprep.mubr.msk.f32.mxu1 %vm596_vm2, %v16290_v36  ;;  %v16858_v31 = vld [vmem:[%s14396_s13 + $0x330] sm:$0xff]  ;;  %19435 = vst [vmem:[#allocation70_spill] sm:$0xff] %v16869_v26  ;;  %v16872_v3 = vsel %vm7070_vm6, %v7122_v54, %v7124_v42  ;;  %v260_v42 = vld [vmem:[%s14396_s13 + $0x200] sm:$0x3] }
 0x203   : > { %3389 = vst.msk [vmem:[%s16768_s27 + $0x20] sm:$0xff] %vm3384_vm7, %v3356_v61  ;;  %v13299_v57 = vadd.f32 %v3185_v56, %v16481_v37  ;;  %12921 = vmatprep.mubr.msk.f32.mxu0 %vm596_vm2, %v16811_v12  ;;  %v16850_v37 = vsel %vm7070_vm6, %v7121_v22, %v7122_v54  ;;  %v4476_v61 = vrot.slane %v16858_v31, 3  ;;  %v4479_v54 = vrot.slane %v16887_v44, 3 }
 0x204   : > { %v3359_v50 = vadd.f32 %v13298_v33, %v16749_v34  ;;  %v7129_v33 = vrot.slane %v255_v24, 2 }
 0x205   : > { %v3358_v1 = vadd.f32 %v13299_v57, %v16749_v34  ;;  %v12308_v41 = vpop.f32.mrb[8].mxu0  ;;  %12522 = vmatmul.mubr.msk.f32.gmra.mrb[50].mxu1 %vm596_vm2, %v19434_v32  ;;  %v16883_v57 = vld [vmem:[%s14396_s13 + $0x348] sm:$0xff] }
 0x206   : > { %3392 = vst.msk [vmem:[%s16768_s27 + $0x38] sm:$0xff] %vm3384_vm7, %v3359_v50  ;;  %v13300_v22 = vadd.f32 %v12308_v41, %v16503_v48  ;;  %v3195_v38 = vpop.f32.mrb[9].mxu0  ;;  %12922 = vmatmul.mubr.msk.f32.gmra.mrb[50].mxu0 %vm596_vm2, %v16825_v18  ;;  %12524 = vmatprep.mubr.msk.f32.mxu1 %vm596_vm2, %v16837_v35  ;;  %v16880_v48 = vsel %vm3426_vm4, %v4473_v29, %v4474_v2  ;;  %v4478_v8 = vrot.slane %v16883_v57, 3  ;;  %v7131_v50 = vrot.slane %v16137_v58, 2  ;;  %v16944_v35 = vld [vmem:[%s14396_s13 + $0x380] sm:$0xff] }
 0x207   : > { %3391 = vst.msk [vmem:[%s16768_s27 + $0x30] sm:$0xff] %vm3384_vm7, %v3358_v1  ;;  %v13301_v56 = vadd.f32 %v3195_v38, %v16505_v45  ;;  %12924 = vmatprep.mubr.msk.f32.mxu0 %vm596_vm2, %v16850_v37  ;;  %19436 = vst [vmem:[#allocation68_spill] sm:$0xff] %v16880_v48  ;;  %v16893_v45 = vsel %vm7070_vm6, %v7126_v52, %v7127_v5  ;;  %v7132_v29 = vrot.slane %v16469_v60, 2  ;;  %v16914_v60 = vld [vmem:[%s14396_s13 + $0x358] sm:$0xff] }
 0x208   : > { %v3361_v24 = vadd.f32 %v13300_v22, %v16749_v34  ;;  %v16901_v38 = vsel %vm3426_vm4, %v4474_v2, %v4476_v61  ;;  %v16911_v58 = vsel %vm7070_vm6, %v7127_v5, %v7129_v33  ;;  %v4481_v2 = vrot.slane %v16914_v60, 3  ;;  %v16930_v33 = vld [vmem:[%s14396_s13 + $0x378] sm:$0xff] }
 0x209   : > { %v3360_v1 = vadd.f32 %v13301_v56, %v16749_v34  ;;  %v12311_v41 = vpop.f32.mrb[10].mxu0  ;;  %12525 = vmatmul.mubr.msk.f32.gmra.mrb[52].mxu1 %vm596_vm2, %v16869_v26  ;;  %19437 = vst [vmem:[#allocation69_spill] sm:$0xff] %v16901_v38  ;;  %v7134_v61 = vrot.slane %v260_v42, 2  ;;  %v16923_v56 = vsel %vm3426_vm4, %v4478_v8, %v4479_v54  ;;  %v4484_v42 = vrot.slane %v16930_v33, 3 }
 0x20a   : > { %3394 = vst.msk [vmem:[%s16768_s27 + $0x48] sm:$0xff] %vm3384_vm7, %v3361_v24  ;;  %v13302_v52 = vadd.f32 %v12311_v41, %v16527_v62  ;;  %v3205_v22 = vpop.f32.mrb[11].mxu0  ;;  %12925 = vmatmul.mubr.msk.f32.gmra.mrb[52].mxu0 %vm596_vm2, %v16872_v3  ;;  %12527 = vmatprep.mubr.msk.f32.mxu1 %vm596_vm2, %v16880_v48  ;;  %19438 = vst [vmem:[#allocation36_spill] sm:$0xff] %v16923_v56  ;;  %v16926_v24 = vld [vmem:[%s14396_s13 + $0x370] sm:$0xff]  ;;  %v265_v41 = vld [vmem:[%s14396_s13 + $0x228] sm:$0x3] }
 0x20b   : > { %3393 = vst.msk [vmem:[%s16768_s27 + $0x40] sm:$0xff] %vm3384_vm7, %v3360_v1  ;;  %v13303_v62 = vadd.f32 %v3205_v22, %v16529_v16  ;;  %12927 = vmatprep.mubr.msk.f32.mxu0 %vm596_vm2, %v16893_v45  ;;  %19439 = vst [vmem:[#allocation37_spill] sm:$0xff] %v16926_v24  ;;  %v4483_v5 = vrot.slane %v16926_v24, 3  ;;  %v16936_v16 = vsel %vm7070_vm6, %v7131_v50, %v7132_v29  ;;  %v7136_v22 = vrot.slane %v16163_v4, 2 }
 0x20c   : > { %v3363_v1 = vadd.f32 %v13302_v52, %v16749_v34  ;;  %19440 = vst [vmem:[#allocation38_spill] sm:$0xff] %v16936_v16  ;;  %v7137_v8 = vrot.slane %v16493_v14, 2  ;;  %v4486_v52 = vrot.slane %v16944_v35, 3  ;;  %v16955_v14 = vsel %vm3426_vm4, %v4479_v54, %v4481_v2  ;;  %v16973_v2 = vld [vmem:[%s14396_s13 + $0x3a0] sm:$0xff] }
 0x20d   : > { %v3362_v48 = vadd.f32 %v13303_v62, %v16749_v34  ;;  %v12314_v26 = vpop.f32.mrb[12].mxu0  ;;  %12528 = vmatmul.mubr.msk.f32.gmra.mrb[54].mxu1 %vm596_vm2, %v16901_v38  ;;  %19441 = vst [vmem:[#allocation41_spill] sm:$0xff] %v16955_v14  ;;  %v16958_v62 = vsel %vm7070_vm6, %v7132_v29, %v7134_v61  ;;  %v7139_v38 = vrot.slane %v265_v41, 2  ;;  %v4489_v29 = vrot.slane %v16973_v2, 3  ;;  %v270_v61 = vld [vmem:[%s14396_s13 + $0x250] sm:$0x3] }
 0x20e   : > { %3396 = vst.msk [vmem:[%s16768_s27 + $0x58] sm:$0xff] %vm3384_vm7, %v3363_v1  ;;  %v13304_v50 = vadd.f32 %v12314_v26, %v16551_v30  ;;  %v3215_v4 = vpop.f32.mrb[13].mxu0  ;;  %12928 = vmatmul.mubr.msk.f32.gmra.mrb[54].mxu0 %vm596_vm2, %v16911_v58  ;;  %12530 = vmatprep.mubr.msk.f32.mxu1 %vm596_vm2, %v16923_v56  ;;  %19442 = vst [vmem:[#allocation58_spill] sm:$0xff] %v16958_v62  ;;  %v16966_v30 = vsel %vm3426_vm4, %v4483_v5, %v4484_v42  ;;  %v16969_v26 = vld [vmem:[%s14396_s13 + $0x398] sm:$0xff]  ;;  %v7141_v41 = vrot.slane %v16189_v9, 2  ;;  %v19446_v5 = vld [vmem:[#allocation83_spill] sm:$0xff] }
 0x20f   : > { %3395 = vst.msk [vmem:[%s16768_s27 + $0x50] sm:$0xff] %vm3384_vm7, %v3362_v48  ;;  %v13305_v1 = vadd.f32 %v3215_v4, %v16553_v51  ;;  %12930 = vmatprep.mubr.msk.f32.mxu0 %vm596_vm2, %v16936_v16  ;;  %19443 = vst [vmem:[#allocation59_spill] sm:$0xff] %v16966_v30  ;;  %v4488_v54 = vrot.slane %v16969_v26, 3  ;;  %v16979_v51 = vsel %vm7070_vm6, %v7136_v22, %v7137_v8  ;;  %v7142_v4 = vrot.slane %v19446_v5, 2  ;;  %v19449_v5 = vld [vmem:[#allocation19_spill] sm:$0xff] }
 0x210   : > { %19444 = vst [vmem:[#allocation61_spill] sm:$0xff] %v16969_v26  ;;  %v3365_v48 = vadd.f32 %v13304_v50, %v16749_v34  ;;  %19445 = vst [vmem:[#allocation62_spill] sm:$0xff] %v16979_v51  ;;  %v16987_v16 = vsel %vm3426_vm4, %v4484_v42, %v4486_v52  ;;  %v16997_v9 = vsel %vm7070_vm6, %v7137_v8, %v7139_v38  ;;  %v7144_v52 = vrot.slane %v270_v61, 2  ;;  %v17016_v8 = vld [vmem:[%s14396_s13 + $0x3c8] sm:$0xff] }
 0x211   : > { %v3364_v56 = vadd.f32 %v13305_v1, %v16749_v34  ;;  %v12317_v32 = vpop.f32.mrb[14].mxu0  ;;  %12531 = vmatmul.mubr.msk.f32.gmra.mrb[56].mxu1 %vm596_vm2, %v16955_v14  ;;  %19447 = vst [vmem:[#allocation10_spill] sm:$0xff] %v16987_v16  ;;  %v17000_v1 = vld [vmem:[%s14396_s13 + $0x3a8] sm:$0xff]  ;;  %v4494_v61 = vrot.slane %v17016_v8, 3  ;;  %v275_v14 = vld [vmem:[%s14396_s13 + $0x278] sm:$0x3] }
 0x212   : > { %3398 = vst.msk [vmem:[%s16768_s27 + $0x68] sm:$0xff] %vm3384_vm7, %v3365_v48  ;;  %v13306_v22 = vadd.f32 %v12317_v32, %v16572_v55  ;;  %v3225_v50 = vpop.f32.mrb[15].mxu0  ;;  %12931 = vmatmul.mubr.msk.f32.gmra.mrb[56].mxu0 %vm596_vm2, %v16958_v62  ;;  %12533 = vmatprep.mubr.msk.f32.mxu1 %vm596_vm2, %v16966_v30  ;;  %v4491_v42 = vrot.slane %v17000_v1, 3  ;;  %v17009_v32 = vsel %vm3426_vm4, %v4488_v54, %v4489_v29  ;;  %v17012_v48 = vld [vmem:[%s14396_s13 + $0x3c0] sm:$0xff]  ;;  %v19450_v30 = vld [vmem:[#allocation86_spill] sm:$0xff] }
 0x213   : > { %3397 = vst.msk [vmem:[%s16768_s27 + $0x60] sm:$0xff] %vm3384_vm7, %v3364_v56  ;;  %v13307_v55 = vadd.f32 %v3225_v50, %v16574_v20  ;;  %12933 = vmatprep.mubr.msk.f32.mxu0 %vm596_vm2, %v16979_v51  ;;  %19448 = vst [vmem:[#allocation12_spill] sm:$0xff] %v17009_v32  ;;  %v4493_v38 = vrot.slane %v17012_v48, 3  ;;  %v17021_v20 = vsel %vm7070_vm6, %v7141_v41, %v7142_v4  ;;  %v7146_v50 = vrot.slane %v19449_v5, 2  ;;  %v17040_v41 = vld [vmem:[%s14396_s13 + $0x3d0] sm:$0xff] }
 0x214   : > { %v3367_v56 = vadd.f32 %v13306_v22, %v16749_v34  ;;  %v7147_v54 = vrot.slane %v19450_v30, 2  ;;  %v17037_v30 = vsel %vm3426_vm4, %v4489_v29, %v4491_v42  ;;  %v7149_v29 = vrot.slane %v275_v14, 2  ;;  %v19456_v14 = vld [vmem:[#allocation64_spill] sm:$0xff] }
 0x215   : > { %v3366_v51 = vadd.f32 %v13307_v55, %v16749_v34  ;;  %v12320_v62 = vpop.f32.mrb[16].mxu0  ;;  %12534 = vmatmul.mubr.msk.f32.gmra.mrb[58].mxu1 %vm596_vm2, %v16987_v16  ;;  %19451 = vst [vmem:[#allocation17_spill] sm:$0xff] %v17037_v30  ;;  %v4496_v55 = vrot.slane %v17040_v41, 3  ;;  %v19493_v16 = vld [vmem:[#allocation54_spill] sm:$0xff] }
 0x216   : > { %3400 = vst.msk [vmem:[%s16768_s27 + $0x78] sm:$0xff] %vm3384_vm7, %v3367_v56  ;;  %v13308_v36 = vadd.f32 %v12320_v62, %v16593_v0  ;;  %v3235_v22 = vpop.f32.mrb[17].mxu0  ;;  %12934 = vmatmul.mubr.msk.f32.gmra.mrb[58].mxu0 %vm596_vm2, %v16997_v9  ;;  %12536 = vmatprep.mubr.msk.f32.mxu1 %vm596_vm2, %v17009_v32  ;;  %v17049_v0 = vsel %vm7070_vm6, %v7142_v4, %v7144_v52 }
 0x217   : > { %3399 = vst.msk [vmem:[%s16768_s27 + $0x70] sm:$0xff] %vm3384_vm7, %v3366_v51  ;;  %v13309_v56 = vadd.f32 %v3235_v22, %v16595_v10  ;;  %12936 = vmatprep.mubr.msk.f32.mxu0 %vm596_vm2, %v17021_v20  ;;  %v17052_v62 = vsel %vm3426_vm4, %v4493_v38, %v4494_v61  ;;  %v17056_v5 = vsel %vm7070_vm6, %v7146_v50, %v7147_v54  ;;  %v19454_v10 = vld [vmem:[#allocation90_spill] sm:$0xff] }
 0x218   : > { %19452 = vst [vmem:[#allocation43_spill] sm:$0xff] %v17052_v62  ;;  %v3369_v42 = vadd.f32 %v13308_v36, %v16749_v34  ;;  %19453 = vst [vmem:[#allocation47_spill] sm:$0xff] %v17056_v5  ;;  %v17069_v36 = vsel %vm3426_vm4, %v4494_v61, %v4496_v55  ;;  %v19458_v61 = vld [vmem:[#allocation15_spill] sm:$0xff] }
 0x219   : > { %v3368_v51 = vadd.f32 %v13309_v56, %v16749_v34  ;;  %v12323_v32 = vpop.f32.mrb[18].mxu0  ;;  %12537 = vmatmul.mubr.msk.f32.gmra.mrb[60].mxu1 %vm596_vm2, %v17037_v30  ;;  %19455 = vst [vmem:[#allocation48_spill] sm:$0xff] %v17069_v36  ;;  %v19491_v30 = vld [vmem:[#allocation52_spill] sm:$0xff] }
 0x21a   : > { %3402 = vst.msk [vmem:[%s16768_s27 + $0x88] sm:$0xff] %vm3384_vm7, %v3369_v42  ;;  %v13310_v4 = vadd.f32 %v12323_v32, %v19454_v10  ;;  %v3245_v52 = vpop.f32.mrb[19].mxu0  ;;  %12937 = vmatmul.mubr.msk.f32.gmra.mrb[60].mxu0 %vm596_vm2, %v17049_v0  ;;  %12539 = vmatprep.mubr.msk.f32.mxu1 %vm596_vm2, %v17052_v62  ;;  %v17077_v32 = vsel %vm7070_vm6, %v7147_v54, %v7149_v29  ;;  %v19459_v54 = vld [vmem:[#allocation9_spill] sm:$0xff]  ;;  %v19460_v29 = vld [vmem:[#allocation91_spill] sm:$0xff]  ;;  %v14177_v10 = vld [vmem:[%s14396_s13 + $0x168] sm:$0xff] }
 0x21b   : > { %3401 = vst.msk [vmem:[%s16768_s27 + $0x80] sm:$0xff] %vm3384_vm7, %v3368_v51  ;;  %v13311_v38 = vadd.f32 %v3245_v52, %v19456_v14  ;;  %12939 = vmatprep.mubr.msk.f32.mxu0 %vm596_vm2, %v17056_v5  ;;  %19457 = vst [vmem:[#allocation83_spill] sm:$0xff] %v17077_v32  ;;  %v19489_v62 = vld [vmem:[#allocation50_spill] sm:$0xff]  ;;  %v17298_v5 = vld [vmem:[%s18899_s1 + $0x40] sm:$0xf] }
 0x21c   : > { %v3371_v50 = vadd.f32 %v13310_v4, %v16749_v34 }
 0x21d   : > { %v3370_v22 = vadd.f32 %v13311_v38, %v16749_v34  ;;  %v12326_v56 = vpop.f32.mrb[20].mxu0  ;;  %12540 = vmatmul.mubr.msk.f32.gmra.mrb[62].mxu1 %vm596_vm2, %v17069_v36  ;;  %v19461_v38 = vld [vmem:[#allocation11_spill] sm:$0xff]  ;;  %v19486_v36 = vld [vmem:[#allocation44_spill] sm:$0xff] }
 0x21e   : > { %3404 = vst.msk [vmem:[%s16768_s27 + $0x98] sm:$0xff] %vm3384_vm7, %v3371_v50  ;;  %v13312_v55 = vadd.f32 %v12326_v56, %v19458_v61  ;;  %v3255_v42 = vpop.f32.mrb[21].mxu0  ;;  %12940 = vmatmul.mubr.msk.f32.gmra.mrb[62].mxu0 %vm596_vm2, %v17077_v32  ;;  %12544 = vmatprep.mubr.msk.f32.mxu1 %vm596_vm2, %v19459_v54  ;;  %v17102_v50 = vld [vmem:[%s18899_s1 + $0x3c] sm:$0xf]  ;;  %v14178_v61 = vld [vmem:[%s14396_s13 + $0x170] sm:$0xff]  ;;  %v19495_v32 = vld [vmem:[#allocation73_spill] sm:$0xff] }
 0x21f   : > { %3403 = vst.msk [vmem:[%s16768_s27 + $0x90] sm:$0xff] %vm3384_vm7, %v3370_v22  ;;  %v13313_v51 = vadd.f32 %v3255_v42, %v19460_v29  ;;  %12944 = vmatprep.mubr.msk.f32.mxu0 %vm596_vm2, %v14177_v10  ;;  %v14179_v29 = vld [vmem:[%s14396_s13 + $0x190] sm:$0xff] }
 0x220   : > { %v3373_v4 = vadd.f32 %v13312_v55, %v16749_v34  ;;  %v17114_v55 = vld [vmem:[%s18899_s1 + $0x5c] sm:$0xf] }
 0x221   : > { %v3372_v52 = vadd.f32 %v13313_v51, %v16749_v34  ;;  %v12329_v14 = vpop.f32.mrb[22].mxu0  ;;  %12545 = vmatmul.mubr.msk.f32.vlgmr.msra.gmra.mrb[32].mxu1 %vm596_vm2, %v19461_v38 }
 0x222   : > { %3406 = vst.msk [vmem:[%s16768_s27 + $0xa8] sm:$0xff] %vm3384_vm7, %v3373_v4  ;;  %v13314_v22 = vadd.f32 %v12329_v14, %v16646_v6  ;;  %v3265_v56 = vpop.f32.mrb[23].mxu0  ;;  %12593 = vmatpush3.msk.msra.mxu1 %vm661_vm0, %v16659_v53  ;;  %12945 = vmatmul.mubr.msk.f32.vlgmr.msra.gmra.mrb[32].mxu0 %vm596_vm2, %v14178_v61  ;;  %v19462_v6 = vld [vmem:[#allocation14_spill] sm:$0xff] }
 0x223   : > { %3405 = vst.msk [vmem:[%s16768_s27 + $0xa0] sm:$0xff] %vm3384_vm7, %v3372_v52  ;;  %v13315_v42 = vadd.f32 %v3265_v56, %v16651_v59  ;;  %12993 = vmatpush3.msk.msra.mxu0 %vm661_vm0, %v16667_v7  ;;  %12547 = vmatprep.mubr.msk.f32.mxu1 %vm596_vm2, %v19462_v6  ;;  %v19463_v59 = vld [vmem:[#allocation16_spill] sm:$0xff]  ;;  %v19464_v14 = vld [vmem:[#allocation18_spill] sm:$0xff] }
 0x224   : > { %v3375_v53 = vadd.f32 %v13314_v22, %v16749_v34  ;;  %12947 = vmatprep.mubr.msk.f32.mxu0 %vm596_vm2, %v14179_v29  ;;  %12642 = vmatprep.subr.msk.mxu1 %vm661_vm0, %v17102_v50  ;;  %v14180_v52 = vld [vmem:[%s14396_s13 + $0x198] sm:$0xff] }
 0x225   : > { %v3374_v51 = vadd.f32 %v13315_v42, %v16749_v34  ;;  %v12332_v10 = vpop.f32.mrb[24].mxu0  ;;  %12548 = vmatmul.mubr.msk.f32.gmra.mrb[34].mxu1 %vm596_vm2, %v19463_v59  ;;  %13042 = vmatprep.subr.msk.mxu0 %vm661_vm0, %v17114_v55  ;;  %v14181_v56 = vld [vmem:[%s14396_s13 + $0x1b8] sm:$0xff] }
 0x226   : > { %3408 = vst.msk [vmem:[%s16768_s27 + $0xb8] sm:$0xff] %vm3384_vm7, %v3375_v53  ;;  %v13316_v7 = vadd.f32 %v12332_v10, %v16674_v17  ;;  %v3275_v4 = vpop.f32.mrb[25].mxu0  ;;  %12948 = vmatmul.mubr.msk.f32.gmra.mrb[34].mxu0 %vm596_vm2, %v14180_v52  ;;  %12550 = vmatprep.mubr.msk.f32.mxu1 %vm596_vm2, %v19464_v14  ;;  %v19465_v53 = vld [vmem:[#allocation20_spill] sm:$0xff]  ;;  %v14182_v10 = vld [vmem:[%s14396_s13 + $0x1c0] sm:$0xff] }
 0x227   : > { %3407 = vst.msk [vmem:[%s16768_s27 + $0xb0] sm:$0xff] %vm3384_vm7, %v3374_v51  ;;  %v13317_v22 = vadd.f32 %v3275_v4, %v16683_v11  ;;  %12950 = vmatprep.mubr.msk.f32.mxu0 %vm596_vm2, %v14181_v56  ;;  %v19466_v11 = vld [vmem:[#allocation21_spill] sm:$0xff]  ;;  %v19467_v56 = vld [vmem:[#allocation22_spill] sm:$0xff] }
 0x228   : > { %v3377_v61 = vadd.f32 %v13316_v7, %v16749_v34  ;;  %v14183_v4 = vld [vmem:[%s14396_s13 + $0x1e0] sm:$0xff] }
 0x229   : > { %v3376_v17 = vadd.f32 %v13317_v22, %v16749_v34  ;;  %v12335_v42 = vpop.f32.mrb[26].mxu0  ;;  %12551 = vmatmul.mubr.msk.f32.gmra.mrb[36].mxu1 %vm596_vm2, %v19465_v53 }
 0x22a   : > { %3410 = vst.msk [vmem:[%s16768_s27 + $0xc8] sm:$0xff] %vm3384_vm7, %v3377_v61  ;;  %v13318_v29 = vadd.f32 %v12335_v42, %v16694_v28  ;;  %v3285_v51 = vpop.f32.mrb[27].mxu0  ;;  %12951 = vmatmul.mubr.msk.f32.gmra.mrb[36].mxu0 %vm596_vm2, %v14182_v10  ;;  %12553 = vmatprep.mubr.msk.f32.mxu1 %vm596_vm2, %v19466_v11  ;;  %v14184_v42 = vld [vmem:[%s14396_s13 + $0x1e8] sm:$0xff] }
 0x22b   : > { %3409 = vst.msk [vmem:[%s16768_s27 + $0xc0] sm:$0xff] %vm3384_vm7, %v3376_v17  ;;  %v13319_v7 = vadd.f32 %v3285_v51, %v16700_v63  ;;  %12953 = vmatprep.mubr.msk.f32.mxu0 %vm596_vm2, %v14183_v4  ;;  %v19468_v63 = vld [vmem:[#allocation23_spill] sm:$0xff]  ;;  %v14185_v51 = vld [vmem:[%s14396_s13 + $0x208] sm:$0xff]  ;;  %v19469_v4 = vld [vmem:[#allocation24_spill] sm:$0xff] }
 0x22c   : > { %v3379_v52 = vadd.f32 %v13318_v29, %v16749_v34 }
 0x22d   : > { %v3378_v28 = vadd.f32 %v13319_v7, %v16749_v34  ;;  %v12338_v22 = vpop.f32.mrb[28].mxu0  ;;  %12554 = vmatmul.mubr.msk.f32.gmra.mrb[38].mxu1 %vm596_vm2, %v19467_v56 }
 0x22e   : > { %3412 = vst.msk [vmem:[%s16768_s27 + $0xd8] sm:$0xff] %vm3384_vm7, %v3379_v52  ;;  %v13320_v61 = vadd.f32 %v12338_v22, %v16709_v25  ;;  %v3295_v17 = vpop.f32.mrb[29].mxu0  ;;  %12954 = vmatmul.mubr.msk.f32.gmra.mrb[38].mxu0 %vm596_vm2, %v14184_v42  ;;  %12556 = vmatprep.mubr.msk.f32.mxu1 %vm596_vm2, %v19468_v63  ;;  %v19470_v22 = vld [vmem:[#allocation25_spill] sm:$0xff]  ;;  %v14187_v42 = vld [vmem:[%s14396_s13 + $0x230] sm:$0xff] }
 0x22f   : > { %3411 = vst.msk [vmem:[%s16768_s27 + $0xd0] sm:$0xff] %vm3384_vm7, %v3378_v28  ;;  %v13321_v29 = vadd.f32 %v3295_v17, %v16715_v49  ;;  %12956 = vmatprep.mubr.msk.f32.mxu0 %vm596_vm2, %v14185_v51  ;;  %v14186_v49 = vld [vmem:[%s14396_s13 + $0x210] sm:$0xff]  ;;  %v19472_v51 = vld [vmem:[#allocation26_spill] sm:$0xff] }
 0x230   : > { %v3381_v10 = vadd.f32 %v13320_v61, %v16749_v34  ;;  %v19471_v61 = vld [vmem:[#allocation66_spill] sm:$0xff] }
 0x231   : > { %v3380_v25 = vadd.f32 %v13321_v29, %v16749_v34  ;;  %v12341_v7 = vpop.f32.mrb[30].mxu0  ;;  %12557 = vmatmul.mubr.msk.f32.gmra.mrb[40].mxu1 %vm596_vm2, %v19469_v4 }
 0x232   : > { %3414 = vst.msk [vmem:[%s16768_s27 + $0xe8] sm:$0xff] %vm3384_vm7, %v3381_v10  ;;  %v13322_v52 = vadd.f32 %v12341_v7, %v16724_v23  ;;  %v3305_v28 = vpop.f32.mrb[31].mxu0  ;;  %12957 = vmatmul.mubr.msk.f32.gmra.mrb[40].mxu0 %vm596_vm2, %v14186_v49  ;;  %12559 = vmatprep.mubr.msk.f32.mxu1 %vm596_vm2, %v19470_v22  ;;  %v14188_v10 = vld [vmem:[%s14396_s13 + $0x238] sm:$0xff]  ;;  %v14191_v49 = vld [vmem:[%s14396_s13 + $0x280] sm:$0xff] }
 0x233   : > { %3413 = vst.msk [vmem:[%s16768_s27 + $0xe0] sm:$0xff] %vm3384_vm7, %v3380_v25  ;;  %v13323_v17 = vadd.f32 %v3305_v28, %v19471_v61  ;;  %12959 = vmatprep.mubr.msk.f32.mxu0 %vm596_vm2, %v14187_v42  ;;  %v19473_v25 = vld [vmem:[#allocation27_spill] sm:$0xff]  ;;  %v14189_v7 = vld [vmem:[%s14396_s13 + $0x258] sm:$0xff]  ;;  %v19475_v28 = vld [vmem:[#allocation29_spill] sm:$0xff] }
 0x234   : > { %v3383_v23 = vadd.f32 %v13322_v52, %v16749_v34  ;;  %v14190_v52 = vld [vmem:[%s14396_s13 + $0x260] sm:$0xff]  ;;  %v19476_v61 = vld [vmem:[#allocation30_spill] sm:$0xff]  ;;  %v19477_v42 = vld [vmem:[#allocation31_spill] sm:$0xff] }
 0x235   : > { %v3382_v29 = vadd.f32 %v13323_v17, %v16749_v34  ;;  %12560 = vmatmul.mubr.msk.f32.gmra.mrb[42].mxu1 %vm596_vm2, %v19472_v51  ;;  %v19474_v34 = vld [vmem:[#allocation28_spill] sm:$0xff]  ;;  %v14192_v17 = vld [vmem:[%s14396_s13 + $0x288] sm:$0xff] }
 0x236   : > { %3416 = vst.msk [vmem:[%s16768_s27 + $0xf8] sm:$0xff] %vm3384_vm7, %v3383_v23  ;;  %12960 = vmatmul.mubr.msk.f32.gmra.mrb[42].mxu0 %vm596_vm2, %v14188_v10  ;;  %12562 = vmatprep.mubr.msk.f32.mxu1 %vm596_vm2, %v19473_v25  ;;  %v14193_v23 = vld [vmem:[%s14396_s13 + $0x2a8] sm:$0xff]  ;;  %v14194_v10 = vld [vmem:[%s14396_s13 + $0x2b0] sm:$0xff] }
 0x237   : > { %3415 = vst.msk [vmem:[%s16768_s27 + $0xf0] sm:$0xff] %vm3384_vm7, %v3382_v29  ;;  %12962 = vmatprep.mubr.msk.f32.mxu0 %vm596_vm2, %v14189_v7  ;;  %v19478_v29 = vld [vmem:[#allocation32_spill] sm:$0xff]  ;;  %v19479_v7 = vld [vmem:[#allocation33_spill] sm:$0xff] }
 0x239   : > { %12563 = vmatmul.mubr.msk.f32.gmra.mrb[44].mxu1 %vm596_vm2, %v19474_v34 }
 0x23a   : > { %12963 = vmatmul.mubr.msk.f32.gmra.mrb[44].mxu0 %vm596_vm2, %v14190_v52  ;;  %12565 = vmatprep.mubr.msk.f32.mxu1 %vm596_vm2, %v19475_v28  ;;  %v17230_v52 = vld [vmem:[%s14396_s13 + $0x2d0] sm:$0xff] }
 0x23b   : > { %12965 = vmatprep.mubr.msk.f32.mxu0 %vm596_vm2, %v14191_v49  ;;  %19480 = vst [vmem:[#allocation19_spill] sm:$0xff] %v17230_v52  ;;  %v19481_v49 = vld [vmem:[#allocation34_spill] sm:$0xff] }
 0x23d   : > { %12566 = vmatmul.mubr.msk.f32.gmra.mrb[46].mxu1 %vm596_vm2, %v19476_v61 }
 0x23e   : > { %12966 = vmatmul.mubr.msk.f32.gmra.mrb[46].mxu0 %vm596_vm2, %v14192_v17  ;;  %12568 = vmatprep.mubr.msk.f32.mxu1 %vm596_vm2, %v19477_v42  ;;  %v17237_v17 = vld [vmem:[%s14396_s13 + $0x2d8] sm:$0xff] }
 0x23f   : > { %12968 = vmatprep.mubr.msk.f32.mxu0 %vm596_vm2, %v14193_v23  ;;  %19482 = vst [vmem:[#allocation86_spill] sm:$0xff] %v17237_v17  ;;  %v19483_v23 = vld [vmem:[#allocation35_spill] sm:$0xff] }
 0x241   : > { %12569 = vmatmul.mubr.msk.f32.gmra.mrb[48].mxu1 %vm596_vm2, %v19478_v29 }
 0x242   : > { %12969 = vmatmul.mubr.msk.f32.gmra.mrb[48].mxu0 %vm596_vm2, %v14194_v10  ;;  %12571 = vmatprep.mubr.msk.f32.mxu1 %vm596_vm2, %v19479_v7  ;;  %v19484_v10 = vld [vmem:[#allocation39_spill] sm:$0xff] }
 0x243   : > { %12971 = vmatprep.mubr.msk.f32.mxu0 %vm596_vm2, %v17230_v52  ;;  %v19485_v52 = vld [vmem:[#allocation40_spill] sm:$0xff] }
 0x245   : > { %12572 = vmatmul.mubr.msk.f32.gmra.mrb[50].mxu1 %vm596_vm2, %v19481_v49 }
 0x246   : > { %12972 = vmatmul.mubr.msk.f32.gmra.mrb[50].mxu0 %vm596_vm2, %v17237_v17  ;;  %12574 = vmatprep.mubr.msk.f32.mxu1 %vm596_vm2, %v19483_v23  ;;  %v19487_v17 = vld [vmem:[#allocation45_spill] sm:$0xff] }
 0x247   : > { %12974 = vmatprep.mubr.msk.f32.mxu0 %vm596_vm2, %v16801_v13  ;;  %v19488_v13 = vld [vmem:[#allocation49_spill] sm:$0xff] }
 0x249   : > { %12575 = vmatmul.mubr.msk.f32.gmra.mrb[52].mxu1 %vm596_vm2, %v19484_v10 }
 0x24a   : > { %12975 = vmatmul.mubr.msk.f32.gmra.mrb[52].mxu0 %vm596_vm2, %v16805_v40  ;;  %12577 = vmatprep.mubr.msk.f32.mxu1 %vm596_vm2, %v19485_v52 }
 0x24b   : > { %12977 = vmatprep.mubr.msk.f32.mxu0 %vm596_vm2, %v16840_v27  ;;  %v19490_v27 = vld [vmem:[#allocation51_spill] sm:$0xff] }
 0x24d   : > { %12578 = vmatmul.mubr.msk.f32.gmra.mrb[54].mxu1 %vm596_vm2, %v19486_v36 }
 0x24e   : > { %12978 = vmatmul.mubr.msk.f32.gmra.mrb[54].mxu0 %vm596_vm2, %v16844_v39  ;;  %12580 = vmatprep.mubr.msk.f32.mxu1 %vm596_vm2, %v19487_v17 }
 0x24f   : > { %12980 = vmatprep.mubr.msk.f32.mxu0 %vm596_vm2, %v16883_v57  ;;  %v19492_v57 = vld [vmem:[#allocation53_spill] sm:$0xff] }
 0x251   : > { %12581 = vmatmul.mubr.msk.f32.gmra.mrb[56].mxu1 %vm596_vm2, %v19488_v13 }
 0x252   : > { %12981 = vmatmul.mubr.msk.f32.gmra.mrb[56].mxu0 %vm596_vm2, %v16887_v44  ;;  %12583 = vmatprep.mubr.msk.f32.mxu1 %vm596_vm2, %v19489_v62 }
 0x253   : > { %12983 = vmatprep.mubr.msk.f32.mxu0 %vm596_vm2, %v16926_v24  ;;  %v19494_v24 = vld [vmem:[#allocation55_spill] sm:$0xff] }
 0x255   : > { %12584 = vmatmul.mubr.msk.f32.gmra.mrb[58].mxu1 %vm596_vm2, %v19490_v27 }
 0x256   : > { %12984 = vmatmul.mubr.msk.f32.gmra.mrb[58].mxu0 %vm596_vm2, %v16930_v33  ;;  %12586 = vmatprep.mubr.msk.f32.mxu1 %vm596_vm2, %v19491_v30 }
 0x257   : > { %12986 = vmatprep.mubr.msk.f32.mxu0 %vm596_vm2, %v16969_v26  ;;  %v19496_v26 = vld [vmem:[#allocation74_spill] sm:$0xff] }
 0x259   : > { %12587 = vmatmul.mubr.msk.f32.gmra.mrb[60].mxu1 %vm596_vm2, %v19492_v57 }
 0x25a   : > { %12987 = vmatmul.mubr.msk.f32.gmra.mrb[60].mxu0 %vm596_vm2, %v16973_v2  ;;  %12589 = vmatprep.mubr.msk.f32.mxu1 %vm596_vm2, %v19493_v16 }
 0x25b   : > { %12989 = vmatprep.mubr.msk.f32.mxu0 %vm596_vm2, %v17012_v48 }
 0x25d   : > { %12590 = vmatmul.mubr.msk.f32.gmra.mrb[62].mxu1 %vm596_vm2, %v19494_v24 }
 0x25e   : > { %12990 = vmatmul.mubr.msk.f32.gmra.mrb[62].mxu0 %vm596_vm2, %v17016_v8  ;;  %12594 = vmatprep.mubr.msk.f32.mxu1 %vm596_vm2, %v19495_v32  ;;  %v17307_v32 = vld [vmem:[%s18899_s1 + $0x60] sm:$0xf] }
 0x25f   : > { %12994 = vmatprep.mubr.msk.f32.mxu0 %vm596_vm2, %v19459_v54 }
 0x261   : > { %12595 = vmatmul.mubr.msk.f32.vlgmr.msra.gmra.mrb[32].mxu1 %vm596_vm2, %v19496_v26  ;;  %v19497_v26 = vld [vmem:[#allocation75_spill] sm:$0xff] }
 0x262   : > { %12643 = vmatpush3.msk.msra.mxu1 %vm661_vm0, %v17102_v50  ;;  %12995 = vmatmul.mubr.msk.f32.vlgmr.msra.gmra.mrb[32].mxu0 %vm596_vm2, %v19461_v38  ;;  %v19498_v50 = vld [vmem:[#allocation76_spill] sm:$0xff]  ;;  %v19499_v38 = vld [vmem:[#allocation77_spill] sm:$0xff] }
 0x263   : > { %13043 = vmatpush3.msk.msra.mxu0 %vm661_vm0, %v17114_v55  ;;  %12597 = vmatprep.mubr.msk.f32.mxu1 %vm596_vm2, %v19497_v26  ;;  %v19500_v55 = vld [vmem:[#allocation78_spill] sm:$0xff]  ;;  %v19501_v26 = vld [vmem:[#allocation79_spill] sm:$0xff] }
 0x264   : > { %12997 = vmatprep.mubr.msk.f32.mxu0 %vm596_vm2, %v19462_v6  ;;  %12692 = vmatprep.subr.msk.mxu1 %vm661_vm0, %v17298_v5  ;;  %v19515_v6 = vld [vmem:[#allocation65_spill] sm:$0xff] }
 0x265   : > { %12598 = vmatmul.mubr.msk.f32.gmra.mrb[34].mxu1 %vm596_vm2, %v19498_v50  ;;  %13092 = vmatprep.subr.msk.mxu0 %vm661_vm0, %v17307_v32  ;;  %v19502_v50 = vld [vmem:[#allocation80_spill] sm:$0xff] }
 0x266   : > { %12998 = vmatmul.mubr.msk.f32.gmra.mrb[34].mxu0 %vm596_vm2, %v19463_v59  ;;  %12600 = vmatprep.mubr.msk.f32.mxu1 %vm596_vm2, %v19499_v38  ;;  %v19503_v38 = vld [vmem:[#allocation81_spill] sm:$0xff]  ;;  %v5052_v59 = vrot.slane %v16858_v31, 7 }
 0x267   : > { %13000 = vmatprep.mubr.msk.f32.mxu0 %vm596_vm2, %v19464_v14  ;;  %v5051_v14 = vrot.slane %v16844_v39, 7 }
 0x269   : > { %12601 = vmatmul.mubr.msk.f32.gmra.mrb[36].mxu1 %vm596_vm2, %v19500_v55  ;;  %v19504_v55 = vld [vmem:[#allocation82_spill] sm:$0xff]  ;;  %v17410_v39 = vsel %vm4061_vm5, %v5051_v14, %v5052_v59 }
 0x26a   : > { %13001 = vmatmul.mubr.msk.f32.gmra.mrb[36].mxu0 %vm596_vm2, %v19465_v53  ;;  %12603 = vmatprep.mubr.msk.f32.mxu1 %vm596_vm2, %v19501_v26  ;;  %v19505_v26 = vld [vmem:[#allocation84_spill] sm:$0xff]  ;;  %19517 = vst [vmem:[#allocation15_spill] sm:$0xff] %v17410_v39 }
 0x26b   : > { %13003 = vmatprep.mubr.msk.f32.mxu0 %vm596_vm2, %v19466_v11  ;;  %v17384_v11 = vld [vmem:[%s14396_s13 + $0x310] sm:$0xff] }
 0x26c   : > { %v5049_v53 = vrot.slane %v17384_v11, 7 }
 0x26d   : > { %12604 = vmatmul.mubr.msk.f32.gmra.mrb[38].mxu1 %vm596_vm2, %v19502_v50  ;;  %v19506_v50 = vld [vmem:[#allocation85_spill] sm:$0xff] }
 0x26e   : > { %13004 = vmatmul.mubr.msk.f32.gmra.mrb[38].mxu0 %vm596_vm2, %v19467_v56  ;;  %12606 = vmatprep.mubr.msk.f32.mxu1 %vm596_vm2, %v19503_v38  ;;  %v19507_v38 = vld [vmem:[#allocation87_spill] sm:$0xff] }
 0x26f   : > { %13006 = vmatprep.mubr.msk.f32.mxu0 %vm596_vm2, %v19468_v63  ;;  %v19512_v63 = vld [vmem:[#allocation89_spill] sm:$0xff]  ;;  %v19513_v56 = vld [vmem:[#allocation7_spill] sm:$0xff] }
 0x271   : > { %12607 = vmatmul.mubr.msk.f32.gmra.mrb[40].mxu1 %vm596_vm2, %v19504_v55  ;;  %v19508_v55 = vld [vmem:[#allocation88_spill] sm:$0xff] }
 0x272   : > { %13007 = vmatmul.mubr.msk.f32.gmra.mrb[40].mxu0 %vm596_vm2, %v19469_v4  ;;  %12609 = vmatprep.mubr.msk.f32.mxu1 %vm596_vm2, %v19505_v26  ;;  %v19509_v26 = vld [vmem:[#allocation57_spill] sm:$0xff]  ;;  %v5047_v4 = vrot.slane %v16828_v47, 7 }
 0x273   : > { %13009 = vmatprep.mubr.msk.f32.mxu0 %vm596_vm2, %v19470_v22  ;;  %v5046_v22 = vrot.slane %v16805_v40, 7 }
 0x274   : > { %v17401_v54 = vsel %vm4061_vm5, %v5047_v4, %v5049_v53 }
 0x275   : > { %12610 = vmatmul.mubr.msk.f32.gmra.mrb[42].mxu1 %vm596_vm2, %v19506_v50  ;;  %v19510_v50 = vld [vmem:[#allocation46_spill] sm:$0xff]  ;;  %v17390_v40 = vsel %vm4061_vm5, %v5046_v22, %v5047_v4  ;;  %19516 = vst [vmem:[#allocation64_spill] sm:$0xff] %v17401_v54  ;;  %v17424_v4 = vld [vmem:[%s14396_s13 + $0x360] sm:$0xff] }
 0x276   : > { %13010 = vmatmul.mubr.msk.f32.gmra.mrb[42].mxu0 %vm596_vm2, %v19472_v51  ;;  %12612 = vmatprep.mubr.msk.f32.mxu1 %vm596_vm2, %v19507_v38  ;;  %v19511_v51 = vld [vmem:[#allocation60_spill] sm:$0xff]  ;;  %19514 = vst [vmem:[#allocation90_spill] sm:$0xff] %v17390_v40  ;;  %v5059_v14 = vrot.slane %v17424_v4, 7 }
 0x277   : > { %13012 = vmatprep.mubr.msk.f32.mxu0 %vm596_vm2, %v19473_v25 }
 0x279   : > { %12613 = vmatmul.mubr.msk.f32.gmra.mrb[44].mxu1 %vm596_vm2, %v19508_v55 }
 0x27a   : > { %13013 = vmatmul.mubr.msk.f32.gmra.mrb[44].mxu0 %vm596_vm2, %v19474_v34  ;;  %12615 = vmatprep.mubr.msk.f32.mxu1 %vm596_vm2, %v19509_v26 }
 0x27b   : > { %13015 = vmatprep.mubr.msk.f32.mxu0 %vm596_vm2, %v19475_v28 }
 0x27d   : > { %12616 = vmatmul.mubr.msk.f32.gmra.mrb[46].mxu1 %vm596_vm2, %v19510_v50  ;;  %v5072_v50 = vrot.slane %v17040_v41, 7 }
 0x27e   : > { %13016 = vmatmul.mubr.msk.f32.gmra.mrb[46].mxu0 %vm596_vm2, %v19476_v61  ;;  %12618 = vmatprep.mubr.msk.f32.mxu1 %vm596_vm2, %v19511_v51  ;;  %v5067_v51 = vrot.slane %v17000_v1, 7 }
 0x27f   : > { %13018 = vmatprep.mubr.msk.f32.mxu0 %vm596_vm2, %v19477_v42 }
 0x281   : > { %12619 = vmatmul.mubr.msk.f32.gmra.mrb[48].mxu1 %vm596_vm2, %v19512_v63  ;;  %v5057_v63 = vrot.slane %v16914_v60, 7 }
 0x282   : > { %13019 = vmatmul.mubr.msk.f32.gmra.mrb[48].mxu0 %vm596_vm2, %v19478_v29  ;;  %12621 = vmatprep.mubr.msk.f32.mxu1 %vm596_vm2, %v19513_v56  ;;  %v17404_v56 = vld [vmem:[%s14396_s13 + $0x338] sm:$0xff] }
 0x283   : > { %13021 = vmatprep.mubr.msk.f32.mxu0 %vm596_vm2, %v19479_v7  ;;  %v5054_v22 = vrot.slane %v17404_v56, 7 }
 0x285   : > { %12622 = vmatmul.mubr.msk.f32.gmra.mrb[50].mxu1 %vm596_vm2, %v19515_v6  ;;  %v5056_v6 = vrot.slane %v16887_v44, 7  ;;  %v17421_v53 = vsel %vm4061_vm5, %v5052_v59, %v5054_v22  ;;  %v17441_v59 = vsel %vm4061_vm5, %v5057_v63, %v5059_v14  ;;  %v17444_v22 = vld [vmem:[%s14396_s13 + $0x388] sm:$0xff]  ;;  %v17464_v14 = vld [vmem:[%s14396_s13 + $0x3b0] sm:$0xff] }
 0x286   : > { %13022 = vmatmul.mubr.msk.f32.gmra.mrb[50].mxu0 %vm596_vm2, %v19481_v49  ;;  %12624 = vmatprep.mubr.msk.f32.mxu1 %vm596_vm2, %v17390_v40  ;;  %19518 = vst [vmem:[#allocation91_spill] sm:$0xff] %v17421_v53  ;;  %v5062_v40 = vrot.slane %v16944_v35, 7  ;;  %19520 = vst [vmem:[#allocation27_spill] sm:$0xff] %v17441_v59 }
 0x287   : > { %13024 = vmatprep.mubr.msk.f32.mxu0 %vm596_vm2, %v19483_v23  ;;  %v17430_v44 = vsel %vm4061_vm5, %v5056_v6, %v5057_v63  ;;  %v5064_v6 = vrot.slane %v17444_v22, 7 }
 0x288   : > { %19519 = vst [vmem:[#allocation66_spill] sm:$0xff] %v17430_v44 }
 0x289   : > { %12625 = vmatmul.mubr.msk.f32.gmra.mrb[52].mxu1 %vm596_vm2, %v17401_v54  ;;  %v5061_v54 = vrot.slane %v16930_v33, 7  ;;  %v17461_v63 = vsel %vm4061_vm5, %v5062_v40, %v5064_v6  ;;  %v17484_v6 = vld [vmem:[%s14396_s13 + $0x3d8] sm:$0xff] }
 0x28a   : > { %13025 = vmatmul.mubr.msk.f32.gmra.mrb[52].mxu0 %vm596_vm2, %v19484_v10  ;;  %12627 = vmatprep.mubr.msk.f32.mxu1 %vm596_vm2, %v17410_v39  ;;  %19522 = vst [vmem:[#allocation29_spill] sm:$0xff] %v17461_v63 }
 0x28b   : > { %13027 = vmatprep.mubr.msk.f32.mxu0 %vm596_vm2, %v19485_v52  ;;  %v17450_v39 = vsel %vm4061_vm5, %v5061_v54, %v5062_v40  ;;  %v5069_v54 = vrot.slane %v17464_v14, 7 }
 0x28c   : > { %19521 = vst [vmem:[#allocation28_spill] sm:$0xff] %v17450_v39 }
 0x28d   : > { %12628 = vmatmul.mubr.msk.f32.gmra.mrb[54].mxu1 %vm596_vm2, %v17421_v53  ;;  %v5066_v53 = vrot.slane %v16973_v2, 7  ;;  %v17481_v40 = vsel %vm4061_vm5, %v5067_v51, %v5069_v54  ;;  %v17525_v54 = vld [vmem:[%s18899_s1 + $0x64] sm:$0xf] }
 0x28e   : > { %13028 = vmatmul.mubr.msk.f32.gmra.mrb[54].mxu0 %vm596_vm2, %v19486_v36  ;;  %12630 = vmatprep.mubr.msk.f32.mxu1 %vm596_vm2, %v17430_v44  ;;  %19524 = vst [vmem:[#allocation31_spill] sm:$0xff] %v17481_v40 }
 0x28f   : > { %13030 = vmatprep.mubr.msk.f32.mxu0 %vm596_vm2, %v19487_v17  ;;  %v17470_v44 = vsel %vm4061_vm5, %v5066_v53, %v5067_v51  ;;  %v5074_v53 = vrot.slane %v17484_v6, 7 }
 0x290   : > { %19523 = vst [vmem:[#allocation30_spill] sm:$0xff] %v17470_v44 }
 0x291   : > { %12631 = vmatmul.mubr.msk.f32.gmra.mrb[56].mxu1 %vm596_vm2, %v17441_v59  ;;  %v5071_v59 = vrot.slane %v17016_v8, 7  ;;  %v17499_v51 = vsel %vm4061_vm5, %v5072_v50, %v5074_v53  ;;  %v19536_v53 = vld [vmem:[#allocation69_spill] sm:$0xff] }
 0x292   : > { %13031 = vmatmul.mubr.msk.f32.gmra.mrb[56].mxu0 %vm596_vm2, %v19488_v13  ;;  %12633 = vmatprep.mubr.msk.f32.mxu1 %vm596_vm2, %v17450_v39  ;;  %19526 = vst [vmem:[#allocation33_spill] sm:$0xff] %v17499_v51 }
 0x293   : > { %13033 = vmatprep.mubr.msk.f32.mxu0 %vm596_vm2, %v19489_v62  ;;  %v17490_v39 = vsel %vm4061_vm5, %v5071_v59, %v5072_v50  ;;  %v19527_v59 = vld [vmem:[#allocation42_spill] sm:$0xff]  ;;  %v17516_v50 = vld [vmem:[%s18899_s1 + $0x44] sm:$0xf] }
 0x294   : > { %19525 = vst [vmem:[#allocation32_spill] sm:$0xff] %v17490_v39 }
 0x295   : > { %12634 = vmatmul.mubr.msk.f32.gmra.mrb[58].mxu1 %vm596_vm2, %v17461_v63 }
 0x296   : > { %13034 = vmatmul.mubr.msk.f32.gmra.mrb[58].mxu0 %vm596_vm2, %v19490_v27  ;;  %12636 = vmatprep.mubr.msk.f32.mxu1 %vm596_vm2, %v17470_v44  ;;  %v17729_v44 = vld [vmem:[%s14396_s13 + $0x498] sm:$0xff] }
 0x297   : > { %13036 = vmatprep.mubr.msk.f32.mxu0 %vm596_vm2, %v19491_v30 }
 0x299   : > { %12637 = vmatmul.mubr.msk.f32.gmra.mrb[60].mxu1 %vm596_vm2, %v17481_v40 }
 0x29a   : > { %13037 = vmatmul.mubr.msk.f32.gmra.mrb[60].mxu0 %vm596_vm2, %v19492_v57  ;;  %12639 = vmatprep.mubr.msk.f32.mxu1 %vm596_vm2, %v17490_v39 }
 0x29b   : > { %13039 = vmatprep.mubr.msk.f32.mxu0 %vm596_vm2, %v19493_v16 }
 0x29d   : > { %12640 = vmatmul.mubr.msk.f32.gmra.mrb[62].mxu1 %vm596_vm2, %v17499_v51  ;;  %v17653_v51 = vld [vmem:[%s14396_s13 + $0x420] sm:$0xff] }
 0x29e   : > { %13040 = vmatmul.mubr.msk.f32.gmra.mrb[62].mxu0 %vm596_vm2, %v19494_v24  ;;  %12644 = vmatprep.mubr.msk.f32.mxu1 %vm596_vm2, %v19527_v59  ;;  %v19538_v59 = vld [vmem:[#allocation47_spill] sm:$0xff]  ;;  %19551 = vst [vmem:[#allocation44_spill] sm:$0xff] %v17653_v51 }
 0x29f   : > { %13044 = vmatprep.mubr.msk.f32.mxu0 %vm596_vm2, %v16811_v12  ;;  %v19532_v12 = vld [vmem:[#allocation67_spill] sm:$0xff] }
 0x2a1   : > { %12645 = vmatmul.mubr.msk.f32.vlgmr.msra.gmra.mrb[32].mxu1 %vm596_vm2, %v19430_v43  ;;  %v19530_v43 = vld [vmem:[#allocation72_spill] sm:$0xff] }
 0x2a2   : > { %12693 = vmatpush3.msk.msra.mxu1 %vm661_vm0, %v17298_v5  ;;  %13045 = vmatmul.mubr.msk.f32.vlgmr.msra.gmra.mrb[32].mxu0 %vm596_vm2, %v16825_v18  ;;  %v19534_v18 = vld [vmem:[#allocation70_spill] sm:$0xff] }
 0x2a3   : > { %13093 = vmatpush3.msk.msra.mxu0 %vm661_vm0, %v17307_v32  ;;  %12647 = vmatprep.mubr.msk.f32.mxu1 %vm596_vm2, %v16244_v21  ;;  %v19528_v21 = vld [vmem:[#allocation71_spill] sm:$0xff]  ;;  %v280_v32 = vld [vmem:[%s14396_s13 + $0x2a0] sm:$0x3] }
 0x2a4   : > { %13047 = vmatprep.mubr.msk.f32.mxu0 %vm596_vm2, %v16850_v37  ;;  %12742 = vmatprep.subr.msk.mxu1 %vm661_vm0, %v17516_v50  ;;  %v19535_v37 = vld [vmem:[#allocation68_spill] sm:$0xff] }
 0x2a5   : > { %12648 = vmatmul.mubr.msk.f32.gmra.mrb[34].mxu1 %vm596_vm2, %v16258_v46  ;;  %13142 = vmatprep.subr.msk.mxu0 %vm661_vm0, %v17525_v54  ;;  %v19529_v46 = vld [vmem:[#allocation38_spill] sm:$0xff] }
 0x2a6   : > { %13048 = vmatmul.mubr.msk.f32.gmra.mrb[34].mxu0 %vm596_vm2, %v16872_v3  ;;  %12650 = vmatprep.mubr.msk.f32.mxu1 %vm596_vm2, %v19431_v15  ;;  %v19531_v15 = vld [vmem:[#allocation58_spill] sm:$0xff]  ;;  %v14203_v3 = vld [vmem:[%s14396_s13 + $0x290] sm:$0xff] }
 0x2a7   : > { %13050 = vmatprep.mubr.msk.f32.mxu0 %vm596_vm2, %v16893_v45  ;;  %v8046_v45 = vrot.slane %v14203_v3, 2 }
 0x2a9   : > { %12651 = vmatmul.mubr.msk.f32.gmra.mrb[36].mxu1 %vm596_vm2, %v19432_v19  ;;  %v19533_v19 = vld [vmem:[#allocation62_spill] sm:$0xff] }
 0x2aa   : > { %13051 = vmatmul.mubr.msk.f32.gmra.mrb[36].mxu0 %vm596_vm2, %v16911_v58  ;;  %12653 = vmatprep.mubr.msk.f32.mxu1 %vm596_vm2, %v19528_v21  ;;  %v14204_v58 = vld [vmem:[%s14396_s13 + $0x298] sm:$0xff] }
 0x2ab   : > { %13053 = vmatprep.mubr.msk.f32.mxu0 %vm596_vm2, %v19529_v46  ;;  %v8047_v5 = vrot.slane %v14204_v58, 2  ;;  %v14205_v46 = vld [vmem:[%s14396_s13 + $0x2b8] sm:$0xff]  ;;  %v290_v58 = vld [vmem:[%s14396_s13 + $0x2f0] sm:$0x3] }
 0x2ad   : > { %12654 = vmatmul.mubr.msk.f32.gmra.mrb[38].mxu1 %vm596_vm2, %v19530_v43  ;;  %v8048_v21 = vsel %vm7070_vm6, %v8046_v45, %v8047_v5  ;;  %v8051_v43 = vrot.slane %v14205_v46, 2 }
 0x2ae   : > { %13054 = vmatmul.mubr.msk.f32.gmra.mrb[38].mxu0 %vm596_vm2, %v19531_v15  ;;  %12656 = vmatprep.mubr.msk.f32.mxu1 %vm596_vm2, %v19532_v12  ;;  %v14206_v15 = vld [vmem:[%s14396_s13 + $0x2c0] sm:$0xff] }
 0x2af   : > { %13056 = vmatprep.mubr.msk.f32.mxu0 %vm596_vm2, %v19533_v19  ;;  %v8052_v12 = vrot.slane %v14206_v15, 2  ;;  %v285_v19 = vld [vmem:[%s14396_s13 + $0x2c8] sm:$0x3] }
 0x2b0   : > { %v8054_v45 = vrot.slane %v285_v19, 2  ;;  %v19542_v15 = vld [vmem:[#allocation10_spill] sm:$0xff]  ;;  %v17608_v19 = vld [vmem:[%s14396_s13 + $0x3f0] sm:$0xff] }
 0x2b1   : > { %12657 = vmatmul.mubr.msk.f32.gmra.mrb[40].mxu1 %vm596_vm2, %v19534_v18  ;;  %v19539_v18 = vld [vmem:[#allocation41_spill] sm:$0xff] }
 0x2b2   : > { %13057 = vmatmul.mubr.msk.f32.gmra.mrb[40].mxu0 %vm596_vm2, %v16997_v9  ;;  %12659 = vmatprep.mubr.msk.f32.mxu1 %vm596_vm2, %v19535_v37  ;;  %v19537_v9 = vld [vmem:[#allocation36_spill] sm:$0xff]  ;;  %v19541_v37 = vld [vmem:[#allocation59_spill] sm:$0xff] }
 0x2b3   : > { %13059 = vmatprep.mubr.msk.f32.mxu0 %vm596_vm2, %v17021_v20  ;;  %v8049_v20 = vrot.slane %v280_v32, 2  ;;  %v8053_v32 = vsel %vm7070_vm6, %v8051_v43, %v8052_v12 }
 0x2b5   : > { %12660 = vmatmul.mubr.msk.f32.gmra.mrb[42].mxu1 %vm596_vm2, %v19536_v53  ;;  %v8050_v3 = vsel %vm7070_vm6, %v8047_v5, %v8049_v20  ;;  %v14207_v53 = vld [vmem:[%s14396_s13 + $0x2e0] sm:$0xff]  ;;  %v8059_v5 = vrot.slane %v290_v58, 2  ;;  %v8055_v20 = vsel %vm7070_vm6, %v8052_v12, %v8054_v45  ;;  %v8062_v58 = vrot.slane %v17384_v11, 2  ;;  %v19546_v45 = vld [vmem:[#allocation43_spill] sm:$0xff] }
 0x2b6   : > { %13060 = vmatmul.mubr.msk.f32.gmra.mrb[42].mxu0 %vm596_vm2, %v17049_v0  ;;  %12662 = vmatprep.mubr.msk.f32.mxu1 %vm596_vm2, %v19537_v9  ;;  %v19540_v0 = vld [vmem:[#allocation83_spill] sm:$0xff]  ;;  %v8056_v9 = vrot.slane %v14207_v53, 2  ;;  %v19545_v12 = vld [vmem:[#allocation17_spill] sm:$0xff] }
 0x2b7   : > { %13062 = vmatprep.mubr.msk.f32.mxu0 %vm596_vm2, %v19538_v59  ;;  %v14208_v59 = vld [vmem:[%s14396_s13 + $0x2e8] sm:$0xff] }
 0x2b8   : > { %v8057_v46 = vrot.slane %v14208_v59, 2  ;;  %v17626_v59 = vld [vmem:[%s14396_s13 + $0x3f8] sm:$0xff] }
 0x2b9   : > { %12663 = vmatmul.mubr.msk.f32.gmra.mrb[44].mxu1 %vm596_vm2, %v19539_v18  ;;  %v19543_v18 = vld [vmem:[#allocation12_spill] sm:$0xff]  ;;  %19548 = vst [vmem:[#allocation39_spill] sm:$0xff] %v17626_v59 }
 0x2ba   : > { %13063 = vmatmul.mubr.msk.f32.gmra.mrb[44].mxu0 %vm596_vm2, %v19540_v0  ;;  %12665 = vmatprep.mubr.msk.f32.mxu1 %vm596_vm2, %v19541_v37  ;;  %v5372_v0 = vrot.slane %v17608_v19, 3  ;;  %v17612_v37 = vsel %vm7070_vm6, %v8056_v9, %v8057_v46  ;;  %v17623_v53 = vsel %vm7070_vm6, %v8057_v46, %v8059_v5  ;;  %v5374_v9 = vrot.slane %v17626_v59, 3  ;;  %v300_v5 = vld [vmem:[%s14396_s13 + $0x340] sm:$0x3]  ;;  %v17700_v59 = vld [vmem:[%s14396_s13 + $0x470] sm:$0xff] }
 0x2bb   : > { %13065 = vmatprep.mubr.msk.f32.mxu0 %vm596_vm2, %v8048_v21  ;;  %v17604_v21 = vld [vmem:[%s14396_s13 + $0x3e8] sm:$0xff]  ;;  %19544 = vst [vmem:[#allocation34_spill] sm:$0xff] %v17612_v37  ;;  %19547 = vst [vmem:[#allocation35_spill] sm:$0xff] %v17623_v53 }
 0x2bc   : > { %v5371_v43 = vrot.slane %v17604_v21, 3 }
 0x2bd   : > { %12666 = vmatmul.mubr.msk.f32.gmra.mrb[46].mxu1 %vm596_vm2, %v19542_v15  ;;  %v17633_v15 = vld [vmem:[%s14396_s13 + $0x410] sm:$0xff] }
 0x2be   : > { %13066 = vmatmul.mubr.msk.f32.gmra.mrb[46].mxu0 %vm596_vm2, %v8050_v3  ;;  %12668 = vmatprep.mubr.msk.f32.mxu1 %vm596_vm2, %v19543_v18  ;;  %v8061_v3 = vrot.slane %v16828_v47, 2  ;;  %v5373_v47 = vsel %vm3426_vm4, %v5371_v43, %v5372_v0  ;;  %v5376_v18 = vrot.slane %v17633_v15, 3  ;;  %v19550_v43 = vld [vmem:[#allocation48_spill] sm:$0xff] }
 0x2bf   : > { %13068 = vmatprep.mubr.msk.f32.mxu0 %vm596_vm2, %v8053_v32  ;;  %v295_v32 = vld [vmem:[%s14396_s13 + $0x318] sm:$0x3] }
 0x2c0   : > { %v8064_v11 = vrot.slane %v295_v32, 2  ;;  %v5375_v32 = vsel %vm3426_vm4, %v5372_v0, %v5374_v9  ;;  %v17667_v0 = vld [vmem:[%s14396_s13 + $0x440] sm:$0xff] }
 0x2c1   : > { %12669 = vmatmul.mubr.msk.f32.gmra.mrb[48].mxu1 %vm596_vm2, %v19545_v12  ;;  %v17642_v12 = vsel %vm7070_vm6, %v8061_v3, %v8062_v58  ;;  %v5379_v3 = vrot.slane %v17653_v51, 3  ;;  %v5382_v9 = vrot.slane %v17667_v0, 3 }
 0x2c2   : > { %13069 = vmatmul.mubr.msk.f32.gmra.mrb[48].mxu0 %vm596_vm2, %v8055_v20  ;;  %12671 = vmatprep.mubr.msk.f32.mxu1 %vm596_vm2, %v19546_v45  ;;  %v17637_v20 = vld [vmem:[%s14396_s13 + $0x418] sm:$0xff]  ;;  %19549 = vst [vmem:[#allocation40_spill] sm:$0xff] %v17642_v12  ;;  %v8066_v45 = vrot.slane %v16858_v31, 2  ;;  %v8069_v31 = vrot.slane %v300_v5, 2  ;;  %v8071_v5 = vrot.slane %v16914_v60, 2 }
 0x2c3   : > { %13071 = vmatprep.mubr.msk.f32.mxu0 %vm596_vm2, %v17612_v37  ;;  %v5377_v46 = vrot.slane %v17637_v20, 3  ;;  %v8067_v37 = vrot.slane %v17404_v56, 2  ;;  %v17659_v56 = vsel %vm7070_vm6, %v8062_v58, %v8064_v11  ;;  %v305_v58 = vld [vmem:[%s14396_s13 + $0x368] sm:$0x3]  ;;  %v17677_v11 = vld [vmem:[%s14396_s13 + $0x460] sm:$0xff] }
 0x2c4   : > { %19552 = vst [vmem:[#allocation45_spill] sm:$0xff] %v17659_v56  ;;  %v8074_v40 = vrot.slane %v305_v58, 2 }
 0x2c5   : > { %12672 = vmatmul.mubr.msk.f32.gmra.mrb[50].mxu1 %vm596_vm2, %v19550_v43  ;;  %v5378_v43 = vsel %vm3426_vm4, %v5376_v18, %v5377_v46  ;;  %v17671_v51 = vsel %vm7070_vm6, %v8066_v45, %v8067_v37  ;;  %v17680_v18 = vld [vmem:[%s14396_s13 + $0x468] sm:$0xff]  ;;  %v5380_v60 = vsel %vm3426_vm4, %v5377_v46, %v5379_v3  ;;  %v310_v46 = vld [vmem:[%s14396_s13 + $0x390] sm:$0x3]  ;;  %v8076_v3 = vrot.slane %v16944_v35, 2 }
 0x2c6   : > { %13072 = vmatmul.mubr.msk.f32.gmra.mrb[50].mxu0 %vm596_vm2, %v17623_v53  ;;  %12674 = vmatprep.mubr.msk.f32.mxu1 %vm596_vm2, %v5373_v47  ;;  %v17663_v53 = vld [vmem:[%s14396_s13 + $0x438] sm:$0xff]  ;;  %19553 = vst [vmem:[#allocation49_spill] sm:$0xff] %v17671_v51  ;;  %v17691_v45 = vld [vmem:[%s14396_s13 + $0x448] sm:$0xff]  ;;  %v5389_v35 = vrot.slane %v17700_v59, 3 }
 0x2c7   : > { %13074 = vmatprep.mubr.msk.f32.mxu0 %vm596_vm2, %v17642_v12  ;;  %v5381_v47 = vrot.slane %v17663_v53, 3  ;;  %v8072_v12 = vrot.slane %v17424_v4, 2  ;;  %v17688_v4 = vsel %vm7070_vm6, %v8067_v37, %v8069_v31  ;;  %19555 = vst [vmem:[#allocation51_spill] sm:$0xff] %v17691_v45  ;;  %v5384_v39 = vrot.slane %v17691_v45, 3  ;;  %v17709_v45 = vld [vmem:[%s14396_s13 + $0x488] sm:$0xff] }
 0x2c8   : > { %19554 = vst [vmem:[#allocation50_spill] sm:$0xff] %v17688_v4  ;;  %v8077_v31 = vrot.slane %v17444_v22, 2 }
 0x2c9   : > { %12675 = vmatmul.mubr.msk.f32.gmra.mrb[52].mxu1 %vm596_vm2, %v5375_v32  ;;  %v5383_v32 = vsel %vm3426_vm4, %v5381_v47, %v5382_v9  ;;  %v17704_v37 = vsel %vm7070_vm6, %v8071_v5, %v8072_v12  ;;  %v5385_v47 = vsel %vm3426_vm4, %v5382_v9, %v5384_v39  ;;  %v8079_v5 = vrot.slane %v310_v46, 2  ;;  %v315_v46 = vld [vmem:[%s14396_s13 + $0x3b8] sm:$0x3] }
 0x2ca   : > { %13075 = vmatmul.mubr.msk.f32.gmra.mrb[52].mxu0 %vm596_vm2, %v17659_v56  ;;  %12677 = vmatprep.mubr.msk.f32.mxu1 %vm596_vm2, %v5378_v43  ;;  %v5386_v56 = vrot.slane %v17677_v11, 3  ;;  %v5387_v43 = vrot.slane %v17680_v18, 3  ;;  %19556 = vst [vmem:[#allocation52_spill] sm:$0xff] %v17704_v37  ;;  %v17723_v22 = vsel %vm7070_vm6, %v8072_v12, %v8074_v40  ;;  %v8081_v39 = vrot.slane %v17000_v1, 2  ;;  %v17741_v40 = vld [vmem:[%s14396_s13 + $0x4b8] sm:$0xff] }
 0x2cb   : > { %13077 = vmatprep.mubr.msk.f32.mxu0 %vm596_vm2, %v17671_v51  ;;  %v17712_v51 = vld [vmem:[%s14396_s13 + $0x490] sm:$0xff]  ;;  %19557 = vst [vmem:[#allocation53_spill] sm:$0xff] %v17723_v22  ;;  %v8082_v9 = vrot.slane %v17464_v14, 2  ;;  %v17749_v1 = vsel %vm7070_vm6, %v8077_v31, %v8079_v5  ;;  %v5394_v14 = vrot.slane %v17729_v44, 3  ;;  %v5397_v63 = vrot.slane %v17741_v40, 3 }
 0x2cc   : > { %v5388_v58 = vsel %vm3426_vm4, %v5386_v56, %v5387_v43  ;;  %v5390_v12 = vsel %vm3426_vm4, %v5387_v43, %v5389_v35  ;;  %v8086_v43 = vrot.slane %v17040_v41, 2  ;;  %v320_v35 = vld [vmem:[%s14396_s13 + $0x3e0] sm:$0x3] }
 0x2cd   : > { %12678 = vmatmul.mubr.msk.f32.gmra.mrb[54].mxu1 %vm596_vm2, %v5380_v60  ;;  %v5391_v60 = vrot.slane %v17709_v45, 3 }
 0x2ce   : > { %13078 = vmatmul.mubr.msk.f32.gmra.mrb[54].mxu0 %vm596_vm2, %v17688_v4  ;;  %12680 = vmatprep.mubr.msk.f32.mxu1 %vm596_vm2, %v5383_v32  ;;  %v5392_v4 = vrot.slane %v17712_v51, 3  ;;  %v17732_v32 = vsel %vm7070_vm6, %v8076_v3, %v8077_v31  ;;  %v8084_v3 = vrot.slane %v315_v46, 2  ;;  %v8087_v31 = vrot.slane %v17484_v6, 2 }
 0x2cf   : > { %13080 = vmatprep.mubr.msk.f32.mxu0 %vm596_vm2, %v17704_v37  ;;  %v17738_v37 = vld [vmem:[%s14396_s13 + $0x4b0] sm:$0xff]  ;;  %v8089_v6 = vrot.slane %v320_v35, 2  ;;  %v19560_v35 = vld [vmem:[#allocation37_spill] sm:$0xff] }
 0x2d0   : > { %v5393_v56 = vsel %vm3426_vm4, %v5391_v60, %v5392_v4  ;;  %v5395_v5 = vsel %vm3426_vm4, %v5392_v4, %v5394_v14  ;;  %v17779_v46 = vsel %vm7070_vm6, %v8086_v43, %v8087_v31  ;;  %v19559_v14 = vld [vmem:[#allocation86_spill] sm:$0xff] }
 0x2d1   : > { %12681 = vmatmul.mubr.msk.f32.gmra.mrb[56].mxu1 %vm596_vm2, %v5385_v47  ;;  %v5396_v47 = vrot.slane %v17738_v37, 3  ;;  %v14222_v43 = vld [vmem:[%s14396_s13 + $0x348] sm:$0xff] }
 0x2d2   : > { %13081 = vmatmul.mubr.msk.f32.gmra.mrb[56].mxu0 %vm596_vm2, %v17723_v22  ;;  %12683 = vmatprep.mubr.msk.f32.mxu1 %vm596_vm2, %v5388_v58  ;;  %v17758_v22 = vld [vmem:[%s14396_s13 + $0x4c0] sm:$0xff]  ;;  %v17761_v58 = vsel %vm7070_vm6, %v8081_v39, %v8082_v9  ;;  %v17775_v39 = vsel %vm7070_vm6, %v8082_v9, %v8084_v3  ;;  %v17789_v9 = vsel %vm7070_vm6, %v8087_v31, %v8089_v6  ;;  %v14218_v3 = vld [vmem:[%s14396_s13 + $0x2f8] sm:$0xff]  ;;  %v14223_v31 = vld [vmem:[%s14396_s13 + $0x350] sm:$0xff]  ;;  %v5695_v6 = vrot.slane %v17712_v51, 1 }
 0x2d3   : > { %13083 = vmatprep.mubr.msk.f32.mxu0 %vm596_vm2, %v17732_v32  ;;  %v5399_v60 = vrot.slane %v17758_v22, 3  ;;  %v5398_v41 = vsel %vm3426_vm4, %v5396_v47, %v5397_v63  ;;  %v14221_v47 = vld [vmem:[%s14396_s13 + $0x328] sm:$0xff] }
 0x2d5   : > { %12684 = vmatmul.mubr.msk.f32.gmra.mrb[58].mxu1 %vm596_vm2, %v5390_v12  ;;  %v5400_v4 = vsel %vm3426_vm4, %v5397_v63, %v5399_v60  ;;  %v19558_v12 = vld [vmem:[#allocation19_spill] sm:$0xff]  ;;  %v17803_v63 = vld [vmem:[%s18899_s1 + $0x68] sm:$0xf]  ;;  %v19566_v60 = vld [vmem:[#allocation56_spill] sm:$0xff] }
 0x2d6   : > { %13084 = vmatmul.mubr.msk.f32.gmra.mrb[58].mxu0 %vm596_vm2, %v17749_v1  ;;  %12686 = vmatprep.mubr.msk.f32.mxu1 %vm596_vm2, %v5393_v56  ;;  %v17812_v56 = vld [vmem:[%s18900_s2] sm:$0xf] }
 0x2d7   : > { %13086 = vmatprep.mubr.msk.f32.mxu0 %vm596_vm2, %v17761_v58 }
 0x2d9   : > { %12687 = vmatmul.mubr.msk.f32.gmra.mrb[60].mxu1 %vm596_vm2, %v5395_v5  ;;  %v19561_v5 = vld [vmem:[#allocation61_spill] sm:$0xff] }
 0x2da   : > { %13087 = vmatmul.mubr.msk.f32.gmra.mrb[60].mxu0 %vm596_vm2, %v17775_v39  ;;  %12689 = vmatprep.mubr.msk.f32.mxu1 %vm596_vm2, %v5398_v41 }
 0x2db   : > { %13089 = vmatprep.mubr.msk.f32.mxu0 %vm596_vm2, %v17779_v46 }
 0x2dd   : > { %12690 = vmatmul.mubr.msk.f32.gmra.mrb[62].mxu1 %vm596_vm2, %v5400_v4  ;;  %v5696_v4 = vrot.slane %v17729_v44, 1 }
 0x2de   : > { %13090 = vmatmul.mubr.msk.f32.gmra.mrb[62].mxu0 %vm596_vm2, %v17789_v9  ;;  %12694 = vmatprep.mubr.msk.f32.mxu1 %vm596_vm2, %v19473_v25 }
 0x2df   : > { %13094 = vmatprep.mubr.msk.f32.mxu0 %vm596_vm2, %v19558_v12  ;;  %v17927_v12 = vld [vmem:[%s14396_s13 + $0x4a0] sm:$0xff] }
 0x2e1   : > { %12695 = vmatmul.mubr.msk.f32.vlgmr.msra.gmra.mrb[32].mxu1 %vm596_vm2, %v19474_v34 }
 0x2e2   : > { %12743 = vmatpush3.msk.msra.mxu1 %vm661_vm0, %v17516_v50  ;;  %13095 = vmatmul.mubr.msk.f32.vlgmr.msra.gmra.mrb[32].mxu0 %vm596_vm2, %v19559_v14  ;;  %v14219_v50 = vld [vmem:[%s14396_s13 + $0x300] sm:$0xff]  ;;  %v351_v14 = vld [vmem:[%s14396_s13 + $0x4d8] sm:$0xff] }
 0x2e3   : > { %13143 = vmatpush3.msk.msra.mxu0 %vm661_vm0, %v17525_v54  ;;  %12697 = vmatprep.mubr.msk.f32.mxu1 %vm596_vm2, %v19475_v28  ;;  %v14220_v54 = vld [vmem:[%s14396_s13 + $0x320] sm:$0xff] }
 0x2e4   : > { %13097 = vmatprep.mubr.msk.f32.mxu0 %vm596_vm2, %v14218_v3  ;;  %13192 = vmatprep.subr.msk.mxu0 %vm661_vm0, %v17803_v63  ;;  %v19567_v3 = vld [vmem:[#allocation63_spill] sm:$0xff] }
 0x2e5   : > { %12698 = vmatmul.mubr.msk.f32.gmra.mrb[34].mxu1 %vm596_vm2, %v19476_v61  ;;  %13242 = vmatprep.subr.msk.mxu1 %vm661_vm0, %v17812_v56 }
 0x2e6   : > { %13098 = vmatmul.mubr.msk.f32.gmra.mrb[34].mxu0 %vm596_vm2, %v14219_v50  ;;  %12700 = vmatprep.mubr.msk.f32.mxu1 %vm596_vm2, %v19477_v42  ;;  %v5698_v50 = vrot.slane %v17927_v12, 1 }
 0x2e7   : > { %13100 = vmatprep.mubr.msk.f32.mxu0 %vm596_vm2, %v14220_v54  ;;  %v17942_v54 = vld [vmem:[%s14396_s13 + $0x4e0] sm:$0xff] }
 0x2e9   : > { %12701 = vmatmul.mubr.msk.f32.gmra.mrb[36].mxu1 %vm596_vm2, %v19478_v29 }
 0x2ea   : > { %13101 = vmatmul.mubr.msk.f32.gmra.mrb[36].mxu0 %vm596_vm2, %v14221_v47  ;;  %12703 = vmatprep.mubr.msk.f32.mxu1 %vm596_vm2, %v19479_v7  ;;  %v17945_v47 = vsel %vm513_vm1, %v5695_v6, %v5696_v4 }
 0x2eb   : > { %13103 = vmatprep.mubr.msk.f32.mxu0 %vm596_vm2, %v14222_v43  ;;  %v5700_v43 = vrot.slane %v17741_v40, 1 }
 0x2ed   : > { %12704 = vmatmul.mubr.msk.f32.gmra.mrb[38].mxu1 %vm596_vm2, %v19481_v49 }
 0x2ee   : > { %13104 = vmatmul.mubr.msk.f32.gmra.mrb[38].mxu0 %vm596_vm2, %v14223_v31  ;;  %12706 = vmatprep.mubr.msk.f32.mxu1 %vm596_vm2, %v19483_v23  ;;  %v5701_v31 = vrot.slane %v17758_v22, 1 }
 0x2ef   : > { %13106 = vmatprep.mubr.msk.f32.mxu0 %vm596_vm2, %v19560_v35  ;;  %v17950_v35 = vld [vmem:[%s14396_s13 + $0x4c8] sm:$0xff] }
 0x2f0   : > { %v17968_v6 = vsel %vm513_vm1, %v5700_v43, %v5701_v31  ;;  %v19574_v43 = vld [vmem:[#allocation64_spill] sm:$0xff] }
 0x2f1   : > { %12707 = vmatmul.mubr.msk.f32.gmra.mrb[40].mxu1 %vm596_vm2, %v19484_v10 }
 0x2f2   : > { %13107 = vmatmul.mubr.msk.f32.gmra.mrb[40].mxu0 %vm596_vm2, %v16930_v33  ;;  %12709 = vmatprep.mubr.msk.f32.mxu1 %vm596_vm2, %v19485_v52  ;;  %v14224_v33 = vld [vmem:[%s18901_s3] ss:$0 sm:$0xff] }
 0x2f3   : > { %13109 = vmatprep.mubr.msk.f32.mxu0 %vm596_vm2, %v19561_v5  ;;  %6295 = vrot.lane.b32.xlu0 %v14224_v33, %s14292_s6  ;;  %v356_v5 = vld [vmem:[%s14396_s13 + $0x500] sm:$0xff] }
 0x2f4   : > { %9340 = vrot.lane.b32.xlu1 %v14224_v33, %s14293_s7 }
 0x2f5   : > { %12710 = vmatmul.mubr.msk.f32.gmra.mrb[42].mxu1 %vm596_vm2, %v19486_v36 }
 0x2f6   : > { %13110 = vmatmul.mubr.msk.f32.gmra.mrb[42].mxu0 %vm596_vm2, %v16973_v2  ;;  %12712 = vmatprep.mubr.msk.f32.mxu1 %vm596_vm2, %v19487_v17  ;;  %v19562_v2 = vld [vmem:[#allocation5_spill] sm:$0xff] }
 0x2f7   : > { %13112 = vmatprep.mubr.msk.f32.mxu0 %vm596_vm2, %v17012_v48  ;;  %v19563_v48 = vld [vmem:[#allocation6_spill] sm:$0xff]  ;;  %9537 = vrot.lane.b32.xlu0 %v14224_v33, %s14294_s8 }
 0x2f8   : > { %v19573_v33 = vld [vmem:[#allocation90_spill] sm:$0xff] }
 0x2f9   : > { %12713 = vmatmul.mubr.msk.f32.gmra.mrb[44].mxu1 %vm596_vm2, %v19488_v13 }
 0x2fa   : > { %13113 = vmatmul.mubr.msk.f32.gmra.mrb[44].mxu0 %vm596_vm2, %v17016_v8  ;;  %12715 = vmatprep.mubr.msk.f32.mxu1 %vm596_vm2, %v19489_v62  ;;  %v19564_v8 = vld [vmem:[#allocation8_spill] sm:$0xff] }
 0x2fb   : > { %13115 = vmatprep.mubr.msk.f32.mxu0 %vm596_vm2, %v17604_v21  ;;  %v5690_v21 = vrot.slane %v17680_v18, 1 }
 0x2fd   : > { %12716 = vmatmul.mubr.msk.f32.gmra.mrb[46].mxu1 %vm596_vm2, %v19490_v27 }
 0x2fe   : > { %13116 = vmatmul.mubr.msk.f32.gmra.mrb[46].mxu0 %vm596_vm2, %v17608_v19  ;;  %12718 = vmatprep.mubr.msk.f32.mxu1 %vm596_vm2, %v19491_v30 }
 0x2ff   : > { %13118 = vmatprep.mubr.msk.f32.mxu0 %vm596_vm2, %v17633_v15  ;;  %v17910_v15 = vld [vmem:[%s14396_s13 + $0x478] sm:$0xff] }
 0x300   : > { %v5693_v41 = vrot.slane %v17910_v15, 1 }
 0x301   : > { %12719 = vmatmul.mubr.msk.f32.gmra.mrb[48].mxu1 %vm596_vm2, %v19492_v57 }
 0x302   : > { %13119 = vmatmul.mubr.msk.f32.gmra.mrb[48].mxu0 %vm596_vm2, %v17637_v20  ;;  %12721 = vmatprep.mubr.msk.f32.mxu1 %vm596_vm2, %v19493_v16 }
 0x303   : > { %13121 = vmatprep.mubr.msk.f32.mxu0 %vm596_vm2, %v17663_v53  ;;  %v5691_v53 = vrot.slane %v17700_v59, 1 }
 0x305   : > { %12722 = vmatmul.mubr.msk.f32.gmra.mrb[50].mxu1 %vm596_vm2, %v19494_v24 }
 0x306   : > { %13122 = vmatmul.mubr.msk.f32.gmra.mrb[50].mxu0 %vm596_vm2, %v17667_v0  ;;  %12724 = vmatprep.mubr.msk.f32.mxu1 %vm596_vm2, %v19562_v2 }
 0x307   : > { %13124 = vmatprep.mubr.msk.f32.mxu0 %vm596_vm2, %v17677_v11  ;;  %v19565_v11 = vld [vmem:[#allocation13_spill] sm:$0xff] }
 0x309   : > { %12725 = vmatmul.mubr.msk.f32.gmra.mrb[52].mxu1 %vm596_vm2, %v19563_v48 }
 0x30a   : > { %13125 = vmatmul.mubr.msk.f32.gmra.mrb[52].mxu0 %vm596_vm2, %v17680_v18  ;;  %12727 = vmatprep.mubr.msk.f32.mxu1 %vm596_vm2, %v19564_v8 }
 0x30b   : > { %13127 = vmatprep.mubr.msk.f32.mxu0 %vm596_vm2, %v17709_v45  ;;  %v17922_v45 = vsel %vm513_vm1, %v5690_v21, %v5691_v53  ;;  %v17960_v21 = vsel %vm513_vm1, %v5696_v4, %v5698_v50  ;;  %v17982_v50 = vld [vmem:[%s14396_s13 + $0x530] sm:$0xff] }
 0x30d   : > { %12728 = vmatmul.mubr.msk.f32.gmra.mrb[54].mxu1 %vm596_vm2, %v19565_v11 }
 0x30e   : > { %13128 = vmatmul.mubr.msk.f32.gmra.mrb[54].mxu0 %vm596_vm2, %v17712_v51  ;;  %12730 = vmatprep.mubr.msk.f32.mxu1 %vm596_vm2, %v19566_v60 }
 0x30f   : > { %13130 = vmatprep.mubr.msk.f32.mxu0 %vm596_vm2, %v17738_v37  ;;  %v17937_v37 = vsel %vm513_vm1, %v5691_v53, %v5693_v41  ;;  %v5703_v53 = vrot.slane %v17950_v35, 1  ;;  %v17965_v41 = vld [vmem:[%s14396_s13 + $0x508] sm:$0xff] }
 0x311   : > { %12731 = vmatmul.mubr.msk.f32.gmra.mrb[56].mxu1 %vm596_vm2, %v19567_v3  ;;  %v17978_v4 = vsel %vm513_vm1, %v5701_v31, %v5703_v53  ;;  %v19575_v31 = vld [vmem:[#allocation15_spill] sm:$0xff]  ;;  %v19577_v53 = vld [vmem:[#allocation66_spill] sm:$0xff] }
 0x312   : > { %13131 = vmatmul.mubr.msk.f32.gmra.mrb[56].mxu0 %vm596_vm2, %v17741_v40  ;;  %12733 = vmatprep.mubr.msk.f32.mxu1 %vm596_vm2, %v17922_v45 }
 0x313   : > { %13133 = vmatprep.mubr.msk.f32.mxu0 %vm596_vm2, %v351_v14  ;;  %v361_v14 = vld [vmem:[%s14396_s13 + $0x528] sm:$0xff] }
 0x315   : > { %12734 = vmatmul.mubr.msk.f32.gmra.mrb[58].mxu1 %vm596_vm2, %v17937_v37 }
 0x316   : > { %13134 = vmatmul.mubr.msk.f32.gmra.mrb[58].mxu0 %vm596_vm2, %v17942_v54  ;;  %12736 = vmatprep.mubr.msk.f32.mxu1 %vm596_vm2, %v17945_v47 }
 0x317   : > { %13136 = vmatprep.mubr.msk.f32.mxu0 %vm596_vm2, %v356_v5  ;;  %v19576_v5 = vld [vmem:[#allocation91_spill] sm:$0xff] }
 0x319   : > { %12737 = vmatmul.mubr.msk.f32.gmra.mrb[60].mxu1 %vm596_vm2, %v17960_v21 }
 0x31a   : > { %13137 = vmatmul.mubr.msk.f32.gmra.mrb[60].mxu0 %vm596_vm2, %v17965_v41  ;;  %12739 = vmatprep.mubr.msk.f32.mxu1 %vm596_vm2, %v17968_v6 }
 0x31b   : > { %13139 = vmatprep.mubr.msk.f32.mxu0 %vm596_vm2, %v361_v14  ;;  %v19578_v14 = vld [vmem:[#allocation27_spill] sm:$0xff] }
 0x31d   : > { %12740 = vmatmul.mubr.msk.f32.gmra.mrb[62].mxu1 %vm596_vm2, %v17978_v4 }
 0x31e   : > { %13140 = vmatmul.mubr.msk.f32.gmra.mrb[62].mxu0 %vm596_vm2, %v17982_v50  ;;  %12744 = vmatprep.mubr.msk.f32.mxu1 %vm596_vm2, %v19507_v38  ;;  %v19568_v38 = vld [vmem:[#allocation46_spill] sm:$0xff] }
 0x31f   : > { %13144 = vmatprep.mubr.msk.f32.mxu0 %vm596_vm2, %v19479_v7 }
 0x321   : > { %12745 = vmatmul.mubr.msk.f32.vlgmr.msra.gmra.mrb[32].mxu1 %vm596_vm2, %v19508_v55  ;;  %v19569_v55 = vld [vmem:[#allocation60_spill] sm:$0xff] }
 0x322   : > { %13145 = vmatmul.mubr.msk.f32.vlgmr.msra.gmra.mrb[32].mxu0 %vm596_vm2, %v19481_v49  ;;  %13243 = vmatpush3.msk.msra.mxu1 %vm661_vm0, %v17812_v56  ;;  %v19570_v56 = vld [vmem:[#allocation89_spill] sm:$0xff] }
 0x323   : > { %13193 = vmatpush3.msk.msra.mxu0 %vm661_vm0, %v17803_v63  ;;  %12747 = vmatprep.mubr.msk.f32.mxu1 %vm596_vm2, %v19509_v26  ;;  %v19571_v26 = vld [vmem:[#allocation7_spill] sm:$0xff]  ;;  %v19572_v63 = vld [vmem:[#allocation65_spill] sm:$0xff] }
 0x324   : > { %13147 = vmatprep.mubr.msk.f32.mxu0 %vm596_vm2, %v19483_v23 }
 0x325   : > { %12748 = vmatmul.mubr.msk.f32.gmra.mrb[34].mxu1 %vm596_vm2, %v19568_v38  ;;  %v19579_v38 = vld [vmem:[#allocation28_spill] sm:$0xff] }
 0x326   : > { %13148 = vmatmul.mubr.msk.f32.gmra.mrb[34].mxu0 %vm596_vm2, %v19484_v10  ;;  %12750 = vmatprep.mubr.msk.f32.mxu1 %vm596_vm2, %v19569_v55  ;;  %v19580_v55 = vld [vmem:[#allocation29_spill] sm:$0xff] }
 0x327   : > { %13150 = vmatprep.mubr.msk.f32.mxu0 %vm596_vm2, %v19485_v52 }
 0x329   : > { %12751 = vmatmul.mubr.msk.f32.gmra.mrb[36].mxu1 %vm596_vm2, %v19570_v56  ;;  %v19581_v56 = vld [vmem:[#allocation30_spill] sm:$0xff] }
 0x32a   : > { %13151 = vmatmul.mubr.msk.f32.gmra.mrb[36].mxu0 %vm596_vm2, %v19486_v36  ;;  %12753 = vmatprep.mubr.msk.f32.mxu1 %vm596_vm2, %v19571_v26  ;;  %v5979_v26 = vrot.slane %v17608_v19, 7 }
 0x32b   : > { %13153 = vmatprep.mubr.msk.f32.mxu0 %vm596_vm2, %v19487_v17 }
 0x32d   : > { %12754 = vmatmul.mubr.msk.f32.gmra.mrb[38].mxu1 %vm596_vm2, %v19572_v63  ;;  %v19582_v63 = vld [vmem:[#allocation39_spill] sm:$0xff] }
 0x32e   : > { %13154 = vmatmul.mubr.msk.f32.gmra.mrb[38].mxu0 %vm596_vm2, %v19488_v13  ;;  %12756 = vmatprep.mubr.msk.f32.mxu1 %vm596_vm2, %v19573_v33  ;;  %v5980_v33 = vrot.slane %v19582_v63, 7 }
 0x32f   : > { %13156 = vmatprep.mubr.msk.f32.mxu0 %vm596_vm2, %v19489_v62 }
 0x330   : > { %v5981_v19 = vsel %vm4061_vm5, %v5979_v26, %v5980_v33 }
 0x331   : > { %12757 = vmatmul.mubr.msk.f32.gmra.mrb[40].mxu1 %vm596_vm2, %v19574_v43  ;;  %v19583_v43 = vld [vmem:[#allocation31_spill] sm:$0xff] }
 0x332   : > { %13157 = vmatmul.mubr.msk.f32.gmra.mrb[40].mxu0 %vm596_vm2, %v19490_v27  ;;  %12759 = vmatprep.mubr.msk.f32.mxu1 %vm596_vm2, %v19575_v31 }
 0x333   : > { %13159 = vmatprep.mubr.msk.f32.mxu0 %vm596_vm2, %v19491_v30 }
 0x335   : > { %12760 = vmatmul.mubr.msk.f32.gmra.mrb[42].mxu1 %vm596_vm2, %v19576_v5  ;;  %v19585_v5 = vld [vmem:[#allocation44_spill] sm:$0xff] }
 0x336   : > { %13160 = vmatmul.mubr.msk.f32.gmra.mrb[42].mxu0 %vm596_vm2, %v19492_v57  ;;  %12762 = vmatprep.mubr.msk.f32.mxu1 %vm596_vm2, %v19577_v53  ;;  %v5985_v53 = vrot.slane %v19585_v5, 7 }
 0x337   : > { %13162 = vmatprep.mubr.msk.f32.mxu0 %vm596_vm2, %v19493_v16 }
 0x339   : > { %12763 = vmatmul.mubr.msk.f32.gmra.mrb[44].mxu1 %vm596_vm2, %v19578_v14  ;;  %v19586_v14 = vld [vmem:[#allocation33_spill] sm:$0xff] }
 0x33a   : > { %13163 = vmatmul.mubr.msk.f32.gmra.mrb[44].mxu0 %vm596_vm2, %v19494_v24  ;;  %12765 = vmatprep.mubr.msk.f32.mxu1 %vm596_vm2, %v19579_v38  ;;  %v18084_v38 = vld [vmem:[%s14396_s13 + $0x428] sm:$0xff] }
 0x33b   : > { %13165 = vmatprep.mubr.msk.f32.mxu0 %vm596_vm2, %v19562_v2  ;;  %v19584_v2 = vld [vmem:[#allocation32_spill] sm:$0xff] }
 0x33d   : > { %12766 = vmatmul.mubr.msk.f32.gmra.mrb[46].mxu1 %vm596_vm2, %v19580_v55  ;;  %v5989_v55 = vrot.slane %v17667_v0, 7 }
 0x33e   : > { %13166 = vmatmul.mubr.msk.f32.gmra.mrb[46].mxu0 %vm596_vm2, %v19563_v48  ;;  %12768 = vmatprep.mubr.msk.f32.mxu1 %vm596_vm2, %v19581_v56  ;;  %v18069_v48 = vld [vmem:[%s14396_s13 + $0x400] sm:$0xff]  ;;  %v19587_v56 = vld [vmem:[#allocation51_spill] sm:$0xff] }
 0x33f   : > { %13168 = vmatprep.mubr.msk.f32.mxu0 %vm596_vm2, %v19564_v8  ;;  %v5982_v31 = vrot.slane %v18069_v48, 7  ;;  %v5984_v8 = vrot.slane %v17637_v20, 7  ;;  %v5990_v26 = vrot.slane %v19587_v56, 7 }
 0x341   : > { %12769 = vmatmul.mubr.msk.f32.gmra.mrb[48].mxu1 %vm596_vm2, %v19583_v43  ;;  %v5986_v20 = vsel %vm4061_vm5, %v5984_v8, %v5985_v53  ;;  %v18101_v43 = vld [vmem:[%s14396_s13 + $0x450] sm:$0xff]  ;;  %v5991_v0 = vsel %vm4061_vm5, %v5989_v55, %v5990_v26 }
 0x342   : > { %13169 = vmatmul.mubr.msk.f32.gmra.mrb[48].mxu0 %vm596_vm2, %v19565_v11  ;;  %12771 = vmatprep.mubr.msk.f32.mxu1 %vm596_vm2, %v19584_v2  ;;  %v5983_v11 = vsel %vm4061_vm5, %v5980_v33, %v5982_v31  ;;  %v5994_v2 = vrot.slane %v17680_v18, 7  ;;  %v5995_v31 = vrot.slane %v17700_v59, 7 }
 0x343   : > { %13171 = vmatprep.mubr.msk.f32.mxu0 %vm596_vm2, %v19566_v60  ;;  %v5987_v60 = vrot.slane %v18084_v38, 7 }
 0x345   : > { %12772 = vmatmul.mubr.msk.f32.gmra.mrb[50].mxu1 %vm596_vm2, %v19586_v14  ;;  %v5988_v33 = vsel %vm4061_vm5, %v5985_v53, %v5987_v60  ;;  %v18116_v53 = vld [vmem:[%s14396_s13 + $0x510] sm:$0xff]  ;;  %v6000_v60 = vrot.slane %v17729_v44, 7 }
 0x346   : > { %13172 = vmatmul.mubr.msk.f32.gmra.mrb[50].mxu0 %vm596_vm2, %v19567_v3  ;;  %12774 = vmatprep.mubr.msk.f32.mxu1 %vm596_vm2, %v5981_v19  ;;  %v18094_v3 = vld [vmem:[%s14396_s13 + $0x4e8] sm:$0xff]  ;;  %v18110_v19 = vld [vmem:[%s14396_s13 + $0x4f0] sm:$0xff]  ;;  %v8705_v55 = vrot.slane %v18116_v53, 1 }
 0x347   : > { %13174 = vmatprep.mubr.msk.f32.mxu0 %vm596_vm2, %v17922_v45  ;;  %v5992_v45 = vrot.slane %v18101_v43, 7  ;;  %v8700_v8 = vrot.slane %v18094_v3, 1  ;;  %v8702_v14 = vrot.slane %v18110_v19, 1 }
 0x349   : > { %12775 = vmatmul.mubr.msk.f32.gmra.mrb[52].mxu1 %vm596_vm2, %v5983_v11  ;;  %v5993_v18 = vsel %vm4061_vm5, %v5990_v26, %v5992_v45  ;;  %v5999_v11 = vrot.slane %v17712_v51, 7  ;;  %v18133_v26 = vld [vmem:[%s14396_s13 + $0x518] sm:$0xff] }
 0x34a   : > { %13175 = vmatmul.mubr.msk.f32.gmra.mrb[52].mxu0 %vm596_vm2, %v17937_v37  ;;  %12777 = vmatprep.mubr.msk.f32.mxu1 %vm596_vm2, %v5986_v20  ;;  %v8699_v37 = vrot.slane %v17942_v54, 1  ;;  %v5996_v54 = vsel %vm4061_vm5, %v5994_v2, %v5995_v31  ;;  %v8704_v20 = vrot.slane %v17965_v41, 1  ;;  %v8703_v41 = vsel %vm513_vm1, %v8700_v8, %v8702_v14 }
 0x34b   : > { %13177 = vmatprep.mubr.msk.f32.mxu0 %vm596_vm2, %v17945_v47  ;;  %v5997_v47 = vrot.slane %v17910_v15, 7  ;;  %v6001_v45 = vsel %vm4061_vm5, %v5999_v11, %v6000_v60  ;;  %v6004_v2 = vrot.slane %v17741_v40, 7  ;;  %v6007_v40 = vrot.slane %v17950_v35, 7 }
 0x34d   : > { %12778 = vmatmul.mubr.msk.f32.gmra.mrb[54].mxu1 %vm596_vm2, %v5988_v33  ;;  %v18137_v33 = vld [vmem:[%s14396_s13 + $0x538] sm:$0xff]  ;;  %v5998_v51 = vsel %vm4061_vm5, %v5995_v31, %v5997_v47  ;;  %v18154_v47 = vld [vmem:[%s14396_s13 + $0x540] sm:$0xff] }
 0x34e   : > { %13178 = vmatmul.mubr.msk.f32.gmra.mrb[54].mxu0 %vm596_vm2, %v17960_v21  ;;  %12780 = vmatprep.mubr.msk.f32.mxu1 %vm596_vm2, %v5991_v0  ;;  %v8701_v21 = vsel %vm513_vm1, %v8699_v37, %v8700_v8  ;;  %v8707_v0 = vrot.slane %v18133_v26, 1  ;;  %v6005_v37 = vrot.slane %v17758_v22, 7  ;;  %v8710_v31 = vrot.slane %v18137_v33, 1 }
 0x34f   : > { %13180 = vmatprep.mubr.msk.f32.mxu0 %vm596_vm2, %v17968_v6  ;;  %v6002_v6 = vrot.slane %v17927_v12, 7 }
 0x350   : > { %v6006_v14 = vsel %vm4061_vm5, %v6004_v2, %v6005_v37  ;;  %v19595_v2 = vld [vmem:[#allocation45_spill] sm:$0xff] }
 0x351   : > { %12781 = vmatmul.mubr.msk.f32.gmra.mrb[56].mxu1 %vm596_vm2, %v5993_v18  ;;  %v8706_v18 = vsel %vm513_vm1, %v8704_v20, %v8705_v55  ;;  %v6003_v8 = vsel %vm4061_vm5, %v6000_v60, %v6002_v6  ;;  %v6008_v60 = vsel %vm4061_vm5, %v6005_v37, %v6007_v40  ;;  %v19592_v6 = vld [vmem:[#allocation14_spill] sm:$0xff]  ;;  %v19601_v40 = vld [vmem:[#allocation52_spill] sm:$0xff] }
 0x352   : > { %13181 = vmatmul.mubr.msk.f32.gmra.mrb[56].mxu0 %vm596_vm2, %v17978_v4  ;;  %12783 = vmatprep.mubr.msk.f32.mxu1 %vm596_vm2, %v5996_v54  ;;  %v8709_v4 = vrot.slane %v17982_v50, 1  ;;  %v8708_v50 = vsel %vm513_vm1, %v8705_v55, %v8707_v0  ;;  %v8712_v54 = vrot.slane %v18154_v47, 1  ;;  %v19589_v55 = vld [vmem:[#allocation34_spill] sm:$0xff]  ;;  %v19594_v0 = vld [vmem:[#allocation16_spill] sm:$0xff] }
 0x353   : > { %13183 = vmatprep.mubr.msk.f32.mxu0 %vm596_vm2, %v8701_v21  ;;  %v19588_v21 = vld [vmem:[#allocation9_spill] sm:$0xff]  ;;  %v19596_v37 = vld [vmem:[#allocation18_spill] sm:$0xff] }
 0x354   : > { %v8711_v11 = vsel %vm513_vm1, %v8709_v4, %v8710_v31  ;;  %v8713_v20 = vsel %vm513_vm1, %v8710_v31, %v8712_v54  ;;  %v19597_v4 = vld [vmem:[#allocation49_spill] sm:$0xff]  ;;  %v19599_v31 = vld [vmem:[#allocation50_spill] sm:$0xff]  ;;  %v19604_v54 = vld [vmem:[#allocation23_spill] sm:$0xff] }
 0x355   : > { %12784 = vmatmul.mubr.msk.f32.gmra.mrb[58].mxu1 %vm596_vm2, %v5998_v51  ;;  %v19590_v51 = vld [vmem:[#allocation11_spill] sm:$0xff] }
 0x356   : > { %13184 = vmatmul.mubr.msk.f32.gmra.mrb[58].mxu0 %vm596_vm2, %v8703_v41  ;;  %12786 = vmatprep.mubr.msk.f32.mxu1 %vm596_vm2, %v6001_v45  ;;  %v19591_v41 = vld [vmem:[#allocation35_spill] sm:$0xff]  ;;  %v19593_v45 = vld [vmem:[#allocation40_spill] sm:$0xff] }
 0x357   : > { %13186 = vmatprep.mubr.msk.f32.mxu0 %vm596_vm2, %v8706_v18  ;;  %v19598_v18 = vld [vmem:[#allocation20_spill] sm:$0xff] }
 0x359   : > { %12787 = vmatmul.mubr.msk.f32.gmra.mrb[60].mxu1 %vm596_vm2, %v6003_v8  ;;  %v19600_v8 = vld [vmem:[#allocation21_spill] sm:$0xff] }
 0x35a   : > { %13187 = vmatmul.mubr.msk.f32.gmra.mrb[60].mxu0 %vm596_vm2, %v8708_v50  ;;  %12789 = vmatprep.mubr.msk.f32.mxu1 %vm596_vm2, %v6006_v14  ;;  %v19602_v50 = vld [vmem:[#allocation22_spill] sm:$0xff]  ;;  %v19603_v14 = vld [vmem:[#allocation53_spill] sm:$0xff] }
 0x35b   : > { %13189 = vmatprep.mubr.msk.f32.mxu0 %vm596_vm2, %v8711_v11  ;;  %v19605_v11 = vld [vmem:[#allocation24_spill] sm:$0xff] }
 0x35d   : > { %12790 = vmatmul.mubr.msk.f32.gmra.mrb[62].mxu1 %vm596_vm2, %v6008_v60  ;;  %v19606_v60 = vld [vmem:[#allocation25_spill] sm:$0xff] }
 0x35e   : > { %13190 = vmatmul.mubr.msk.f32.gmra.mrb[62].mxu0 %vm596_vm2, %v8713_v20  ;;  %13244 = vmatprep.mubr.msk.f32.mxu1 %vm596_vm2, %v19588_v21  ;;  %v8997_v20 = vrot.slane %v19582_v63, 2  ;;  %v8998_v21 = vrot.slane %v18069_v48, 2  ;;  %v9003_v63 = vrot.slane %v18084_v38, 2  ;;  %v330_v48 = vld [vmem:[%s14396_s13 + $0x430] sm:$0x3]  ;;  %v9008_v38 = vrot.slane %v18101_v43, 2 }
 0x35f   : > { %13194 = vmatprep.mubr.msk.f32.mxu0 %vm596_vm2, %v19589_v55  ;;  %v325_v55 = vld [vmem:[%s14396_s13 + $0x408] sm:$0x3]  ;;  %v9013_v43 = vrot.slane %v17910_v15, 2  ;;  %v9018_v15 = vrot.slane %v17927_v12, 2  ;;  %v9023_v12 = vrot.slane %v17950_v35, 2  ;;  %v9028_v35 = vrot.slane %v18110_v19, 2 }
 0x360   : > { %v9033_v19 = vrot.slane %v18133_v26, 2  ;;  %v9038_v26 = vrot.slane %v18154_v47, 2 }
 0x361   : > { %13245 = vmatmul.mubr.msk.f32.vlgmr.msra.gmra.mrb[64].mxu1 %vm596_vm2, %v19590_v51  ;;  %v19607_v51 = vld [vmem:[#allocation26_spill] sm:$0xff] }
 0x362   : > { %13195 = vmatmul.mubr.msk.f32.vlgmr.msra.gmra.mrb[32].mxu0 %vm596_vm2, %v19591_v41  ;;  %13247 = vmatprep.mubr.msk.f32.mxu1 %vm596_vm2, %v19592_v6  ;;  %v335_v41 = vld [vmem:[%s14396_s13 + $0x458] sm:$0x3]  ;;  %v340_v6 = vld [vmem:[%s14396_s13 + $0x480] sm:$0x3] }
 0x363   : > { %13197 = vmatprep.mubr.msk.f32.mxu0 %vm596_vm2, %v19593_v45 }
 0x365   : > { %13248 = vmatmul.mubr.msk.f32.gmra.mrb[66].mxu1 %vm596_vm2, %v19594_v0  ;;  %v345_v0 = vld [vmem:[%s14396_s13 + $0x4a8] sm:$0x3] }
 0x366   : > { %13198 = vmatmul.mubr.msk.f32.gmra.mrb[34].mxu0 %vm596_vm2, %v19595_v2  ;;  %13250 = vmatprep.mubr.msk.f32.mxu1 %vm596_vm2, %v19596_v37  ;;  %v350_v37 = vld [vmem:[%s14396_s13 + $0x4d0] sm:$0x3] }
 0x367   : > { %13200 = vmatprep.mubr.msk.f32.mxu0 %vm596_vm2, %v19597_v4 }
 0x369   : > { %13251 = vmatmul.mubr.msk.f32.gmra.mrb[68].mxu1 %vm596_vm2, %v19598_v18  ;;  %v355_v18 = vld [vmem:[%s14396_s13 + $0x4f8] sm:$0x3] }
 0x36a   : > { %13201 = vmatmul.mubr.msk.f32.gmra.mrb[36].mxu0 %vm596_vm2, %v19599_v31  ;;  %13253 = vmatprep.mubr.msk.f32.mxu1 %vm596_vm2, %v19600_v8  ;;  %v360_v8 = vld [vmem:[%s14396_s13 + $0x520] sm:$0x3] }
 0x36b   : > { %13203 = vmatprep.mubr.msk.f32.mxu0 %vm596_vm2, %v19601_v40 }
 0x36d   : > { %13254 = vmatmul.mubr.msk.f32.gmra.mrb[70].mxu1 %vm596_vm2, %v19602_v50  ;;  %v365_v50 = vld [vmem:[%s14396_s13 + $0x548] sm:$0x3]  ;;  %s14295_s13 = smov 8  }
 0x36e   : > { %13204 = vmatmul.mubr.msk.f32.gmra.mrb[38].mxu0 %vm596_vm2, %v19603_v14  ;;  %13256 = vmatprep.mubr.msk.f32.mxu1 %vm596_vm2, %v19604_v54 }
 0x36f   : > { %13206 = vmatprep.mubr.msk.f32.mxu0 %vm596_vm2, %v17732_v32  ;;  %v9000_v32 = vrot.slane %v325_v55, 2 }
 0x371   : > { %13257 = vmatmul.mubr.msk.f32.gmra.mrb[72].mxu1 %vm596_vm2, %v19605_v11 }
 0x372   : > { %13207 = vmatmul.mubr.msk.f32.gmra.mrb[40].mxu0 %vm596_vm2, %v17749_v1  ;;  %13259 = vmatprep.mubr.msk.f32.mxu1 %vm596_vm2, %v19606_v60  ;;  %v8999_v1 = vsel %vm7070_vm6, %v8997_v20, %v8998_v21 }
 0x373   : > { %13209 = vmatprep.mubr.msk.f32.mxu0 %vm596_vm2, %v17761_v58  ;;  %v9002_v58 = vrot.slane %v19585_v5, 2  ;;  %v9007_v5 = vrot.slane %v19587_v56, 2  ;;  %v9012_v56 = vrot.slane %v17700_v59, 2  ;;  %v9017_v59 = vrot.slane %v17729_v44, 2 }
 0x374   : > { %v9022_v44 = vrot.slane %v17758_v22, 2  ;;  %v9027_v22 = vrot.slane %v18094_v3, 2  ;;  %v9032_v3 = vrot.slane %v18116_v53, 2  ;;  %v9037_v53 = vrot.slane %v18137_v33, 2 }
 0x375   : > { %13260 = vmatmul.mubr.msk.f32.gmra.mrb[74].mxu1 %vm596_vm2, %v19607_v51  ;;  %v9014_v45 = vsel %vm7070_vm6, %v9012_v56, %v9013_v43  ;;  %v9019_v2 = vsel %vm7070_vm6, %v9017_v59, %v9018_v15 }
 0x376   : > { %13210 = vmatmul.mubr.msk.f32.gmra.mrb[42].mxu0 %vm596_vm2, %v17775_v39  ;;  %13262 = vmatprep.mubr.msk.f32.mxu1 %vm596_vm2, %v19473_v25  ;;  %v9001_v25 = vsel %vm7070_vm6, %v8998_v21, %v9000_v32  ;;  %v9005_v39 = vrot.slane %v330_v48, 2  ;;  %v9024_v4 = vsel %vm7070_vm6, %v9022_v44, %v9023_v12  ;;  %v9029_v31 = vsel %vm7070_vm6, %v9027_v22, %v9028_v35 }
 0x377   : > { %13212 = vmatprep.mubr.msk.f32.mxu0 %vm596_vm2, %v17779_v46  ;;  %v9004_v46 = vsel %vm7070_vm6, %v9002_v58, %v9003_v63  ;;  %v9034_v40 = vsel %vm7070_vm6, %v9032_v3, %v9033_v19  ;;  %v9039_v14 = vsel %vm7070_vm6, %v9037_v53, %v9038_v26 }
 0x379   : > { %13263 = vmatmul.mubr.msk.f32.gmra.mrb[76].mxu1 %vm596_vm2, %v19474_v34  ;;  %v9006_v34 = vsel %vm7070_vm6, %v9003_v63, %v9005_v39 }
 0x37a   : > { %13213 = vmatmul.mubr.msk.f32.gmra.mrb[44].mxu0 %vm596_vm2, %v17789_v9  ;;  %13265 = vmatprep.mubr.msk.f32.mxu1 %vm596_vm2, %v19475_v28  ;;  %v9010_v28 = vrot.slane %v335_v41, 2  ;;  %v9009_v9 = vsel %vm7070_vm6, %v9007_v5, %v9008_v38 }
 0x37b   : > { %13215 = vmatprep.mubr.msk.f32.mxu0 %vm596_vm2, %v8999_v1 }
 0x37d   : > { %13266 = vmatmul.mubr.msk.f32.gmra.mrb[78].mxu1 %vm596_vm2, %v19476_v61  ;;  %v9011_v61 = vsel %vm7070_vm6, %v9008_v38, %v9010_v28 }
 0x37e   : > { %13216 = vmatmul.mubr.msk.f32.gmra.mrb[46].mxu0 %vm596_vm2, %v9001_v25  ;;  %13268 = vmatprep.mubr.msk.f32.mxu1 %vm596_vm2, %v19477_v42  ;;  %v9015_v42 = vrot.slane %v340_v6, 2 }
 0x37f   : > { %13218 = vmatprep.mubr.msk.f32.mxu0 %vm596_vm2, %v9004_v46 }
 0x381   : > { %13269 = vmatmul.mubr.msk.f32.gmra.mrb[80].mxu1 %vm596_vm2, %v19478_v29  ;;  %v9016_v29 = vsel %vm7070_vm6, %v9013_v43, %v9015_v42 }
 0x382   : > { %13219 = vmatmul.mubr.msk.f32.gmra.mrb[48].mxu0 %vm596_vm2, %v9006_v34  ;;  %13271 = vmatprep.mubr.msk.f32.mxu1 %vm596_vm2, %v19479_v7  ;;  %v9020_v7 = vrot.slane %v345_v0, 2 }
 0x383   : > { %13221 = vmatprep.mubr.msk.f32.mxu0 %vm596_vm2, %v9009_v9 }
 0x385   : > { %13272 = vmatmul.mubr.msk.f32.gmra.mrb[82].mxu1 %vm596_vm2, %v19481_v49  ;;  %v9021_v49 = vsel %vm7070_vm6, %v9018_v15, %v9020_v7 }
 0x386   : > { %13222 = vmatmul.mubr.msk.f32.gmra.mrb[50].mxu0 %vm596_vm2, %v9011_v61  ;;  %13274 = vmatprep.mubr.msk.f32.mxu1 %vm596_vm2, %v19483_v23  ;;  %v9025_v23 = vrot.slane %v350_v37, 2 }
 0x387   : > { %13224 = vmatprep.mubr.msk.f32.mxu0 %vm596_vm2, %v9014_v45 }
 0x389   : > { %13275 = vmatmul.mubr.msk.f32.gmra.mrb[84].mxu1 %vm596_vm2, %v19484_v10  ;;  %v9030_v10 = vrot.slane %v355_v18, 2 }
 0x38a   : > { %13225 = vmatmul.mubr.msk.f32.gmra.mrb[52].mxu0 %vm596_vm2, %v9016_v29  ;;  %13277 = vmatprep.mubr.msk.f32.mxu1 %vm596_vm2, %v19485_v52  ;;  %v9026_v52 = vsel %vm7070_vm6, %v9023_v12, %v9025_v23 }
 0x38b   : > { %13227 = vmatprep.mubr.msk.f32.mxu0 %vm596_vm2, %v9019_v2 }
 0x38d   : > { %13278 = vmatmul.mubr.msk.f32.gmra.mrb[86].mxu1 %vm596_vm2, %v19486_v36  ;;  %v9031_v36 = vsel %vm7070_vm6, %v9028_v35, %v9030_v10 }
 0x38e   : > { %13228 = vmatmul.mubr.msk.f32.gmra.mrb[54].mxu0 %vm596_vm2, %v9021_v49  ;;  %13280 = vmatprep.mubr.msk.f32.mxu1 %vm596_vm2, %v19487_v17  ;;  %v9035_v17 = vrot.slane %v360_v8, 2 }
 0x38f   : > { %13230 = vmatprep.mubr.msk.f32.mxu0 %vm596_vm2, %v9024_v4 }
 0x391   : > { %13281 = vmatmul.mubr.msk.f32.gmra.mrb[88].mxu1 %vm596_vm2, %v19488_v13  ;;  %v9040_v13 = vrot.slane %v365_v50, 2 }
 0x392   : > { %13231 = vmatmul.mubr.msk.f32.gmra.mrb[56].mxu0 %vm596_vm2, %v9026_v52  ;;  %13283 = vmatprep.mubr.msk.f32.mxu1 %vm596_vm2, %v19489_v62  ;;  %v9036_v62 = vsel %vm7070_vm6, %v9033_v19, %v9035_v17 }
 0x393   : > { %13233 = vmatprep.mubr.msk.f32.mxu0 %vm596_vm2, %v9029_v31 }
 0x395   : > { %13284 = vmatmul.mubr.msk.f32.gmra.mrb[90].mxu1 %vm596_vm2, %v19490_v27  ;;  %v9041_v27 = vsel %vm7070_vm6, %v9038_v26, %v9040_v13 }
 0x396   : > { %13234 = vmatmul.mubr.msk.f32.gmra.mrb[58].mxu0 %vm596_vm2, %v9031_v36  ;;  %13286 = vmatprep.mubr.msk.f32.mxu1 %vm596_vm2, %v19491_v30  ;;  %v18329_v30 = vpop.permute.xlu0 %6295 }
 0x397   : > { %13236 = vmatprep.mubr.msk.f32.mxu0 %vm596_vm2, %v9034_v40 }
 0x399   : > { %13287 = vmatmul.mubr.msk.f32.gmra.mrb[92].mxu1 %vm596_vm2, %v19492_v57 }
 0x39a   : > { %13237 = vmatmul.mubr.msk.f32.gmra.mrb[60].mxu0 %vm596_vm2, %v9036_v62  ;;  %13289 = vmatprep.mubr.msk.f32.mxu1 %vm596_vm2, %v19493_v16 }
 0x39b   : > { %13239 = vmatprep.mubr.msk.f32.mxu0 %vm596_vm2, %v9039_v14 }
 0x39d   : > { %13290 = vmatmul.mubr.msk.f32.gmra.mrb[94].mxu1 %vm596_vm2, %v19494_v24 }
 0x39e   : > { %13240 = vmatmul.mubr.msk.f32.gmra.mrb[62].mxu0 %vm596_vm2, %v9041_v27 }
 0x3f4   : > { %v12746_v33 = vpop.f32.mrb[32].mxu1 }
 0x3f5   : > { %v6299_v47 = vadd.f32 %v12746_v33, %v18329_v30  ;;  %v6104_v57 = vpop.f32.mrb[33].mxu1 }
 0x3f6   : > { %v6298_v54 = vadd.f32 %v18329_v30, %v6104_v57  ;;  %v18395_v57 = vpop.permute.xlu1 %9340 }
 0x3f7   : > { %6364 = vrot.lane.b32.xlu1 %v6299_v47, %s14295_s13  ;;  %v18393_v47 = vpop.permute.xlu0 %9537 }
 0x3f8   : > { %6362 = vrot.lane.b32.xlu0 %v6298_v54, %s14295_s13  ;;  %v12749_v16 = vpop.f32.mrb[34].mxu1 }
 0x3f9   : > { %v6301_v11 = vadd.f32 %v12749_v16, %v18329_v30  ;;  %v6114_v60 = vpop.f32.mrb[35].mxu1 }
 0x3fa   : > { %v6300_v24 = vadd.f32 %v18329_v30, %v6114_v60 }
 0x3fc   : > { %6368 = vrot.lane.b32.xlu0 %v6301_v11, %s14295_s13  ;;  %6366 = vrot.lane.b32.xlu1 %v6300_v24, %s14295_s13  ;;  %v12752_v20 = vpop.f32.mrb[36].mxu1 }
 0x3fd   : > { %v6303_v21 = vadd.f32 %v12752_v20, %v18329_v30  ;;  %v6124_v55 = vpop.f32.mrb[37].mxu1 }
 0x3fe   : > { %v6302_v51 = vadd.f32 %v18329_v30, %v6124_v55 }
 0x400   : > { %6372 = vrot.lane.b32.xlu0 %v6303_v21, %s14295_s13  ;;  %6370 = vrot.lane.b32.xlu1 %v6302_v51, %s14295_s13  ;;  %v12755_v32 = vpop.f32.mrb[38].mxu1 }
 0x401   : > { %v6305_v1 = vadd.f32 %v12755_v32, %v18329_v30  ;;  %v6134_v58 = vpop.f32.mrb[39].mxu1 }
 0x402   : > { %v6304_v63 = vadd.f32 %v18329_v30, %v6134_v58 }
 0x404   : > { %6376 = vrot.lane.b32.xlu0 %v6305_v1, %s14295_s13  ;;  %6374 = vrot.lane.b32.xlu1 %v6304_v63, %s14295_s13  ;;  %v12758_v48 = vpop.f32.mrb[40].mxu1 }
 0x405   : > { %v6307_v25 = vadd.f32 %v12758_v48, %v18329_v30  ;;  %v6144_v39 = vpop.f32.mrb[41].mxu1 }
 0x406   : > { %v6306_v46 = vadd.f32 %v18329_v30, %v6144_v39 }
 0x408   : > { %6380 = vrot.lane.b32.xlu0 %v6307_v25, %s14295_s13  ;;  %6378 = vrot.lane.b32.xlu1 %v6306_v46, %s14295_s13  ;;  %v12761_v5 = vpop.f32.mrb[42].mxu1 }
 0x409   : > { %v6309_v38 = vadd.f32 %v12761_v5, %v18329_v30  ;;  %v6154_v41 = vpop.f32.mrb[43].mxu1 }
 0x40a   : > { %v6308_v34 = vadd.f32 %v18329_v30, %v6154_v41 }
 0x40c   : > { %6384 = vrot.lane.b32.xlu0 %v6309_v38, %s14295_s13  ;;  %6382 = vrot.lane.b32.xlu1 %v6308_v34, %s14295_s13  ;;  %v12764_v28 = vpop.f32.mrb[44].mxu1 }
 0x40d   : > { %v6311_v9 = vadd.f32 %v12764_v28, %v18329_v30  ;;  %v6164_v56 = vpop.f32.mrb[45].mxu1 }
 0x40e   : > { %v6310_v43 = vadd.f32 %v18329_v30, %v6164_v56 }
 0x410   : > { %6388 = vrot.lane.b32.xlu0 %v6311_v9, %s14295_s13  ;;  %6386 = vrot.lane.b32.xlu1 %v6310_v43, %s14295_s13  ;;  %v12767_v6 = vpop.f32.mrb[46].mxu1 }
 0x411   : > { %v6313_v61 = vadd.f32 %v12767_v6, %v18329_v30  ;;  %v6174_v42 = vpop.f32.mrb[47].mxu1 }
 0x412   : > { %v6312_v45 = vadd.f32 %v18329_v30, %v6174_v42 }
 0x414   : > { %6392 = vrot.lane.b32.xlu0 %v6313_v61, %s14295_s13  ;;  %6390 = vrot.lane.b32.xlu1 %v6312_v45, %s14295_s13  ;;  %v12770_v59 = vpop.f32.mrb[48].mxu1 }
 0x415   : > { %v6315_v15 = vadd.f32 %v12770_v59, %v18329_v30  ;;  %v6184_v0 = vpop.f32.mrb[49].mxu1 }
 0x416   : > { %v6314_v29 = vadd.f32 %v18329_v30, %v6184_v0 }
 0x418   : > { %6396 = vrot.lane.b32.xlu0 %v6315_v15, %s14295_s13  ;;  %6394 = vrot.lane.b32.xlu1 %v6314_v29, %s14295_s13  ;;  %v12773_v7 = vpop.f32.mrb[50].mxu1 }
 0x419   : > { %v6317_v2 = vadd.f32 %v12773_v7, %v18329_v30  ;;  %v6194_v44 = vpop.f32.mrb[51].mxu1 }
 0x41a   : > { %v6316_v12 = vadd.f32 %v18329_v30, %v6194_v44 }
 0x41c   : > { %6400 = vrot.lane.b32.xlu0 %v6317_v2, %s14295_s13  ;;  %6398 = vrot.lane.b32.xlu1 %v6316_v12, %s14295_s13  ;;  %v12776_v37 = vpop.f32.mrb[52].mxu1 }
 0x41d   : > { %v6319_v49 = vadd.f32 %v12776_v37, %v18329_v30  ;;  %v6204_v23 = vpop.f32.mrb[53].mxu1 }
 0x41e   : > { %v6318_v4 = vadd.f32 %v18329_v30, %v6204_v23 }
 0x420   : > { %6404 = vrot.lane.b32.xlu0 %v6319_v49, %s14295_s13  ;;  %6402 = vrot.lane.b32.xlu1 %v6318_v4, %s14295_s13  ;;  %v12779_v22 = vpop.f32.mrb[54].mxu1 }
 0x421   : > { %v6321_v35 = vadd.f32 %v12779_v22, %v18329_v30  ;;  %v6214_v18 = vpop.f32.mrb[55].mxu1 }
 0x422   : > { %v6320_v52 = vadd.f32 %v18329_v30, %v6214_v18 }
 0x424   : > { %6408 = vrot.lane.b32.xlu0 %v6321_v35, %s14295_s13  ;;  %6406 = vrot.lane.b32.xlu1 %v6320_v52, %s14295_s13  ;;  %v12782_v10 = vpop.f32.mrb[56].mxu1 }
 0x425   : > { %v6323_v31 = vadd.f32 %v12782_v10, %v18329_v30  ;;  %v6224_v3 = vpop.f32.mrb[57].mxu1 }
 0x426   : > { %v6322_v19 = vadd.f32 %v18329_v30, %v6224_v3 }
 0x428   : > { %6412 = vrot.lane.b32.xlu0 %v6323_v31, %s14295_s13  ;;  %6410 = vrot.lane.b32.xlu1 %v6322_v19, %s14295_s13  ;;  %v12785_v8 = vpop.f32.mrb[58].mxu1 }
 0x429   : > { %v6325_v36 = vadd.f32 %v12785_v8, %v18329_v30  ;;  %v6234_v17 = vpop.f32.mrb[59].mxu1 }
 0x42a   : > { %v6324_v40 = vadd.f32 %v18329_v30, %v6234_v17 }
 0x42c   : > { %6416 = vrot.lane.b32.xlu0 %v6325_v36, %s14295_s13  ;;  %6414 = vrot.lane.b32.xlu1 %v6324_v40, %s14295_s13  ;;  %v12788_v53 = vpop.f32.mrb[60].mxu1 }
 0x42d   : > { %v6327_v26 = vadd.f32 %v12788_v53, %v18329_v30  ;;  %v6244_v50 = vpop.f32.mrb[61].mxu1 }
 0x42e   : > { %v6326_v62 = vadd.f32 %v18329_v30, %v6244_v50 }
 0x430   : > { %6420 = vrot.lane.b32.xlu0 %v6327_v26, %s14295_s13  ;;  %6418 = vrot.lane.b32.xlu1 %v6326_v62, %s14295_s13  ;;  %v12791_v13 = vpop.f32.mrb[62].mxu1 }
 0x431   : > { %v6329_v14 = vadd.f32 %v12791_v13, %v18329_v30  ;;  %v6254_v27 = vpop.f32.mrb[63].mxu1 }
 0x432   : > { %v6328_v33 = vadd.f32 %v18329_v30, %v6254_v27 }
 0x434   : > { %6424 = vrot.lane.b32.xlu0 %v6329_v14, %s14295_s13  ;;  %v13246_v54 = vpop.f32.mrb[64].mxu1  ;;  %6422 = vrot.lane.b32.xlu1 %v6328_v33, %s14295_s13 }
 0x435   : > { %v13196_v16 = vpop.f32.mrb[32].mxu0  ;;  %v9609_v11 = vpop.f32.mrb[65].mxu1  ;;  %v9615_v60 = vadd.f32 %v13246_v54, %v18393_v47 }
 0x436   : > { %v9344_v24 = vadd.f32 %v13196_v16, %v18395_v57  ;;  %v9149_v20 = vpop.f32.mrb[33].mxu0  ;;  %v9610_v32 = vadd.f32 %v9609_v11, %v18393_v47 }
 0x437   : > { %v9343_v51 = vadd.f32 %v18395_v57, %v9149_v20 }
 0x438   : > { %9802 = vrot.lane.b32.xlu0 %v9615_v60, %s14296_s9  ;;  %v13249_v30 = vpop.f32.mrb[66].mxu1  ;;  %9409 = vrot.lane.b32.xlu1 %v9344_v24, %s14297_s10 }
 0x439   : > { %v13199_v21 = vpop.f32.mrb[34].mxu0  ;;  %v9619_v55 = vpop.f32.mrb[67].mxu1  ;;  %v9625_v25 = vadd.f32 %v13249_v30, %v18393_v47 }
 0x43a   : > { %v9159_v1 = vpop.f32.mrb[35].mxu0  ;;  %v9346_v39 = vadd.f32 %v13199_v21, %v18395_v57  ;;  %v9620_v28 = vadd.f32 %v9619_v55, %v18393_v47 }
 0x43b   : > { %v9345_v34 = vadd.f32 %v18395_v57, %v9159_v1 }
 0x43c   : > { %v13252_v58 = vpop.f32.mrb[68].mxu1  ;;  %9800 = vrot.lane.b32.xlu1 %v9610_v32, %s14296_s9  ;;  %9407 = vrot.lane.b32.xlu0 %v9343_v51, %s14297_s10 }
 0x43d   : > { %v13202_v63 = vpop.f32.mrb[36].mxu0  ;;  %v9629_v48 = vpop.f32.mrb[69].mxu1  ;;  %v9635_v61 = vadd.f32 %v13252_v58, %v18393_v47 }
 0x43e   : > { %v9169_v46 = vpop.f32.mrb[37].mxu0  ;;  %v9348_v42 = vadd.f32 %v13202_v63, %v18395_v57  ;;  %v9630_v7 = vadd.f32 %v9629_v48, %v18393_v47 }
 0x43f   : > { %v9347_v29 = vadd.f32 %v18395_v57, %v9169_v46 }
 0x440   : > { %v13255_v5 = vpop.f32.mrb[70].mxu1  ;;  %9806 = vrot.lane.b32.xlu0 %v9625_v25, %s14296_s9  ;;  %9413 = vrot.lane.b32.xlu1 %v9346_v39, %s14297_s10 }
 0x441   : > { %v13205_v38 = vpop.f32.mrb[38].mxu0  ;;  %v9639_v41 = vpop.f32.mrb[71].mxu1  ;;  %v9645_v52 = vadd.f32 %v13255_v5, %v18393_v47 }
 0x442   : > { %v9179_v9 = vpop.f32.mrb[39].mxu0  ;;  %v9350_v49 = vadd.f32 %v13205_v38, %v18395_v57  ;;  %v9640_v10 = vadd.f32 %v9639_v41, %v18393_v47 }
 0x443   : > { %v9349_v23 = vadd.f32 %v18395_v57, %v9179_v9 }
 0x444   : > { %v13258_v56 = vpop.f32.mrb[72].mxu1  ;;  %9804 = vrot.lane.b32.xlu1 %v9620_v28, %s14296_s9  ;;  %9411 = vrot.lane.b32.xlu0 %v9345_v34, %s14297_s10 }
 0x445   : > { %v13208_v43 = vpop.f32.mrb[40].mxu0  ;;  %v9649_v6 = vpop.f32.mrb[73].mxu1  ;;  %v9655_v54 = vadd.f32 %v13258_v56, %v18393_v47 }
 0x446   : > { %v9189_v45 = vpop.f32.mrb[41].mxu0  ;;  %v9352_v17 = vadd.f32 %v13208_v43, %v18395_v57  ;;  %v9650_v16 = vadd.f32 %v9649_v6, %v18393_v47 }
 0x447   : > { %v9351_v40 = vadd.f32 %v18395_v57, %v9189_v45 }
 0x448   : > { %v18417_v59 = vpop.f32.mrb[74].mxu1  ;;  %9810 = vrot.lane.b32.xlu0 %v9635_v61, %s14296_s9  ;;  %9417 = vrot.lane.b32.xlu1 %v9348_v42, %s14297_s10 }
 0x449   : > { %v13211_v15 = vpop.f32.mrb[42].mxu0  ;;  %v18421_v0 = vpop.f32.mrb[75].mxu1  ;;  %v9665_v41 = vadd.f32 %v18417_v59, %v18393_v47 }
 0x44a   : > { %v9199_v2 = vpop.f32.mrb[43].mxu0  ;;  %v9354_v32 = vadd.f32 %v13211_v15, %v18395_v57  ;;  %v9660_v34 = vadd.f32 %v18421_v0, %v18393_v47 }
 0x44b   : > { %v9353_v1 = vadd.f32 %v18395_v57, %v9199_v2 }
 0x44c   : > { %v18425_v44 = vpop.f32.mrb[76].mxu1  ;;  %9808 = vrot.lane.b32.xlu1 %v9630_v7, %s14296_s9  ;;  %9415 = vrot.lane.b32.xlu0 %v9347_v29, %s14297_s10 }
 0x44d   : > { %v18429_v12 = vpop.f32.mrb[44].mxu0  ;;  %v18431_v37 = vpop.f32.mrb[77].mxu1 }
 0x44e   : > { %v18435_v4 = vpop.f32.mrb[45].mxu0  ;;  %v9356_v59 = vadd.f32 %v18429_v12, %v18395_v57 }
 0x44f   : > { %v9355_v15 = vadd.f32 %v18395_v57, %v18435_v4 }
 0x450   : > { %v18437_v22 = vpop.f32.mrb[78].mxu1  ;;  %9421 = vrot.lane.b32.xlu0 %v9350_v49, %s14297_s10  ;;  %9419 = vrot.lane.b32.xlu1 %v9349_v23, %s14297_s10 }
 0x451   : > { %v18441_v35 = vpop.f32.mrb[46].mxu0  ;;  %v18443_v18 = vpop.f32.mrb[79].mxu1 }
 0x452   : > { %v18447_v31 = vpop.f32.mrb[47].mxu0 }
 0x454   : > { %v13270_v3 = vpop.f32.mrb[80].mxu1  ;;  %9814 = vrot.lane.b32.xlu0 %v9645_v52, %s14296_s9  ;;  %9812 = vrot.lane.b32.xlu1 %v9640_v10, %s14296_s9  ;;  %v9675_v52 = vadd.f32 %v18425_v44, %v18393_v47  ;;  %v9670_v10 = vadd.f32 %v18431_v37, %v18393_v47 }
 0x455   : > { %v18452_v19 = vadd.f32 %v13270_v3, %v18393_v47  ;;  %v13220_v8 = vpop.f32.mrb[48].mxu0  ;;  %v9689_v36 = vpop.f32.mrb[81].mxu1 }
 0x456   : > { %v18457_v53 = vadd.f32 %v13220_v8, %v18395_v57  ;;  %v9229_v26 = vpop.f32.mrb[49].mxu0  ;;  %v18460_v50 = vadd.f32 %v9689_v36, %v18393_v47 }
 0x457   : > { %v18463_v62 = vadd.f32 %v18395_v57, %v9229_v26 }
 0x458   : > { %v13273_v13 = vpop.f32.mrb[82].mxu1  ;;  %9425 = vrot.lane.b32.xlu0 %v9352_v17, %s14297_s10  ;;  %9423 = vrot.lane.b32.xlu1 %v9351_v40, %s14297_s10 }
 0x459   : > { %v18468_v14 = vadd.f32 %v13273_v13, %v18393_v47  ;;  %v13223_v27 = vpop.f32.mrb[50].mxu0  ;;  %v9699_v33 = vpop.f32.mrb[83].mxu1 }
 0x45a   : > { %v18473_v11 = vadd.f32 %v13223_v27, %v18395_v57  ;;  %v9239_v60 = vpop.f32.mrb[51].mxu0  ;;  %v18476_v24 = vadd.f32 %v9699_v33, %v18393_v47  ;;  %v9358_v33 = vadd.f32 %v18441_v35, %v18395_v57 }
 0x45b   : > { %v18479_v20 = vadd.f32 %v18395_v57, %v9239_v60 }
 0x45c   : > { %v13276_v30 = vpop.f32.mrb[84].mxu1  ;;  %9818 = vrot.lane.b32.xlu0 %v9655_v54, %s14296_s9  ;;  %9816 = vrot.lane.b32.xlu1 %v9650_v16, %s14296_s9  ;;  %v9357_v54 = vadd.f32 %v18395_v57, %v18447_v31 }
 0x45d   : > { %v18484_v21 = vadd.f32 %v13276_v30, %v18393_v47  ;;  %v13226_v55 = vpop.f32.mrb[52].mxu0  ;;  %v9709_v51 = vpop.f32.mrb[85].mxu1 }
 0x45e   : > { %v18489_v58 = vadd.f32 %v13226_v55, %v18395_v57  ;;  %v9249_v63 = vpop.f32.mrb[53].mxu0  ;;  %v18492_v48 = vadd.f32 %v9709_v51, %v18393_v47 }
 0x45f   : > { %v18495_v25 = vadd.f32 %v18395_v57, %v9249_v63 }
 0x460   : > { %v13279_v39 = vpop.f32.mrb[86].mxu1  ;;  %9429 = vrot.lane.b32.xlu0 %v9354_v32, %s14297_s10  ;;  %9427 = vrot.lane.b32.xlu1 %v9353_v1, %s14297_s10 }
 0x461   : > { %v18500_v46 = vadd.f32 %v13279_v39, %v18393_v47  ;;  %v13229_v5 = vpop.f32.mrb[54].mxu0  ;;  %v9719_v38 = vpop.f32.mrb[87].mxu1  ;;  %v9685_v39 = vadd.f32 %v18437_v22, %v18393_v47 }
 0x462   : > { %v18507_v28 = vadd.f32 %v13229_v5, %v18395_v57  ;;  %v9259_v9 = vpop.f32.mrb[55].mxu0  ;;  %v18510_v56 = vadd.f32 %v9719_v38, %v18393_v47  ;;  %v9680_v5 = vadd.f32 %v18443_v18, %v18393_v47 }
 0x463   : > { %v18513_v43 = vadd.f32 %v18395_v57, %v9259_v9 }
 0x464   : > { %v13282_v6 = vpop.f32.mrb[88].mxu1  ;;  %9822 = vrot.lane.b32.xlu0 %v9665_v41, %s14296_s9  ;;  %9820 = vrot.lane.b32.xlu1 %v9660_v34, %s14296_s9 }
 0x465   : > { %v18518_v61 = vadd.f32 %v13282_v6, %v18393_v47  ;;  %v13232_v42 = vpop.f32.mrb[56].mxu0  ;;  %v9729_v45 = vpop.f32.mrb[89].mxu1 }
 0x466   : > { %v18525_v0 = vadd.f32 %v13232_v42, %v18395_v57  ;;  %v9269_v29 = vpop.f32.mrb[57].mxu0  ;;  %v18528_v7 = vadd.f32 %v9729_v45, %v18393_v47 }
 0x467   : > { %v18531_v2 = vadd.f32 %v18395_v57, %v9269_v29 }
 0x468   : > { %v13285_v49 = vpop.f32.mrb[90].mxu1  ;;  %9433 = vrot.lane.b32.xlu0 %v9356_v59, %s14297_s10  ;;  %9431 = vrot.lane.b32.xlu1 %v9355_v15, %s14297_s10 }
 0x469   : > { %v18536_v12 = vadd.f32 %v13285_v49, %v18393_v47  ;;  %v13235_v23 = vpop.f32.mrb[58].mxu0  ;;  %v6365_v4 = vpop.permute.xlu1 %6364 }
 0x46a   : > { %v18543_v3 = vadd.f32 %v13235_v23, %v18395_v57  ;;  %6460 = vst.msk [vmem:[%s16768_s27 + $0x8] sm:$0xff] %vm6458_vm8, %v6365_v4  ;;  %v9279_v8 = vpop.f32.mrb[59].mxu0  ;;  %v9739_v36 = vpop.f32.mrb[91].mxu1 }
 0x46b   : > { %v18548_v17 = vadd.f32 %v18395_v57, %v9279_v8  ;;  %v18551_v40 = vadd.f32 %v9739_v36, %v18393_v47  ;;  %v6363_v26 = vpop.permute.xlu0 %6362 }
 0x46c   : > { %6459 = vst.msk [vmem:[%s16768_s27] sm:$0xff] %vm6458_vm8, %v6363_v26  ;;  %v13288_v44 = vpop.f32.mrb[92].mxu1  ;;  %9826 = vrot.lane.b32.xlu0 %v9675_v52, %s14296_s9  ;;  %9824 = vrot.lane.b32.xlu1 %v9670_v10, %s14296_s9 }
 0x46d   : > { %v18558_v37 = vadd.f32 %v13288_v44, %v18393_v47  ;;  %v13238_v13 = vpop.f32.mrb[60].mxu0  ;;  %v9749_v27 = vpop.f32.mrb[93].mxu1 }
 0x46e   : > { %v18565_v16 = vadd.f32 %v13238_v13, %v18395_v57  ;;  %v9289_v60 = vpop.f32.mrb[61].mxu0  ;;  %v18568_v30 = vadd.f32 %v9749_v27, %v18393_v47  ;;  %v6367_v55 = vpop.permute.xlu1 %6366 }
 0x46f   : > { %v18571_v51 = vadd.f32 %v18395_v57, %v9289_v60  ;;  %v6369_v32 = vpop.permute.xlu0 %6368  ;;  %6461 = vst.msk [vmem:[%s16768_s27 + $0x10] sm:$0xff] %vm6458_vm8, %v6367_v55 }
 0x470   : > { %6462 = vst.msk [vmem:[%s16768_s27 + $0x18] sm:$0xff] %vm6458_vm8, %v6369_v32  ;;  %v13291_v35 = vpop.f32.mrb[94].mxu1  ;;  %9437 = vrot.lane.b32.xlu0 %v9358_v33, %s14297_s10  ;;  %9435 = vrot.lane.b32.xlu1 %v9357_v54, %s14297_s10 }
 0x471   : > { %v18580_v31 = vadd.f32 %v13291_v35, %v18393_v47  ;;  %v13241_v1 = vpop.f32.mrb[62].mxu0  ;;  %v9759_v63 = vpop.f32.mrb[95].mxu1 }
 0x472   : > { %v18587_v38 = vadd.f32 %v13241_v1, %v18395_v57  ;;  %v9299_v41 = vpop.f32.mrb[63].mxu0  ;;  %v18590_v34 = vadd.f32 %v9759_v63, %v18393_v47  ;;  %v6371_v9 = vpop.permute.xlu1 %6370 }
 0x473   : > { %v18593_v6 = vadd.f32 %v18395_v57, %v9299_v41  ;;  %v6373_v42 = vpop.permute.xlu0 %6372  ;;  %6463 = vst.msk [vmem:[%s16768_s27 + $0x20] sm:$0xff] %vm6458_vm8, %v6371_v9 }
 0x474   : > { %6464 = vst.msk [vmem:[%s16768_s27 + $0x28] sm:$0xff] %vm6458_vm8, %v6373_v42  ;;  %9830 = vrot.lane.b32.xlu0 %v9685_v39, %s14296_s9  ;;  %9828 = vrot.lane.b32.xlu1 %v9680_v5, %s14296_s9 }
 0x476   : > { %v6375_v22 = vpop.permute.xlu1 %6374 }
 0x477   : > { %v6377_v47 = vpop.permute.xlu0 %6376  ;;  %6465 = vst.msk [vmem:[%s16768_s27 + $0x30] sm:$0xff] %vm6458_vm8, %v6375_v22 }
 0x478   : > { %6466 = vst.msk [vmem:[%s16768_s27 + $0x38] sm:$0xff] %vm6458_vm8, %v6377_v47  ;;  %9441 = vrot.lane.b32.xlu0 %v18457_v53, %s14297_s10  ;;  %9439 = vrot.lane.b32.xlu1 %v18463_v62, %s14297_s10 }
 0x47a   : > { %v6379_v57 = vpop.permute.xlu1 %6378 }
 0x47b   : > { %v6381_v18 = vpop.permute.xlu0 %6380  ;;  %6467 = vst.msk [vmem:[%s16768_s27 + $0x40] sm:$0xff] %vm6458_vm8, %v6379_v57 }
 0x47c   : > { %6468 = vst.msk [vmem:[%s16768_s27 + $0x48] sm:$0xff] %vm6458_vm8, %v6381_v18  ;;  %9834 = vrot.lane.b32.xlu0 %v18452_v19, %s14296_s9  ;;  %9832 = vrot.lane.b32.xlu1 %v18460_v50, %s14296_s9 }
 0x47e   : > { %v6383_v53 = vpop.permute.xlu1 %6382 }
 0x47f   : > { %v6385_v45 = vpop.permute.xlu0 %6384  ;;  %6469 = vst.msk [vmem:[%s16768_s27 + $0x50] sm:$0xff] %vm6458_vm8, %v6383_v53 }
 0x480   : > { %6470 = vst.msk [vmem:[%s16768_s27 + $0x58] sm:$0xff] %vm6458_vm8, %v6385_v45  ;;  %9445 = vrot.lane.b32.xlu0 %v18473_v11, %s14297_s10  ;;  %9443 = vrot.lane.b32.xlu1 %v18479_v20, %s14297_s10 }
 0x482   : > { %v6387_v19 = vpop.permute.xlu1 %6386 }
 0x483   : > { %v6389_v62 = vpop.permute.xlu0 %6388  ;;  %6471 = vst.msk [vmem:[%s16768_s27 + $0x60] sm:$0xff] %vm6458_vm8, %v6387_v19 }
 0x484   : > { %6472 = vst.msk [vmem:[%s16768_s27 + $0x68] sm:$0xff] %vm6458_vm8, %v6389_v62  ;;  %9838 = vrot.lane.b32.xlu0 %v18468_v14, %s14296_s9  ;;  %9836 = vrot.lane.b32.xlu1 %v18476_v24, %s14296_s9 }
 0x486   : > { %v6391_v50 = vpop.permute.xlu1 %6390 }
 0x487   : > { %v6393_v11 = vpop.permute.xlu0 %6392  ;;  %6473 = vst.msk [vmem:[%s16768_s27 + $0x70] sm:$0xff] %vm6458_vm8, %v6391_v50 }
 0x488   : > { %6474 = vst.msk [vmem:[%s16768_s27 + $0x78] sm:$0xff] %vm6458_vm8, %v6393_v11  ;;  %9449 = vrot.lane.b32.xlu0 %v18489_v58, %s14297_s10  ;;  %9447 = vrot.lane.b32.xlu1 %v18495_v25, %s14297_s10 }
 0x48a   : > { %v6395_v14 = vpop.permute.xlu1 %6394 }
 0x48b   : > { %v6397_v20 = vpop.permute.xlu0 %6396  ;;  %6475 = vst.msk [vmem:[%s16768_s27 + $0x80] sm:$0xff] %vm6458_vm8, %v6395_v14 }
 0x48c   : > { %6476 = vst.msk [vmem:[%s16768_s27 + $0x88] sm:$0xff] %vm6458_vm8, %v6397_v20  ;;  %9842 = vrot.lane.b32.xlu0 %v18484_v21, %s14296_s9  ;;  %9840 = vrot.lane.b32.xlu1 %v18492_v48, %s14296_s9 }
 0x48e   : > { %v6399_v24 = vpop.permute.xlu1 %6398 }
 0x48f   : > { %v6401_v58 = vpop.permute.xlu0 %6400  ;;  %6477 = vst.msk [vmem:[%s16768_s27 + $0x90] sm:$0xff] %vm6458_vm8, %v6399_v24 }
 0x490   : > { %6478 = vst.msk [vmem:[%s16768_s27 + $0x98] sm:$0xff] %vm6458_vm8, %v6401_v58  ;;  %9453 = vrot.lane.b32.xlu0 %v18507_v28, %s14297_s10  ;;  %9451 = vrot.lane.b32.xlu1 %v18513_v43, %s14297_s10 }
 0x492   : > { %v6403_v21 = vpop.permute.xlu1 %6402 }
 0x493   : > { %v6405_v25 = vpop.permute.xlu0 %6404  ;;  %6479 = vst.msk [vmem:[%s16768_s27 + $0xa0] sm:$0xff] %vm6458_vm8, %v6403_v21 }
 0x494   : > { %6480 = vst.msk [vmem:[%s16768_s27 + $0xa8] sm:$0xff] %vm6458_vm8, %v6405_v25  ;;  %9846 = vrot.lane.b32.xlu0 %v18500_v46, %s14296_s9  ;;  %9844 = vrot.lane.b32.xlu1 %v18510_v56, %s14296_s9 }
 0x496   : > { %v6407_v48 = vpop.permute.xlu1 %6406 }
 0x497   : > { %v6409_v28 = vpop.permute.xlu0 %6408  ;;  %6481 = vst.msk [vmem:[%s16768_s27 + $0xb0] sm:$0xff] %vm6458_vm8, %v6407_v48 }
 0x498   : > { %6482 = vst.msk [vmem:[%s16768_s27 + $0xb8] sm:$0xff] %vm6458_vm8, %v6409_v28  ;;  %9457 = vrot.lane.b32.xlu0 %v18525_v0, %s14297_s10  ;;  %9455 = vrot.lane.b32.xlu1 %v18531_v2, %s14297_s10 }
 0x49a   : > { %v6411_v46 = vpop.permute.xlu1 %6410 }
 0x49b   : > { %v6413_v43 = vpop.permute.xlu0 %6412  ;;  %6483 = vst.msk [vmem:[%s16768_s27 + $0xc0] sm:$0xff] %vm6458_vm8, %v6411_v46 }
 0x49c   : > { %6484 = vst.msk [vmem:[%s16768_s27 + $0xc8] sm:$0xff] %vm6458_vm8, %v6413_v43  ;;  %9850 = vrot.lane.b32.xlu0 %v18518_v61, %s14296_s9  ;;  %9848 = vrot.lane.b32.xlu1 %v18528_v7, %s14296_s9 }
 0x49e   : > { %v6415_v56 = vpop.permute.xlu1 %6414 }
 0x49f   : > { %v6417_v59 = vpop.permute.xlu0 %6416  ;;  %6485 = vst.msk [vmem:[%s16768_s27 + $0xd0] sm:$0xff] %vm6458_vm8, %v6415_v56 }
 0x4a0   : > { %6486 = vst.msk [vmem:[%s16768_s27 + $0xd8] sm:$0xff] %vm6458_vm8, %v6417_v59  ;;  %9461 = vrot.lane.b32.xlu0 %v18543_v3, %s14297_s10  ;;  %9459 = vrot.lane.b32.xlu1 %v18548_v17, %s14297_s10 }
 0x4a2   : > { %v6419_v15 = vpop.permute.xlu1 %6418 }
 0x4a3   : > { %v6421_v61 = vpop.permute.xlu0 %6420  ;;  %6487 = vst.msk [vmem:[%s16768_s27 + $0xe0] sm:$0xff] %vm6458_vm8, %v6419_v15 }
 0x4a4   : > { %6488 = vst.msk [vmem:[%s16768_s27 + $0xe8] sm:$0xff] %vm6458_vm8, %v6421_v61  ;;  %9854 = vrot.lane.b32.xlu0 %v18536_v12, %s14296_s9  ;;  %9852 = vrot.lane.b32.xlu1 %v18551_v40, %s14296_s9 }
 0x4a6   : > { %v6423_v0 = vpop.permute.xlu1 %6422 }
 0x4a7   : > { %v6425_v29 = vpop.permute.xlu0 %6424  ;;  %6489 = vst.msk [vmem:[%s16768_s27 + $0xf0] sm:$0xff] %vm6458_vm8, %v6423_v0 }
 0x4a8   : > { %6490 = vst.msk [vmem:[%s16768_s27 + $0xf8] sm:$0xff] %vm6458_vm8, %v6425_v29  ;;  %9465 = vrot.lane.b32.xlu0 %v18565_v16, %s14297_s10  ;;  %9463 = vrot.lane.b32.xlu1 %v18571_v51, %s14297_s10 }
 0x4aa   : > { %v9410_v7 = vpop.permute.xlu1 %9409 }
 0x4ab   : > { %v9803_v2 = vpop.permute.xlu0 %9802  ;;  %9505 = vst.msk [vmem:[%s16768_s27 + $0x8] sm:$0xff] %vm9503_vm9, %v9410_v7 }
 0x4ac   : > { %9898 = vst.msk [vmem:[%s16768_s27 + $0x8] sm:$0xff] %vm9896_vm10, %v9803_v2  ;;  %9858 = vrot.lane.b32.xlu0 %v18558_v37, %s14296_s9  ;;  %9856 = vrot.lane.b32.xlu1 %v18568_v30, %s14296_s9 }
 0x4ae   : > { %v9801_v49 = vpop.permute.xlu1 %9800 }
 0x4af   : > { %v9408_v12 = vpop.permute.xlu0 %9407 }
 0x4b0   : > { %9504 = vst.msk [vmem:[%s16768_s27] sm:$0xff] %vm9503_vm9, %v9408_v12  ;;  %9469 = vrot.lane.b32.xlu0 %v18587_v38, %s14297_s10  ;;  %9467 = vrot.lane.b32.xlu1 %v18593_v6, %s14297_s10 }
 0x4b1   : > { %9897 = vst.msk [vmem:[%s16768_s27] sm:$0xff] %vm9896_vm10, %v9801_v49 }
 0x4b2   : > { %v9414_v23 = vpop.permute.xlu1 %9413 }
 0x4b3   : > { %v9807_v4 = vpop.permute.xlu0 %9806  ;;  %9507 = vst.msk [vmem:[%s16768_s27 + $0x18] sm:$0xff] %vm9503_vm9, %v9414_v23 }
 0x4b4   : > { %9900 = vst.msk [vmem:[%s16768_s27 + $0x18] sm:$0xff] %vm9896_vm10, %v9807_v4  ;;  %9862 = vrot.lane.b32.xlu0 %v18580_v31, %s14296_s9  ;;  %9860 = vrot.lane.b32.xlu1 %v18590_v34, %s14296_s9 }
 0x4b6   : > { %v9805_v52 = vpop.permute.xlu1 %9804 }
 0x4b7   : > { %v9412_v10 = vpop.permute.xlu0 %9411 }
 0x4b8   : > { %9506 = vst.msk [vmem:[%s16768_s27 + $0x10] sm:$0xff] %vm9503_vm9, %v9412_v10 }
 0x4b9   : > { %9899 = vst.msk [vmem:[%s16768_s27 + $0x10] sm:$0xff] %vm9896_vm10, %v9805_v52 }
 0x4ba   : > { %v9418_v3 = vpop.permute.xlu1 %9417 }
 0x4bb   : > { %v9811_v8 = vpop.permute.xlu0 %9810  ;;  %9509 = vst.msk [vmem:[%s16768_s27 + $0x28] sm:$0xff] %vm9503_vm9, %v9418_v3 }
 0x4bc   : > { %9902 = vst.msk [vmem:[%s16768_s27 + $0x28] sm:$0xff] %vm9896_vm10, %v9811_v8 }
 0x4be   : > { %v9809_v36 = vpop.permute.xlu1 %9808 }
 0x4bf   : > { %v9416_v17 = vpop.permute.xlu0 %9415 }
 0x4c0   : > { %9508 = vst.msk [vmem:[%s16768_s27 + $0x20] sm:$0xff] %vm9503_vm9, %v9416_v17 }
 0x4c1   : > { %9901 = vst.msk [vmem:[%s16768_s27 + $0x20] sm:$0xff] %vm9896_vm10, %v9809_v36 }
 0x4c2   : > { %v9420_v40 = vpop.permute.xlu1 %9419 }
 0x4c3   : > { %v9422_v26 = vpop.permute.xlu0 %9421  ;;  %9510 = vst.msk [vmem:[%s16768_s27 + $0x30] sm:$0xff] %vm9503_vm9, %v9420_v40 }
 0x4c4   : > { %9511 = vst.msk [vmem:[%s16768_s27 + $0x38] sm:$0xff] %vm9503_vm9, %v9422_v26 }
 0x4c6   : > { %v9813_v44 = vpop.permute.xlu1 %9812 }
 0x4c7   : > { %v9815_v37 = vpop.permute.xlu0 %9814  ;;  %9903 = vst.msk [vmem:[%s16768_s27 + $0x30] sm:$0xff] %vm9896_vm10, %v9813_v44 }
 0x4c8   : > { %9904 = vst.msk [vmem:[%s16768_s27 + $0x38] sm:$0xff] %vm9896_vm10, %v9815_v37 }
 0x4ca   : > { %v9424_v13 = vpop.permute.xlu1 %9423 }
 0x4cb   : > { %v9426_v27 = vpop.permute.xlu0 %9425  ;;  %9512 = vst.msk [vmem:[%s16768_s27 + $0x40] sm:$0xff] %vm9503_vm9, %v9424_v13 }
 0x4cc   : > { %9513 = vst.msk [vmem:[%s16768_s27 + $0x48] sm:$0xff] %vm9503_vm9, %v9426_v27 }
 0x4ce   : > { %v9817_v33 = vpop.permute.xlu1 %9816 }
 0x4cf   : > { %v9819_v54 = vpop.permute.xlu0 %9818  ;;  %9905 = vst.msk [vmem:[%s16768_s27 + $0x40] sm:$0xff] %vm9896_vm10, %v9817_v33 }
 0x4d0   : > { %9906 = vst.msk [vmem:[%s16768_s27 + $0x48] sm:$0xff] %vm9896_vm10, %v9819_v54 }
 0x4d2   : > { %v9428_v16 = vpop.permute.xlu1 %9427 }
 0x4d3   : > { %v9430_v60 = vpop.permute.xlu0 %9429  ;;  %9514 = vst.msk [vmem:[%s16768_s27 + $0x50] sm:$0xff] %vm9503_vm9, %v9428_v16 }
 0x4d4   : > { %9515 = vst.msk [vmem:[%s16768_s27 + $0x58] sm:$0xff] %vm9503_vm9, %v9430_v60 }
 0x4d6   : > { %v9821_v30 = vpop.permute.xlu1 %9820 }
 0x4d7   : > { %v9823_v55 = vpop.permute.xlu0 %9822  ;;  %9907 = vst.msk [vmem:[%s16768_s27 + $0x50] sm:$0xff] %vm9896_vm10, %v9821_v30 }
 0x4d8   : > { %9908 = vst.msk [vmem:[%s16768_s27 + $0x58] sm:$0xff] %vm9896_vm10, %v9823_v55 }
 0x4da   : > { %v9432_v51 = vpop.permute.xlu1 %9431 }
 0x4db   : > { %v9434_v32 = vpop.permute.xlu0 %9433  ;;  %9516 = vst.msk [vmem:[%s16768_s27 + $0x60] sm:$0xff] %vm9503_vm9, %v9432_v51 }
 0x4dc   : > { %9517 = vst.msk [vmem:[%s16768_s27 + $0x68] sm:$0xff] %vm9503_vm9, %v9434_v32 }
 0x4de   : > { %v9825_v35 = vpop.permute.xlu1 %9824 }
 0x4df   : > { %v9827_v31 = vpop.permute.xlu0 %9826  ;;  %9909 = vst.msk [vmem:[%s16768_s27 + $0x60] sm:$0xff] %vm9896_vm10, %v9825_v35 }
 0x4e0   : > { %9910 = vst.msk [vmem:[%s16768_s27 + $0x68] sm:$0xff] %vm9896_vm10, %v9827_v31 }
 0x4e2   : > { %v9436_v1 = vpop.permute.xlu1 %9435 }
 0x4e3   : > { %v9438_v63 = vpop.permute.xlu0 %9437  ;;  %9518 = vst.msk [vmem:[%s16768_s27 + $0x70] sm:$0xff] %vm9503_vm9, %v9436_v1 }
 0x4e4   : > { %9519 = vst.msk [vmem:[%s16768_s27 + $0x78] sm:$0xff] %vm9503_vm9, %v9438_v63 }
 0x4e6   : > { %v9829_v39 = vpop.permute.xlu1 %9828 }
 0x4e7   : > { %v9831_v5 = vpop.permute.xlu0 %9830  ;;  %9911 = vst.msk [vmem:[%s16768_s27 + $0x70] sm:$0xff] %vm9896_vm10, %v9829_v39 }
 0x4e8   : > { %9912 = vst.msk [vmem:[%s16768_s27 + $0x78] sm:$0xff] %vm9896_vm10, %v9831_v5 }
 0x4ea   : > { %v9440_v38 = vpop.permute.xlu1 %9439 }
 0x4eb   : > { %v9442_v41 = vpop.permute.xlu0 %9441  ;;  %9520 = vst.msk [vmem:[%s16768_s27 + $0x80] sm:$0xff] %vm9503_vm9, %v9440_v38 }
 0x4ec   : > { %9521 = vst.msk [vmem:[%s16768_s27 + $0x88] sm:$0xff] %vm9503_vm9, %v9442_v41 }
 0x4ee   : > { %v9833_v34 = vpop.permute.xlu1 %9832 }
 0x4ef   : > { %v9835_v9 = vpop.permute.xlu0 %9834  ;;  %9913 = vst.msk [vmem:[%s16768_s27 + $0x80] sm:$0xff] %vm9896_vm10, %v9833_v34 }
 0x4f0   : > { %9914 = vst.msk [vmem:[%s16768_s27 + $0x88] sm:$0xff] %vm9896_vm10, %v9835_v9 }
 0x4f2   : > { %v9444_v6 = vpop.permute.xlu1 %9443 }
 0x4f3   : > { %v9446_v42 = vpop.permute.xlu0 %9445  ;;  %9522 = vst.msk [vmem:[%s16768_s27 + $0x90] sm:$0xff] %vm9503_vm9, %v9444_v6 }
 0x4f4   : > { %9523 = vst.msk [vmem:[%s16768_s27 + $0x98] sm:$0xff] %vm9503_vm9, %v9446_v42 }
 0x4f6   : > { %v9837_v22 = vpop.permute.xlu1 %9836 }
 0x4f7   : > { %v9839_v47 = vpop.permute.xlu0 %9838  ;;  %9915 = vst.msk [vmem:[%s16768_s27 + $0x90] sm:$0xff] %vm9896_vm10, %v9837_v22 }
 0x4f8   : > { %9916 = vst.msk [vmem:[%s16768_s27 + $0x98] sm:$0xff] %vm9896_vm10, %v9839_v47 }
 0x4fa   : > { %v9448_v57 = vpop.permute.xlu1 %9447 }
 0x4fb   : > { %v9450_v18 = vpop.permute.xlu0 %9449  ;;  %9524 = vst.msk [vmem:[%s16768_s27 + $0xa0] sm:$0xff] %vm9503_vm9, %v9448_v57 }
 0x4fc   : > { %9525 = vst.msk [vmem:[%s16768_s27 + $0xa8] sm:$0xff] %vm9503_vm9, %v9450_v18 }
 0x4fe   : > { %v9841_v53 = vpop.permute.xlu1 %9840 }
 0x4ff   : > { %v9843_v45 = vpop.permute.xlu0 %9842  ;;  %9917 = vst.msk [vmem:[%s16768_s27 + $0xa0] sm:$0xff] %vm9896_vm10, %v9841_v53 }
 0x500   : > { %9918 = vst.msk [vmem:[%s16768_s27 + $0xa8] sm:$0xff] %vm9896_vm10, %v9843_v45 }
 0x502   : > { %v9452_v19 = vpop.permute.xlu1 %9451 }
 0x503   : > { %v9454_v62 = vpop.permute.xlu0 %9453  ;;  %9526 = vst.msk [vmem:[%s16768_s27 + $0xb0] sm:$0xff] %vm9503_vm9, %v9452_v19 }
 0x504   : > { %9527 = vst.msk [vmem:[%s16768_s27 + $0xb8] sm:$0xff] %vm9503_vm9, %v9454_v62 }
 0x506   : > { %v9845_v50 = vpop.permute.xlu1 %9844 }
 0x507   : > { %v9847_v11 = vpop.permute.xlu0 %9846  ;;  %9919 = vst.msk [vmem:[%s16768_s27 + $0xb0] sm:$0xff] %vm9896_vm10, %v9845_v50 }
 0x508   : > { %9920 = vst.msk [vmem:[%s16768_s27 + $0xb8] sm:$0xff] %vm9896_vm10, %v9847_v11 }
 0x50a   : > { %v9456_v14 = vpop.permute.xlu1 %9455 }
 0x50b   : > { %v9458_v20 = vpop.permute.xlu0 %9457  ;;  %9528 = vst.msk [vmem:[%s16768_s27 + $0xc0] sm:$0xff] %vm9503_vm9, %v9456_v14 }
 0x50c   : > { %9529 = vst.msk [vmem:[%s16768_s27 + $0xc8] sm:$0xff] %vm9503_vm9, %v9458_v20 }
 0x50e   : > { %v9849_v24 = vpop.permute.xlu1 %9848 }
 0x50f   : > { %v9851_v58 = vpop.permute.xlu0 %9850  ;;  %9921 = vst.msk [vmem:[%s16768_s27 + $0xc0] sm:$0xff] %vm9896_vm10, %v9849_v24 }
 0x510   : > { %9922 = vst.msk [vmem:[%s16768_s27 + $0xc8] sm:$0xff] %vm9896_vm10, %v9851_v58 }
 0x512   : > { %v9460_v21 = vpop.permute.xlu1 %9459 }
 0x513   : > { %v9462_v25 = vpop.permute.xlu0 %9461  ;;  %9530 = vst.msk [vmem:[%s16768_s27 + $0xd0] sm:$0xff] %vm9503_vm9, %v9460_v21 }
 0x514   : > { %9531 = vst.msk [vmem:[%s16768_s27 + $0xd8] sm:$0xff] %vm9503_vm9, %v9462_v25 }
 0x516   : > { %v9853_v48 = vpop.permute.xlu1 %9852 }
 0x517   : > { %v9855_v28 = vpop.permute.xlu0 %9854  ;;  %9923 = vst.msk [vmem:[%s16768_s27 + $0xd0] sm:$0xff] %vm9896_vm10, %v9853_v48 }
 0x518   : > { %9924 = vst.msk [vmem:[%s16768_s27 + $0xd8] sm:$0xff] %vm9896_vm10, %v9855_v28 }
 0x51a   : > { %v9464_v46 = vpop.permute.xlu1 %9463 }
 0x51b   : > { %v9466_v43 = vpop.permute.xlu0 %9465  ;;  %9532 = vst.msk [vmem:[%s16768_s27 + $0xe0] sm:$0xff] %vm9503_vm9, %v9464_v46 }
 0x51c   : > { %9533 = vst.msk [vmem:[%s16768_s27 + $0xe8] sm:$0xff] %vm9503_vm9, %v9466_v43 }
 0x51e   : > { %v9857_v56 = vpop.permute.xlu1 %9856 }
 0x51f   : > { %v9859_v59 = vpop.permute.xlu0 %9858  ;;  %9925 = vst.msk [vmem:[%s16768_s27 + $0xe0] sm:$0xff] %vm9896_vm10, %v9857_v56 }
 0x520   : > { %9926 = vst.msk [vmem:[%s16768_s27 + $0xe8] sm:$0xff] %vm9896_vm10, %v9859_v59 }
 0x522   : > { %v9468_v15 = vpop.permute.xlu1 %9467 }
 0x523   : > { %v9470_v61 = vpop.permute.xlu0 %9469  ;;  %9534 = vst.msk [vmem:[%s16768_s27 + $0xf0] sm:$0xff] %vm9503_vm9, %v9468_v15 }
 0x524   : > { %9535 = vst.msk [vmem:[%s16768_s27 + $0xf8] sm:$0xff] %vm9503_vm9, %v9470_v61 }
 0x526   : > { %v9861_v0 = vpop.permute.xlu1 %9860 }
 0x527   : > { %v9863_v29 = vpop.permute.xlu0 %9862  ;;  %9927 = vst.msk [vmem:[%s16768_s27 + $0xf0] sm:$0xff] %vm9896_vm10, %v9861_v0 }
 0x528   : > { %9928 = vst.msk [vmem:[%s16768_s27 + $0xf8] sm:$0xff] %vm9896_vm10, %v9863_v29 }
 0x529   : > { %14241 = shalt.err (!%p14238_p3)
}
 0x52a   : > { %s14242_s14 = scalar_lea.hbm %s18846_s23, 4096  ;;  %s14246_s7 = scalar_lea.hbm %s18902_s4, 8192 }
 0x52b   : > { %p14243_p4 = scmp.ne.s32.totalorder %s18846_s23, %s14242_s14  ;;  %p14247_p9 = scmp.lt.u32.totalorder %s18846_s23, %s18902_s4 }
 0x52c   : > { %p14248_p10 = scmp.lt.u32.totalorder %s14246_s7, %s14242_s14  ;;  %p14250_p12 = scmp.lt.u32.totalorder %s14242_s14, %s18846_s23 }
 0x52d   : > { %p14244_p7 = pnand %p14243_p4, %p14363_p5 }
 0x52e   : > { %p14249_p11 = por %p14248_p10, %p14247_p9 }
 0x52f   : > { %p14245_p8 = pneg %p14244_p7 }
 0x530   : > { %p14251_p13 = por %p14250_p12, %p14249_p11 }
 0x532   : > { %p14252_p0 = pnand %p14251_p13, %p14245_p8 }
 0x534   : > { %14255 = shalt.err (!%p14252_p0)
}
 0x535   : > { %s14299_s10 = smov 128  }
 0x536   : > { %14061 = dma.vmem_to_hbm [thread:$0]  (%p14363_p5), %s18848_s12, 4096, %s18846_s23, %s18856_s19, %s14299_s10, %s14299_s10, %s14295_s13  }
 0x537 PF: > { %p14067_p1 = scmp.ge.s32.totalorder %s14290_s18, 2  ;;  %s9958_s11 = sand.u32 1, %s14278_s15  }
 0x538   : > { %s9959_s20 = scalar_lea.sflag [#allocation3], %s9958_s11 }
 0x539   : > { %p14064_p2 = pnand %p14067_p1, %p14367_p6 }
 0x53b   : > { %14273 = dma.done.wait (!%p14064_p2), %s9959_s20, 4096  }
 0x53c   : > { %14275 = vsyncadd (!%p14064_p2), %s9959_s20, 4294963200  ;;  %p14_p3 = scmp.ge.s32.totalorder %s14350_s21, 4   ;;  %s19608_s15 = smov %s14282_s16 }
 0x53d   : > { %s19609_s16 = smov %s14286_s17  ;;  %s19610_s17 = smov %s14361_s24 }
 0x53e   : > { %s19611_s18 = smov %s14350_s21  ;;  %16 = sbr.rel (!%p14_p3) target bundleno = 3 (0x3), region = 97 }
 0x545   :  { %9964 = vsyncpa [#allocation3], 1 }
 0x546   :  { %9966 = vsyncpa [#allocation3 + $0x1], 1 }

</bundles_post_ra>
